<compile_context>
chip_gen: v7x
topology: tpu7x:2x2x1
jax: 0.10.0
libtpu: 0.0.40
codegen_flags: <defaults>
</compile_context>

<pallas_src>
import functools

import jax
import jax.numpy as jnp
import numpy as np
from jax.experimental import pallas as pl
from jax.experimental.pallas import tpu as pltpu

_BN_EPS = 1e-5
_SELU_ALPHA = 1.6732632423543772
_SELU_SCALE = 1.0507009873554805
_HI = jax.lax.Precision.HIGHEST  # reference only


def _round_up(x, m):
    return (x + m - 1) // m * m


def _selu(x):
    neg = _SELU_ALPHA * (jnp.exp(jnp.minimum(x, 0.0)) - 1.0)
    return _SELU_SCALE * jnp.where(x > 0, x, neg)


# ----------------------------------------------------------------------------
# Kernel
# ----------------------------------------------------------------------------
def _i2cmse_kernel(x_ref, w1_ref, w2_ref, bns_ref, bnb_ref, o_ref, *,
                   TB, C, C2, L, ks, k_max, c1_pad, c2_pad):
    # Loop-invariant operands, loaded once per grid step.
    w1 = w1_ref[...]                       # (3*C2, k_max*c1_pad)     bf16
    w2 = w2_ref[...]                       # (3*C2, sum_n k_n*c2_pad) bf16
    bn_scale = bns_ref[...]                # (3*C2, 1) f32 (permuted, folded BN)
    bn_bias = bnb_ref[...]

    def chan_pad(a, rows):
        if a.shape[0] == rows:
            return a
        z = jnp.zeros((rows - a.shape[0], a.shape[1]), a.dtype)
        return jnp.concatenate([a, z], axis=0)

    def im2col(a, k):
        """(rows, L) -> (k*rows, L): 'same' zero padding, tap-major rows."""
        pad = (k - 1) // 2
        if pad:
            z = jnp.zeros((a.shape[0], pad), a.dtype)
            a = jnp.concatenate([z, a, z], axis=1)
        # TODO(synk): switch the per-tap lane shifts to pltpu.roll (XLU slot).
        return jnp.concatenate([a[:, j:j + L] for j in range(k)], axis=0)

    def sample(b, carry):
        x = x_ref[b]                                             # (C, L) f32

        # ---- stage 1: ONE shared 21-tap im2col + ONE fused matmul ----------
        x1_taps = im2col(chan_pad(x, c1_pad), k_max)             # (k_max*c1_pad, L)
        s1 = jnp.dot(w1, x1_taps.astype(jnp.bfloat16),
                     preferred_element_type=jnp.float32)         # (3*C2, L)

        # ---- stage 2: per-branch im2col stacked on K, ONE fused matmul -----
        blocks = [im2col(chan_pad(s1[n * C2:(n + 1) * C2], c2_pad), k)
                  for n, k in enumerate(ks)]
        x2_taps = jnp.concatenate(blocks, axis=0)                # (sum k*c2_pad, L)
        y = jnp.dot(w2, x2_taps.astype(jnp.bfloat16),
                    preferred_element_type=jnp.float32)          # (6C, L), final order
        y = _selu(y * bn_scale + bn_bias)                        # folded eval BN + SELU

        o_ref[b] = y.astype(o_ref.dtype)                         # one dense store
        return carry

    jax.lax.fori_loop(0, TB, sample, 0)


# ----------------------------------------------------------------------------
# Parameter construction / packing (done once, outside the hot path)
# ----------------------------------------------------------------------------
def init_i2cv2_params(key, in_planes, groups, rate, k, flag):
    """Synthetic params matching the PyTorch module's _init_weights."""
    gw = in_planes // groups
    C_local = (groups - 1) * gw
    k1, k2, k3 = jax.random.split(key, 3)

    def kaiming(kk, shape):
        fan_in = shape[1] * (shape[2] if len(shape) > 2 else 1)
        std = (2.0 / fan_in) ** 0.5
        return jax.random.normal(kk, shape, jnp.float32) * std

    params = dict(
        groups=groups, in_planes=in_planes, rate=rate, k=k, flag=flag,
        w_g1=kaiming(k1, (gw * rate, C_local, 1)),               # global_conv1
        w_g2=kaiming(k2, (gw * rate, gw * (rate + 1), 1)),       # global_conv2
        w_loc=kaiming(k3, (C_local * rate, gw, k)),              # local_conv
    )
    if flag:  # BatchNorm1d: gamma=1, beta=0, running_mean=0, running_var=1
        C_out = in_planes * rate
        params.update(
            bn_gamma=jnp.ones((C_out,), jnp.float32),
            bn_beta=jnp.zeros((C_out,), jnp.float32),
            bn_mean=jnp.zeros((C_out,), jnp.float32),
            bn_var=jnp.ones((C_out,), jnp.float32),
        )
    return params


def _pack_stage_weight(p, k_grid, c_pad):
    """One full I2Cv2 stage (grouped local conv + FOLDED 2x1x1 global path) as
    one tap-stacked weight W of shape (C_in*rate, k_grid*c_pad) such that
        out = W @ x_taps ,  x_taps[j*c_pad + c, l] = x_pad[c, l + j - (k_grid-1)//2]
    with x zero-padded to c_pad channels and out rows = [local | global]."""
    G, C, rate, k = p['groups'], p['in_planes'], p['rate'], p['k']
    gw = C // G
    C_local = (G - 1) * gw
    out_local = C_local * rate
    opg = gw * rate                                  # local out channels / group
    off = (k_grid - 1) // 2 - (k - 1) // 2           # tap j = conv tap t + off

    W = np.zeros((C * rate, k_grid, c_pad), np.float32)
    w_loc = np.asarray(p['w_loc'], np.float32).reshape(G - 1, opg, gw, k)
    for g in range(G - 1):
        W[g * opg:(g + 1) * opg, off:off + k, g * gw:(g + 1) * gw] = \
            np.transpose(w_loc[g], (0, 2, 1))        # (oo, t, ci)

    # Folded global path: g2 = Wg2[:, :gw] @ glob + (Wg2[:, gw:] @ Wg1) @ local,
    # embedded at the centre tap (1x1 convs -> zero spatial offset).
    wg1 = np.asarray(p['w_g1'], np.float32)[:, :, 0]             # (gw*rate, C_local)
    wg2 = np.asarray(p['w_g2'], np.float32)[:, :, 0]             # (gw*rate, gw*(rate+1))
    ctr = (k_grid - 1) // 2
    W[out_local:, ctr, :C_local] = wg2[:, gw:] @ wg1
    W[out_local:, ctr, C_local:C] = wg2[:, :gw]
    return W.reshape(C * rate, k_grid * c_pad)


def pack_i2cmse(branch_params):
    """Pack all 6 I2Cv2 stages into two fused matmul weights + folded BN.

    w1 : (3*2C, k_max*c1_pad)      bf16 -- 3 stage-1 blocks stacked on M,
                                           sharing one k_max-tap im2col of x.
    w2 : (6C, sum_n k_n*c2_pad)    bf16 -- block-column per branch, rows already
                                           permuted into the final interleaved
                                           output channel order.
    bn_scale / bn_bias : (6C, 1)   f32  -- folded eval-mode BN, same permutation.
    """
    G = branch_params[0][0]['groups']
    C = branch_params[0][0]['in_planes']
    expansion = branch_params[0][0]['rate']
    ks = tuple(p1['k'] for (p1, _p2) in branch_params)
    nb = len(ks)
    gw = C // G
    gwe = gw * expansion
    C2 = C * expansion
    c1_pad = _round_up(C, 8)
    c2_pad = _round_up(C2, 8)
    k_max = max(ks)

    w1 = np.concatenate(
        [_pack_stage_weight(p1, k_max, c1_pad) for (p1, _p2) in branch_params],
        axis=0)                                                   # (nb*C2, k_max*c1_pad)

    col_off = np.cumsum([0] + [k * c2_pad for k in ks])
    C_out = nb * C2
    w2 = np.zeros((C_out, int(col_off[-1])), np.float32)
    bn_scale = np.zeros((C_out, 1), np.float32)
    bn_bias = np.zeros((C_out, 1), np.float32)
    for n, (_p1, p2) in enumerate(branch_params):
        v = _pack_stage_weight(p2, ks[n], c2_pad)                 # (C2, k_n*c2_pad)
        scale = (np.asarray(p2['bn_gamma'], np.float32)
                 / np.sqrt(np.asarray(p2['bn_var'], np.float32) + _BN_EPS))
        bias = (np.asarray(p2['bn_beta'], np.float32)
                - np.asarray(p2['bn_mean'], np.float32) * scale)
        for i in range(G):                                        # final interleave
            dst = slice(i * nb * gwe + n * gwe, i * nb * gwe + (n + 1) * gwe)
            src = slice(i * gwe, (i + 1) * gwe)
            w2[dst, int(col_off[n]):int(col_off[n + 1])] = v[src]
            bn_scale[dst, 0] = scale[src]
            bn_bias[dst, 0] = bias[src]

    meta = dict(groups=G, in_planes=C, expansion=expansion, ks=ks,
                c1_pad=c1_pad, c2_pad=c2_pad, k_max=k_max)
    packed = (jnp.asarray(w1, jnp.bfloat16), jnp.asarray(w2, jnp.bfloat16),
              jnp.asarray(bn_scale), jnp.asarray(bn_bias))
    return meta, packed


# ----------------------------------------------------------------------------
# Pallas wrapper
# ----------------------------------------------------------------------------
def i2cmse_forward(x, meta, packed, *, tb=None):
    B, C, L = x.shape
    G = meta['groups']
    assert C == meta['in_planes'] and C % G == 0
    expansion = meta['expansion']
    ks = meta['ks']
    nb = len(ks)
    C2 = C * expansion
    C_out = nb * C2
    w1, w2, bns, bnb = packed

    if tb is None:  # largest divisor of B that is <= 8 (batch-tiled grid)
        tb = max(d for d in range(1, min(B, 8) + 1) if B % d == 0)
    assert B % tb == 0

    kernel = functools.partial(
        _i2cmse_kernel, TB=tb, C=C, C2=C2, L=L, ks=ks,
        k_max=meta['k_max'], c1_pad=meta['c1_pad'], c2_pad=meta['c2_pad'])

    flops = int(2 * B * L * (w1.shape[0] * w1.shape[1]
                             + w2.shape[0] * w2.shape[1]))
    bytes_accessed = int(x.size * x.dtype.itemsize + B * C_out * L * 4
                         + sum(int(a.size) * a.dtype.itemsize for a in packed))
    cost = pl.CostEstimate(flops=flops,
                           transcendentals=int(B * C_out * L),
                           bytes_accessed=bytes_accessed)

    return pl.pallas_call(
        kernel,
        out_shape=jax.ShapeDtypeStruct((B, C_out, L), jnp.float32),
        grid=(B // tb,),
        in_specs=[
            pl.BlockSpec((tb, C, L), lambda i: (i, 0, 0)),
            pl.BlockSpec(w1.shape, lambda i: (0, 0)),
            pl.BlockSpec(w2.shape, lambda i: (0, 0)),
            pl.BlockSpec(bns.shape, lambda i: (0, 0)),
            pl.BlockSpec(bnb.shape, lambda i: (0, 0)),
        ],
        out_specs=pl.BlockSpec((tb, C_out, L), lambda i: (i, 0, 0)),
        compiler_params=pltpu.CompilerParams(
            dimension_semantics=("parallel",)),   # megacore split on v7x
        cost_estimate=cost,
    )(x, w1, w2, bns, bnb)


# ----------------------------------------------------------------------------
# Pure-JAX reference (faithful to the PyTorch forward, eval-mode BN)
# ----------------------------------------------------------------------------
def _conv1d_ref(x, w, padding, groups):
    return jax.lax.conv_general_dilated(
        x, w, window_strides=(1,), padding=[(padding, padding)],
        dimension_numbers=('NCH', 'OIH', 'NCH'),
        feature_group_count=groups, precision=_HI)


def _i2cv2_ref(x, p):
    G, C, rate, k = p['groups'], p['in_planes'], p['rate'], p['k']
    gw = C // G
    C_local = (G - 1) * gw
    local = x[:, :C_local, :]
    glob = x[:, C_local:, :]
    g1 = _conv1d_ref(local, p['w_g1'], padding=0, groups=1)
    gcat = jnp.concatenate([glob, g1], axis=1)
    g2 = _conv1d_ref(gcat, p['w_g2'], padding=0, groups=1)
    lout = _conv1d_ref(local, p['w_loc'], padding=(k - 1) // 2, groups=G - 1)
    out = jnp.concatenate([lout, g2], axis=1)
    if p['flag']:
        inv = 1.0 / jnp.sqrt(p['bn_var'] + _BN_EPS)
        out = ((out - p['bn_mean'][None, :, None]) * inv[None, :, None]
               * p['bn_gamma'][None, :, None] + p['bn_beta'][None, :, None])
        out = _SELU_SCALE * jnp.where(
            out > 0, out,
            _SELU_ALPHA * (jnp.exp(jnp.minimum(out, 0.0)) - 1.0))
    return out


def i2cmse_ref(x, branch_params):
    G = branch_params[0][0]['groups']
    C = x.shape[1]
    gw = C // G
    gwe = branch_params[0][0]['rate'] * gw
    bouts = [_i2cv2_ref(_i2cv2_ref(x, p1), p2) for (p1, p2) in branch_params]
    chunks = []
    for i in range(G):
        for bo in bouts:
            chunks.append(bo[:, i * gwe:(i + 1) * gwe, :])
    return jnp.concatenate(chunks, axis=1)


# ----------------------------------------------------------------------------
if __name__ == "__main__":
    # Shapes consistent with the module: groups=11 -> in_planes=22
    # (group_width=2), expansion=2, kernel sizes (5, 11, 21), lane-dense L=128.
    B = 2
    groups = 11
    in_planes = 22
    L = 128
    expansion = 2
    ks = (5, 11, 21)

    key = jax.random.PRNGKey(0)
    kx, *wkeys = jax.random.split(key, 1 + 2 * len(ks))
    x = jax.random.normal(kx, (B, in_planes, L), dtype=jnp.float32)

    branch_params = []
    for n, k in enumerate(ks):
        p1 = init_i2cv2_params(wkeys[2 * n], in_planes, groups,
                               rate=expansion, k=k, flag=False)
        p2 = init_i2cv2_params(wkeys[2 * n + 1], in_planes * expansion, groups,
                               rate=1, k=k, flag=True)
        branch_params.append((p1, p2))

    meta, packed = pack_i2cmse(branch_params)

    out = jax.block_until_ready(i2cmse_forward(x, meta, packed))
    ref = i2cmse_ref(x, branch_params)

    assert out.shape == (B, len(ks) * expansion * in_planes, L)
    max_abs = float(jnp.max(jnp.abs(out - ref)))
    ref_scale = float(jnp.max(jnp.abs(ref)))
    # bf16 MXU operands (f32 accumulation): allow ~2% of the output scale.
    assert max_abs <= 2e-2 * ref_scale + 1e-3, (
        f"mismatch: max_abs_err={max_abs}, ref_scale={ref_scale}")

    print("KERNEL_OK")
</pallas_src>

<mosaic_0001>
module attributes {stable_mosaic.version = 11 : i64} {
  func.func @_i2cmse_kernel(%arg0: i32, %arg1: memref<2x22x128xf32, #tpu.memory_space<vmem>>, %arg2: memref<132x504xbf16, #tpu.memory_space<vmem>>, %arg3: memref<132x1776xbf16, #tpu.memory_space<vmem>>, %arg4: memref<132x1xf32, #tpu.memory_space<vmem>>, %arg5: memref<132x1xf32, #tpu.memory_space<vmem>>, %arg6: memref<2x132x128xf32, #tpu.memory_space<vmem>>) attributes {dimension_semantics = [#tpu.dimension_semantics<parallel>], iteration_bounds = array<i64: 1>, scalar_prefetch = 0 : i64, scratch_operands = 0 : i64, tpu.core_type = #tpu.core_type<tc>, window_params = [{transform_indices = @transform_0, window_bounds = array<i64: 2, 22, 128>}, {pipeline_mode = #tpu.pipeline_mode<synchronous>, transform_indices = @transform_1, window_bounds = array<i64: 132, 504>}, {pipeline_mode = #tpu.pipeline_mode<synchronous>, transform_indices = @transform_2, window_bounds = array<i64: 132, 1776>}, {pipeline_mode = #tpu.pipeline_mode<synchronous>, transform_indices = @transform_3, window_bounds = array<i64: 132, 1>}, {pipeline_mode = #tpu.pipeline_mode<synchronous>, transform_indices = @transform_4, window_bounds = array<i64: 132, 1>}, {transform_indices = @transform_5, window_bounds = array<i64: 2, 132, 128>}]} {
    %c0 = arith.constant 0 : index
    %c0_0 = arith.constant 0 : index
    %0 = vector.load %arg2[%c0, %c0_0] : memref<132x504xbf16, #tpu.memory_space<vmem>>, vector<132x504xbf16>
    %c0_1 = arith.constant 0 : index
    %c0_2 = arith.constant 0 : index
    %1 = vector.load %arg3[%c0_1, %c0_2] : memref<132x1776xbf16, #tpu.memory_space<vmem>>, vector<132x1776xbf16>
    %c0_3 = arith.constant 0 : index
    %c0_4 = arith.constant 0 : index
    %2 = vector.load %arg4[%c0_3, %c0_4] : memref<132x1xf32, #tpu.memory_space<vmem>>, vector<132x1xf32>
    %c0_5 = arith.constant 0 : index
    %c0_6 = arith.constant 0 : index
    %3 = vector.load %arg5[%c0_5, %c0_6] : memref<132x1xf32, #tpu.memory_space<vmem>>, vector<132x1xf32>
    %c0_i32 = arith.constant 0 : i32
    %c2_i32 = arith.constant 2 : i32
    %4 = arith.addi %c0_i32, %c2_i32 : i32
    %c1_i32 = arith.constant 1 : i32
    scf.for %arg7 = %c0_i32 to %4 step %c1_i32  : i32 {
      %5 = arith.index_cast %arg7 : i32 to index
      %c0_8 = arith.constant 0 : index
      %c0_9 = arith.constant 0 : index
      %6 = vector.load %arg1[%5, %c0_8, %c0_9] : memref<2x22x128xf32, #tpu.memory_space<vmem>>, vector<1x22x128xf32>
      %7 = vector.shape_cast %6 : vector<1x22x128xf32> to vector<22x128xf32>
      %cst = arith.constant 0.000000e+00 : f32
      %8 = vector.broadcast %cst : f32 to vector<2x128xf32>
      %9 = tpu.concatenate %7, %8 in 0 : vector<22x128xf32>, vector<2x128xf32> -> vector<24x128xf32>
      %cst_10 = arith.constant 0.000000e+00 : f32
      %10 = vector.broadcast %cst_10 : f32 to vector<24x10xf32>
      %11 = tpu.concatenate %10, %9, %10 in 1 : vector<24x10xf32>, vector<24x128xf32>, vector<24x10xf32> -> vector<24x148xf32>
      %12 = vector.extract_strided_slice %11 {offsets = [0, 0], sizes = [24, 128], strides = [1, 1]} : vector<24x148xf32> to vector<24x128xf32>
      %13 = vector.extract_strided_slice %11 {offsets = [0, 1], sizes = [24, 128], strides = [1, 1]} : vector<24x148xf32> to vector<24x128xf32>
      %14 = vector.extract_strided_slice %11 {offsets = [0, 2], sizes = [24, 128], strides = [1, 1]} : vector<24x148xf32> to vector<24x128xf32>
      %15 = vector.extract_strided_slice %11 {offsets = [0, 3], sizes = [24, 128], strides = [1, 1]} : vector<24x148xf32> to vector<24x128xf32>
      %16 = vector.extract_strided_slice %11 {offsets = [0, 4], sizes = [24, 128], strides = [1, 1]} : vector<24x148xf32> to vector<24x128xf32>
      %17 = vector.extract_strided_slice %11 {offsets = [0, 5], sizes = [24, 128], strides = [1, 1]} : vector<24x148xf32> to vector<24x128xf32>
      %18 = vector.extract_strided_slice %11 {offsets = [0, 6], sizes = [24, 128], strides = [1, 1]} : vector<24x148xf32> to vector<24x128xf32>
      %19 = vector.extract_strided_slice %11 {offsets = [0, 7], sizes = [24, 128], strides = [1, 1]} : vector<24x148xf32> to vector<24x128xf32>
      %20 = vector.extract_strided_slice %11 {offsets = [0, 8], sizes = [24, 128], strides = [1, 1]} : vector<24x148xf32> to vector<24x128xf32>
      %21 = vector.extract_strided_slice %11 {offsets = [0, 9], sizes = [24, 128], strides = [1, 1]} : vector<24x148xf32> to vector<24x128xf32>
      %22 = vector.extract_strided_slice %11 {offsets = [0, 10], sizes = [24, 128], strides = [1, 1]} : vector<24x148xf32> to vector<24x128xf32>
      %23 = vector.extract_strided_slice %11 {offsets = [0, 11], sizes = [24, 128], strides = [1, 1]} : vector<24x148xf32> to vector<24x128xf32>
      %24 = vector.extract_strided_slice %11 {offsets = [0, 12], sizes = [24, 128], strides = [1, 1]} : vector<24x148xf32> to vector<24x128xf32>
      %25 = vector.extract_strided_slice %11 {offsets = [0, 13], sizes = [24, 128], strides = [1, 1]} : vector<24x148xf32> to vector<24x128xf32>
      %26 = vector.extract_strided_slice %11 {offsets = [0, 14], sizes = [24, 128], strides = [1, 1]} : vector<24x148xf32> to vector<24x128xf32>
      %27 = vector.extract_strided_slice %11 {offsets = [0, 15], sizes = [24, 128], strides = [1, 1]} : vector<24x148xf32> to vector<24x128xf32>
      %28 = vector.extract_strided_slice %11 {offsets = [0, 16], sizes = [24, 128], strides = [1, 1]} : vector<24x148xf32> to vector<24x128xf32>
      %29 = vector.extract_strided_slice %11 {offsets = [0, 17], sizes = [24, 128], strides = [1, 1]} : vector<24x148xf32> to vector<24x128xf32>
      %30 = vector.extract_strided_slice %11 {offsets = [0, 18], sizes = [24, 128], strides = [1, 1]} : vector<24x148xf32> to vector<24x128xf32>
      %31 = vector.extract_strided_slice %11 {offsets = [0, 19], sizes = [24, 128], strides = [1, 1]} : vector<24x148xf32> to vector<24x128xf32>
      %32 = vector.extract_strided_slice %11 {offsets = [0, 20], sizes = [24, 128], strides = [1, 1]} : vector<24x148xf32> to vector<24x128xf32>
      %33 = tpu.concatenate %12, %13, %14, %15, %16, %17, %18, %19, %20, %21, %22, %23, %24, %25, %26, %27 in 0 : vector<24x128xf32>, vector<24x128xf32>, vector<24x128xf32>, vector<24x128xf32>, vector<24x128xf32>, vector<24x128xf32>, vector<24x128xf32>, vector<24x128xf32>, vector<24x128xf32>, vector<24x128xf32>, vector<24x128xf32>, vector<24x128xf32>, vector<24x128xf32>, vector<24x128xf32>, vector<24x128xf32>, vector<24x128xf32> -> vector<384x128xf32>
      %34 = tpu.concatenate %28, %29, %30, %31, %32 in 0 : vector<24x128xf32>, vector<24x128xf32>, vector<24x128xf32>, vector<24x128xf32>, vector<24x128xf32> -> vector<120x128xf32>
      %35 = tpu.concatenate %33, %34 in 0 : vector<384x128xf32>, vector<120x128xf32> -> vector<504x128xf32>
      %36 = arith.truncf %35 : vector<504x128xf32> to vector<504x128xbf16>
      %cst_11 = arith.constant dense<0.000000e+00> : vector<132x128xf32>
      %37 = tpu.matmul %0, %36, %cst_11 {dimension_numbers = #tpu.dot_dimension_numbers<[1], [0], [0], [1], [0, 0, 1, 1], [], []>} : vector<132x504xbf16>, vector<504x128xbf16>, vector<132x128xf32> -> vector<132x128xf32>
      %38 = vector.extract_strided_slice %37 {offsets = [0, 0], sizes = [44, 128], strides = [1, 1]} : vector<132x128xf32> to vector<44x128xf32>
      %cst_12 = arith.constant 0.000000e+00 : f32
      %39 = vector.broadcast %cst_12 : f32 to vector<4x128xf32>
      %40 = tpu.concatenate %38, %39 in 0 : vector<44x128xf32>, vector<4x128xf32> -> vector<48x128xf32>
      %cst_13 = arith.constant 0.000000e+00 : f32
      %41 = vector.broadcast %cst_13 : f32 to vector<48x2xf32>
      %42 = tpu.concatenate %41, %40, %41 in 1 : vector<48x2xf32>, vector<48x128xf32>, vector<48x2xf32> -> vector<48x132xf32>
      %43 = vector.extract_strided_slice %42 {offsets = [0, 0], sizes = [48, 128], strides = [1, 1]} : vector<48x132xf32> to vector<48x128xf32>
      %44 = vector.extract_strided_slice %42 {offsets = [0, 1], sizes = [48, 128], strides = [1, 1]} : vector<48x132xf32> to vector<48x128xf32>
      %45 = vector.extract_strided_slice %42 {offsets = [0, 2], sizes = [48, 128], strides = [1, 1]} : vector<48x132xf32> to vector<48x128xf32>
      %46 = vector.extract_strided_slice %42 {offsets = [0, 3], sizes = [48, 128], strides = [1, 1]} : vector<48x132xf32> to vector<48x128xf32>
      %47 = vector.extract_strided_slice %42 {offsets = [0, 4], sizes = [48, 128], strides = [1, 1]} : vector<48x132xf32> to vector<48x128xf32>
      %48 = tpu.concatenate %43, %44, %45, %46, %47 in 0 : vector<48x128xf32>, vector<48x128xf32>, vector<48x128xf32>, vector<48x128xf32>, vector<48x128xf32> -> vector<240x128xf32>
      %49 = vector.extract_strided_slice %37 {offsets = [44, 0], sizes = [44, 128], strides = [1, 1]} : vector<132x128xf32> to vector<44x128xf32>
      %cst_14 = arith.constant 0.000000e+00 : f32
      %50 = vector.broadcast %cst_14 : f32 to vector<4x128xf32>
      %51 = tpu.concatenate %49, %50 in 0 : vector<44x128xf32>, vector<4x128xf32> -> vector<48x128xf32>
      %cst_15 = arith.constant 0.000000e+00 : f32
      %52 = vector.broadcast %cst_15 : f32 to vector<48x5xf32>
      %53 = tpu.concatenate %52, %51, %52 in 1 : vector<48x5xf32>, vector<48x128xf32>, vector<48x5xf32> -> vector<48x138xf32>
      %54 = vector.extract_strided_slice %53 {offsets = [0, 0], sizes = [48, 128], strides = [1, 1]} : vector<48x138xf32> to vector<48x128xf32>
      %55 = vector.extract_strided_slice %53 {offsets = [0, 1], sizes = [48, 128], strides = [1, 1]} : vector<48x138xf32> to vector<48x128xf32>
      %56 = vector.extract_strided_slice %53 {offsets = [0, 2], sizes = [48, 128], strides = [1, 1]} : vector<48x138xf32> to vector<48x128xf32>
      %57 = vector.extract_strided_slice %53 {offsets = [0, 3], sizes = [48, 128], strides = [1, 1]} : vector<48x138xf32> to vector<48x128xf32>
      %58 = vector.extract_strided_slice %53 {offsets = [0, 4], sizes = [48, 128], strides = [1, 1]} : vector<48x138xf32> to vector<48x128xf32>
      %59 = vector.extract_strided_slice %53 {offsets = [0, 5], sizes = [48, 128], strides = [1, 1]} : vector<48x138xf32> to vector<48x128xf32>
      %60 = vector.extract_strided_slice %53 {offsets = [0, 6], sizes = [48, 128], strides = [1, 1]} : vector<48x138xf32> to vector<48x128xf32>
      %61 = vector.extract_strided_slice %53 {offsets = [0, 7], sizes = [48, 128], strides = [1, 1]} : vector<48x138xf32> to vector<48x128xf32>
      %62 = vector.extract_strided_slice %53 {offsets = [0, 8], sizes = [48, 128], strides = [1, 1]} : vector<48x138xf32> to vector<48x128xf32>
      %63 = vector.extract_strided_slice %53 {offsets = [0, 9], sizes = [48, 128], strides = [1, 1]} : vector<48x138xf32> to vector<48x128xf32>
      %64 = vector.extract_strided_slice %53 {offsets = [0, 10], sizes = [48, 128], strides = [1, 1]} : vector<48x138xf32> to vector<48x128xf32>
      %65 = tpu.concatenate %54, %55, %56, %57, %58, %59, %60, %61, %62, %63, %64 in 0 : vector<48x128xf32>, vector<48x128xf32>, vector<48x128xf32>, vector<48x128xf32>, vector<48x128xf32>, vector<48x128xf32>, vector<48x128xf32>, vector<48x128xf32>, vector<48x128xf32>, vector<48x128xf32>, vector<48x128xf32> -> vector<528x128xf32>
      %66 = vector.extract_strided_slice %37 {offsets = [88, 0], sizes = [44, 128], strides = [1, 1]} : vector<132x128xf32> to vector<44x128xf32>
      %cst_16 = arith.constant 0.000000e+00 : f32
      %67 = vector.broadcast %cst_16 : f32 to vector<4x128xf32>
      %68 = tpu.concatenate %66, %67 in 0 : vector<44x128xf32>, vector<4x128xf32> -> vector<48x128xf32>
      %cst_17 = arith.constant 0.000000e+00 : f32
      %69 = vector.broadcast %cst_17 : f32 to vector<48x10xf32>
      %70 = tpu.concatenate %69, %68, %69 in 1 : vector<48x10xf32>, vector<48x128xf32>, vector<48x10xf32> -> vector<48x148xf32>
      %71 = vector.extract_strided_slice %70 {offsets = [0, 0], sizes = [48, 128], strides = [1, 1]} : vector<48x148xf32> to vector<48x128xf32>
      %72 = vector.extract_strided_slice %70 {offsets = [0, 1], sizes = [48, 128], strides = [1, 1]} : vector<48x148xf32> to vector<48x128xf32>
      %73 = vector.extract_strided_slice %70 {offsets = [0, 2], sizes = [48, 128], strides = [1, 1]} : vector<48x148xf32> to vector<48x128xf32>
      %74 = vector.extract_strided_slice %70 {offsets = [0, 3], sizes = [48, 128], strides = [1, 1]} : vector<48x148xf32> to vector<48x128xf32>
      %75 = vector.extract_strided_slice %70 {offsets = [0, 4], sizes = [48, 128], strides = [1, 1]} : vector<48x148xf32> to vector<48x128xf32>
      %76 = vector.extract_strided_slice %70 {offsets = [0, 5], sizes = [48, 128], strides = [1, 1]} : vector<48x148xf32> to vector<48x128xf32>
      %77 = vector.extract_strided_slice %70 {offsets = [0, 6], sizes = [48, 128], strides = [1, 1]} : vector<48x148xf32> to vector<48x128xf32>
      %78 = vector.extract_strided_slice %70 {offsets = [0, 7], sizes = [48, 128], strides = [1, 1]} : vector<48x148xf32> to vector<48x128xf32>
      %79 = vector.extract_strided_slice %70 {offsets = [0, 8], sizes = [48, 128], strides = [1, 1]} : vector<48x148xf32> to vector<48x128xf32>
      %80 = vector.extract_strided_slice %70 {offsets = [0, 9], sizes = [48, 128], strides = [1, 1]} : vector<48x148xf32> to vector<48x128xf32>
      %81 = vector.extract_strided_slice %70 {offsets = [0, 10], sizes = [48, 128], strides = [1, 1]} : vector<48x148xf32> to vector<48x128xf32>
      %82 = vector.extract_strided_slice %70 {offsets = [0, 11], sizes = [48, 128], strides = [1, 1]} : vector<48x148xf32> to vector<48x128xf32>
      %83 = vector.extract_strided_slice %70 {offsets = [0, 12], sizes = [48, 128], strides = [1, 1]} : vector<48x148xf32> to vector<48x128xf32>
      %84 = vector.extract_strided_slice %70 {offsets = [0, 13], sizes = [48, 128], strides = [1, 1]} : vector<48x148xf32> to vector<48x128xf32>
      %85 = vector.extract_strided_slice %70 {offsets = [0, 14], sizes = [48, 128], strides = [1, 1]} : vector<48x148xf32> to vector<48x128xf32>
      %86 = vector.extract_strided_slice %70 {offsets = [0, 15], sizes = [48, 128], strides = [1, 1]} : vector<48x148xf32> to vector<48x128xf32>
      %87 = vector.extract_strided_slice %70 {offsets = [0, 16], sizes = [48, 128], strides = [1, 1]} : vector<48x148xf32> to vector<48x128xf32>
      %88 = vector.extract_strided_slice %70 {offsets = [0, 17], sizes = [48, 128], strides = [1, 1]} : vector<48x148xf32> to vector<48x128xf32>
      %89 = vector.extract_strided_slice %70 {offsets = [0, 18], sizes = [48, 128], strides = [1, 1]} : vector<48x148xf32> to vector<48x128xf32>
      %90 = vector.extract_strided_slice %70 {offsets = [0, 19], sizes = [48, 128], strides = [1, 1]} : vector<48x148xf32> to vector<48x128xf32>
      %91 = vector.extract_strided_slice %70 {offsets = [0, 20], sizes = [48, 128], strides = [1, 1]} : vector<48x148xf32> to vector<48x128xf32>
      %92 = tpu.concatenate %71, %72, %73, %74, %75, %76, %77, %78, %79, %80, %81, %82, %83, %84, %85, %86 in 0 : vector<48x128xf32>, vector<48x128xf32>, vector<48x128xf32>, vector<48x128xf32>, vector<48x128xf32>, vector<48x128xf32>, vector<48x128xf32>, vector<48x128xf32>, vector<48x128xf32>, vector<48x128xf32>, vector<48x128xf32>, vector<48x128xf32>, vector<48x128xf32>, vector<48x128xf32>, vector<48x128xf32>, vector<48x128xf32> -> vector<768x128xf32>
      %93 = tpu.concatenate %87, %88, %89, %90, %91 in 0 : vector<48x128xf32>, vector<48x128xf32>, vector<48x128xf32>, vector<48x128xf32>, vector<48x128xf32> -> vector<240x128xf32>
      %94 = tpu.concatenate %92, %93 in 0 : vector<768x128xf32>, vector<240x128xf32> -> vector<1008x128xf32>
      %95 = tpu.concatenate %48, %65, %94 in 0 : vector<240x128xf32>, vector<528x128xf32>, vector<1008x128xf32> -> vector<1776x128xf32>
      %96 = arith.truncf %95 : vector<1776x128xf32> to vector<1776x128xbf16>
      %cst_18 = arith.constant dense<0.000000e+00> : vector<132x128xf32>
      %97 = tpu.matmul %1, %96, %cst_18 {dimension_numbers = #tpu.dot_dimension_numbers<[1], [0], [0], [1], [0, 0, 1, 1], [], []>} : vector<132x1776xbf16>, vector<1776x128xbf16>, vector<132x128xf32> -> vector<132x128xf32>
      %98 = vector.broadcast %2 : vector<132x1xf32> to vector<132x128xf32>
      %99 = arith.mulf %97, %98 : vector<132x128xf32>
      %100 = vector.broadcast %3 : vector<132x1xf32> to vector<132x128xf32>
      %101 = arith.addf %99, %100 : vector<132x128xf32>
      %cst_19 = arith.constant 0.000000e+00 : f32
      %102 = vector.broadcast %cst_19 : f32 to vector<132x128xf32>
      %103 = arith.minimumf %101, %102 : vector<132x128xf32>
      %104 = math.exp %103 : vector<132x128xf32>
      %cst_20 = arith.constant 1.000000e+00 : f32
      %105 = vector.broadcast %cst_20 : f32 to vector<132x128xf32>
      %106 = arith.subf %104, %105 : vector<132x128xf32>
      %cst_21 = arith.constant 1.67326319 : f32
      %107 = vector.broadcast %cst_21 : f32 to vector<132x128xf32>
      %108 = arith.mulf %107, %106 : vector<132x128xf32>
      %cst_22 = arith.constant 0.000000e+00 : f32
      %109 = vector.broadcast %cst_22 : f32 to vector<132x128xf32>
      %110 = arith.cmpf ogt, %101, %109 : vector<132x128xf32>
      %111 = arith.select %110, %101, %108 : vector<132x128xi1>, vector<132x128xf32>
      %cst_23 = arith.constant 1.05070102 : f32
      %112 = vector.broadcast %cst_23 : f32 to vector<132x128xf32>
      %113 = arith.mulf %112, %111 : vector<132x128xf32>
      %114 = arith.index_cast %arg7 : i32 to index
      %c0_24 = arith.constant 0 : index
      %c0_25 = arith.constant 0 : index
      %115 = vector.load %arg6[%114, %c0_24, %c0_25] : memref<2x132x128xf32, #tpu.memory_space<vmem>>, vector<1x132x128xf32>
      %116 = vector.shape_cast %115 : vector<1x132x128xf32> to vector<132x128xf32>
      %117 = vector.shape_cast %113 : vector<132x128xf32> to vector<1x132x128xf32>
      tpu.vector_store %arg6[%114, %c0_24, %c0_25], %117 {strides = array<i32>} : memref<2x132x128xf32, #tpu.memory_space<vmem>>, vector<1x132x128xf32>,
    }
    %c2_i32_7 = arith.constant 2 : i32
    return
  }
  func.func @transform_0(%arg0: i32) -> (i32, i32, i32) {
    %c0_i32 = arith.constant 0 : i32
    %c0_i32_0 = arith.constant 0 : i32
    %c0_i32_1 = arith.constant 0 : i32
    return %arg0, %c0_i32, %c0_i32_0 : i32, i32, i32
  }
  func.func @transform_1(%arg0: i32) -> (i32, i32) {
    %c0_i32 = arith.constant 0 : i32
    %c0_i32_0 = arith.constant 0 : i32
    %c0_i32_1 = arith.constant 0 : i32
    return %c0_i32, %c0_i32_0 : i32, i32
  }
  func.func @transform_2(%arg0: i32) -> (i32, i32) {
    %c0_i32 = arith.constant 0 : i32
    %c0_i32_0 = arith.constant 0 : i32
    %c0_i32_1 = arith.constant 0 : i32
    return %c0_i32, %c0_i32_0 : i32, i32
  }
  func.func @transform_3(%arg0: i32) -> (i32, i32) {
    %c0_i32 = arith.constant 0 : i32
    %c0_i32_0 = arith.constant 0 : i32
    %c0_i32_1 = arith.constant 0 : i32
    return %c0_i32, %c0_i32_0 : i32, i32
  }
  func.func @transform_4(%arg0: i32) -> (i32, i32) {
    %c0_i32 = arith.constant 0 : i32
    %c0_i32_0 = arith.constant 0 : i32
    %c0_i32_1 = arith.constant 0 : i32
    return %c0_i32, %c0_i32_0 : i32, i32
  }
  func.func @transform_5(%arg0: i32) -> (i32, i32, i32) {
    %c0_i32 = arith.constant 0 : i32
    %c0_i32_0 = arith.constant 0 : i32
    %c0_i32_1 = arith.constant 0 : i32
    return %arg0, %c0_i32, %c0_i32_0 : i32, i32, i32
  }
}

</mosaic_0001>

<bundles_post_ra>
// kernel: tpu_custom_call.1
= control target key start
LH: loop header
LB: loop body
LE: loop exit
PB: predicated region body
PF: predicated region fallthrough
CT: control target
= control target key end

     0   :  { %10 = vsyncpa [#allocation3], 0  ;;  %s6595_s18 = smov [#allocation2]   ;;  %s9914_s0 = inlined_call_operand.vmem [shape: f32[2,22,128], index: 0, kind: input, shape index: {}]   ;;  %s9915_s1 = inlined_call_operand.vmem [shape: bf16[132,504], index: 1, kind: input, shape index: {}]   ;;  %s9916_s2 = inlined_call_operand.hbm [shape: bf16[132,1776], index: 2, kind: input, shape index: {}]   ;;  %s9917_s3 = inlined_call_operand.vmem [shape: f32[132,1], index: 3, kind: input, shape index: {}]   ;;  %s9918_s4 = inlined_call_operand.vmem [shape: f32[132,1], index: 4, kind: input, shape index: {}]   ;;  %s9919_s5 = inlined_call_operand.vmem [shape: f32[2,132,128], index: 5, kind: output, shape index: {}]  }
   0x1   :  { %s20_s19 = sshll.u32 %s6595_s18, 4  ;;  %s6563_s22 = scalar_lea.hbm %s9916_s2, 15232  ;;  %s21_s19 = int_to_ptr.vmem [resolvable:$true] %s20_s19 }
   0x2   :  { %p6564_p0 = scmp.ne.s32.totalorder %s9916_s2, %s6563_s22  ;;  %p6567_p1 = scmp.lt.u32.totalorder %s6563_s22, %s9916_s2 }
   0x4   :  { %p6569_p2 = pnand %p6567_p1, %p6564_p0 }
   0x6   :  { %6572 = shalt.err (!%p6569_p2)
}
   0x7   :  { %s6573_s27 = scalar_lea.vmem %s21_s19, 15232  ;;  %p6578_p4 = scmp.lt.s32.totalorder %s21_s19, %s21_s19 }
   0x8   :  { %p6574_p3 = scmp.ne.s32.totalorder %s21_s19, %s6573_s27  ;;  %p6579_p5 = scmp.lt.s32.totalorder %s6573_s27, %s6573_s27 }
   0xa   :  { %p6580_p6 = por %p6579_p5, %p6578_p4 }
   0xc   :  { %p6581_p7 = pnand %p6580_p6, %p6574_p3 }
   0xe   :  { %6584 = shalt.err (!%p6581_p7)
}
   0xf   :  { %s6596_s28 = smov 896   ;;  %s6597_s29 = smov 56  }
  0x10   :  { %26 = dma.hbm_to_vmem [thread:$0]  %s9916_s2, 15232, %s21_s19, [#allocation3], %s6596_s28, %s6596_s28, %s6597_s29  }
  0x11   :  { %6589 = dma.done.wait [#allocation3], 15232  }
  0x12   :  { %6590 = vsyncadd [#allocation3], 4294952064  ;;  %v6664_v0 = vld [vmem:[%s9915_s1] sm:$0xff]  ;;  %v6669_v1 = vld [vmem:[%s9915_s1 + $0x8] sm:$0xff]  ;;  %s7239_s9 = smov 0  }
  0x13   :  { %10260 = vst [vmem:[#allocation5_spill] sm:$0xff] %v6664_v0  ;;  %10261 = vst [vmem:[#allocation6_spill] sm:$0xff] %v6669_v1  ;;  %v6674_v2 = vld [vmem:[%s9915_s1 + $0x10] sm:$0xff]  ;;  %v6679_v3 = vld [vmem:[%s9915_s1 + $0x18] sm:$0xff] }
  0x14   :  { %10262 = vst [vmem:[#allocation7_spill] sm:$0xff] %v6674_v2  ;;  %10263 = vst [vmem:[#allocation8_spill] sm:$0xff] %v6679_v3  ;;  %v6684_v4 = vld [vmem:[%s9915_s1 + $0x20] sm:$0xff]  ;;  %v6689_v5 = vld [vmem:[%s9915_s1 + $0x28] sm:$0xff] }
  0x15   :  { %10264 = vst [vmem:[#allocation9_spill] sm:$0xff] %v6684_v4  ;;  %10265 = vst [vmem:[#allocation10_spill] sm:$0xff] %v6689_v5  ;;  %v6694_v6 = vld [vmem:[%s9915_s1 + $0x30] sm:$0xff]  ;;  %v6699_v7 = vld [vmem:[%s9915_s1 + $0x38] sm:$0xff] }
  0x16   :  { %10266 = vst [vmem:[#allocation11_spill] sm:$0xff] %v6694_v6  ;;  %10267 = vst [vmem:[#allocation12_spill] sm:$0xff] %v6699_v7  ;;  %v6704_v8 = vld [vmem:[%s9915_s1 + $0x40] sm:$0xff]  ;;  %v6709_v9 = vld [vmem:[%s9915_s1 + $0x48] sm:$0xff] }
  0x17   :  { %10268 = vst [vmem:[#allocation13_spill] sm:$0xff] %v6704_v8  ;;  %10269 = vst [vmem:[#allocation14_spill] sm:$0xff] %v6709_v9  ;;  %v6714_v10 = vld [vmem:[%s9915_s1 + $0x50] sm:$0xff]  ;;  %v6719_v11 = vld [vmem:[%s9915_s1 + $0x58] sm:$0xff] }
  0x18   :  { %10270 = vst [vmem:[#allocation15_spill] sm:$0xff] %v6714_v10  ;;  %10271 = vst [vmem:[#allocation16_spill] sm:$0xff] %v6719_v11  ;;  %v6724_v12 = vld [vmem:[%s9915_s1 + $0x60] sm:$0xff]  ;;  %v6729_v13 = vld [vmem:[%s9915_s1 + $0x68] sm:$0xff] }
  0x19   :  { %10272 = vst [vmem:[#allocation17_spill] sm:$0xff] %v6724_v12  ;;  %10273 = vst [vmem:[#allocation18_spill] sm:$0xff] %v6729_v13  ;;  %v6734_v14 = vld [vmem:[%s9915_s1 + $0x70] sm:$0xff]  ;;  %v6739_v15 = vld [vmem:[%s9915_s1 + $0x78] sm:$0xff] }
  0x1a   :  { %10274 = vst [vmem:[#allocation19_spill] sm:$0xff] %v6734_v14  ;;  %10275 = vst [vmem:[#allocation20_spill] sm:$0xff] %v6739_v15  ;;  %v6744_v16 = vld [vmem:[%s9915_s1 + $0x80] sm:$0xff]  ;;  %v6749_v17 = vld [vmem:[%s9915_s1 + $0x88] sm:$0xff] }
  0x1b   :  { %10276 = vst [vmem:[#allocation21_spill] sm:$0xff] %v6744_v16  ;;  %10277 = vst [vmem:[#allocation22_spill] sm:$0xff] %v6749_v17  ;;  %v6754_v18 = vld [vmem:[%s9915_s1 + $0x90] sm:$0xff]  ;;  %v6759_v19 = vld [vmem:[%s9915_s1 + $0x98] sm:$0xff] }
  0x1c   :  { %10278 = vst [vmem:[#allocation23_spill] sm:$0xff] %v6754_v18  ;;  %10279 = vst [vmem:[#allocation24_spill] sm:$0xff] %v6759_v19  ;;  %v6764_v20 = vld [vmem:[%s9915_s1 + $0xa0] sm:$0xff]  ;;  %v6769_v21 = vld [vmem:[%s9915_s1 + $0xa8] sm:$0xff] }
  0x1d   :  { %10280 = vst [vmem:[#allocation25_spill] sm:$0xff] %v6764_v20  ;;  %10281 = vst [vmem:[#allocation26_spill] sm:$0xff] %v6769_v21  ;;  %v6774_v22 = vld [vmem:[%s9915_s1 + $0xb0] sm:$0xff]  ;;  %v6779_v23 = vld [vmem:[%s9915_s1 + $0xb8] sm:$0xff] }
  0x1e   :  { %10282 = vst [vmem:[#allocation27_spill] sm:$0xff] %v6774_v22  ;;  %10283 = vst [vmem:[#allocation28_spill] sm:$0xff] %v6779_v23  ;;  %v6784_v24 = vld [vmem:[%s9915_s1 + $0xc0] sm:$0xff]  ;;  %v6789_v25 = vld [vmem:[%s9915_s1 + $0xc8] sm:$0xff] }
  0x1f   :  { %10284 = vst [vmem:[#allocation29_spill] sm:$0xff] %v6784_v24  ;;  %10285 = vst [vmem:[#allocation30_spill] sm:$0xff] %v6789_v25  ;;  %v6794_v26 = vld [vmem:[%s9915_s1 + $0xd0] sm:$0xff]  ;;  %v6799_v27 = vld [vmem:[%s9915_s1 + $0xd8] sm:$0xff] }
  0x20   :  { %10286 = vst [vmem:[#allocation31_spill] sm:$0xff] %v6794_v26  ;;  %10287 = vst [vmem:[#allocation32_spill] sm:$0xff] %v6799_v27  ;;  %v6804_v28 = vld [vmem:[%s9915_s1 + $0xe0] sm:$0xff]  ;;  %v6809_v29 = vld [vmem:[%s9915_s1 + $0xe8] sm:$0xff] }
  0x21   :  { %10288 = vst [vmem:[#allocation33_spill] sm:$0xff] %v6804_v28  ;;  %10289 = vst [vmem:[#allocation34_spill] sm:$0xff] %v6809_v29  ;;  %v6814_v30 = vld [vmem:[%s9915_s1 + $0xf0] sm:$0xff]  ;;  %v6819_v31 = vld [vmem:[%s9915_s1 + $0xf8] sm:$0xff] }
  0x22   :  { %10290 = vst [vmem:[#allocation35_spill] sm:$0xff] %v6814_v30  ;;  %10291 = vst [vmem:[#allocation36_spill] sm:$0xff] %v6819_v31  ;;  %v6824_v32 = vld [vmem:[%s9915_s1 + $0x100] sm:$0x33]  ;;  %v6829_v33 = vld [vmem:[%s9915_s1 + $0x108] sm:$0x33] }
  0x23   :  { %10292 = vst [vmem:[#allocation37_spill] sm:$0xff] %v6824_v32  ;;  %10293 = vst [vmem:[#allocation38_spill] sm:$0xff] %v6829_v33  ;;  %v6831_v34 = vld [vmem:[#allocation2] sm:$0xff]  ;;  %v6833_v35 = vld [vmem:[#allocation2 + $0x8] sm:$0xff] }
  0x24   :  { %10294 = vst [vmem:[#allocation39_spill] sm:$0xff] %v6831_v34  ;;  %10295 = vst [vmem:[#allocation40_spill] sm:$0xff] %v6833_v35  ;;  %v6835_v36 = vld [vmem:[#allocation2 + $0x10] sm:$0xff]  ;;  %v6837_v37 = vld [vmem:[#allocation2 + $0x18] sm:$0xff] }
  0x25   :  { %10296 = vst [vmem:[#allocation41_spill] sm:$0xff] %v6835_v36  ;;  %10297 = vst [vmem:[#allocation42_spill] sm:$0xff] %v6837_v37  ;;  %v6839_v38 = vld [vmem:[#allocation2 + $0x20] sm:$0xff]  ;;  %v6841_v39 = vld [vmem:[#allocation2 + $0x28] sm:$0xff] }
  0x26   :  { %10298 = vst [vmem:[#allocation43_spill] sm:$0xff] %v6839_v38  ;;  %10299 = vst [vmem:[#allocation44_spill] sm:$0xff] %v6841_v39  ;;  %v6843_v40 = vld [vmem:[#allocation2 + $0x30] sm:$0xff]  ;;  %v6845_v41 = vld [vmem:[#allocation2 + $0x38] sm:$0xff] }
  0x27   :  { %10300 = vst [vmem:[#allocation45_spill] sm:$0xff] %v6843_v40  ;;  %10301 = vst [vmem:[#allocation46_spill] sm:$0xff] %v6845_v41  ;;  %v6847_v42 = vld [vmem:[#allocation2 + $0x40] sm:$0xff]  ;;  %v6849_v43 = vld [vmem:[#allocation2 + $0x48] sm:$0xff] }
  0x28   :  { %10302 = vst [vmem:[#allocation47_spill] sm:$0xff] %v6847_v42  ;;  %10303 = vst [vmem:[#allocation48_spill] sm:$0xff] %v6849_v43  ;;  %v6851_v44 = vld [vmem:[#allocation2 + $0x50] sm:$0xff]  ;;  %v6853_v45 = vld [vmem:[#allocation2 + $0x58] sm:$0xff] }
  0x29   :  { %10304 = vst [vmem:[#allocation49_spill] sm:$0xff] %v6851_v44  ;;  %10305 = vst [vmem:[#allocation50_spill] sm:$0xff] %v6853_v45  ;;  %v6855_v46 = vld [vmem:[#allocation2 + $0x60] sm:$0xff]  ;;  %v6857_v47 = vld [vmem:[#allocation2 + $0x68] sm:$0xff] }
  0x2a   :  { %10306 = vst [vmem:[#allocation51_spill] sm:$0xff] %v6855_v46  ;;  %10307 = vst [vmem:[#allocation52_spill] sm:$0xff] %v6857_v47  ;;  %v6859_v48 = vld [vmem:[#allocation2 + $0x70] sm:$0xff]  ;;  %v6861_v49 = vld [vmem:[#allocation2 + $0x78] sm:$0xff] }
  0x2b   :  { %10308 = vst [vmem:[#allocation53_spill] sm:$0xff] %v6859_v48  ;;  %10309 = vst [vmem:[#allocation54_spill] sm:$0xff] %v6861_v49  ;;  %v6863_v50 = vld [vmem:[#allocation2 + $0x80] sm:$0xff]  ;;  %v6865_v51 = vld [vmem:[#allocation2 + $0x88] sm:$0xff] }
  0x2c   :  { %10310 = vst [vmem:[#allocation55_spill] sm:$0xff] %v6863_v50  ;;  %10311 = vst [vmem:[#allocation56_spill] sm:$0xff] %v6865_v51  ;;  %v6867_v52 = vld [vmem:[#allocation2 + $0x90] sm:$0xff]  ;;  %v6869_v53 = vld [vmem:[#allocation2 + $0x98] sm:$0xff] }
  0x2d   :  { %10312 = vst [vmem:[#allocation57_spill] sm:$0xff] %v6867_v52  ;;  %10313 = vst [vmem:[#allocation58_spill] sm:$0xff] %v6869_v53  ;;  %v6871_v54 = vld [vmem:[#allocation2 + $0xa0] sm:$0xff]  ;;  %v6873_v55 = vld [vmem:[#allocation2 + $0xa8] sm:$0xff] }
  0x2e   :  { %10314 = vst [vmem:[#allocation59_spill] sm:$0xff] %v6871_v54  ;;  %10315 = vst [vmem:[#allocation60_spill] sm:$0xff] %v6873_v55  ;;  %v6875_v56 = vld [vmem:[#allocation2 + $0xb0] sm:$0xff]  ;;  %v6877_v57 = vld [vmem:[#allocation2 + $0xb8] sm:$0xff] }
  0x2f   :  { %10316 = vst [vmem:[#allocation61_spill] sm:$0xff] %v6875_v56  ;;  %10317 = vst [vmem:[#allocation62_spill] sm:$0xff] %v6877_v57  ;;  %v6879_v58 = vld [vmem:[#allocation2 + $0xc0] sm:$0xff]  ;;  %v6881_v59 = vld [vmem:[#allocation2 + $0xc8] sm:$0xff] }
  0x30   :  { %10318 = vst [vmem:[#allocation63_spill] sm:$0xff] %v6879_v58  ;;  %10319 = vst [vmem:[#allocation64_spill] sm:$0xff] %v6881_v59  ;;  %v6883_v60 = vld [vmem:[#allocation2 + $0xd0] sm:$0xff]  ;;  %v6885_v61 = vld [vmem:[#allocation2 + $0xd8] sm:$0xff] }
  0x31   :  { %10320 = vst [vmem:[#allocation65_spill] sm:$0xff] %v6883_v60  ;;  %10321 = vst [vmem:[#allocation66_spill] sm:$0xff] %v6885_v61  ;;  %v6887_v62 = vld [vmem:[#allocation2 + $0xe0] sm:$0xff]  ;;  %v6889_v63 = vld [vmem:[#allocation2 + $0xe8] sm:$0xff] }
  0x32   :  { %10322 = vst [vmem:[#allocation67_spill] sm:$0xff] %v6887_v62  ;;  %10323 = vst [vmem:[#allocation68_spill] sm:$0xff] %v6889_v63  ;;  %v6891_v53 = vld [vmem:[#allocation2 + $0xf0] sm:$0xff]  ;;  %v6893_v54 = vld [vmem:[#allocation2 + $0xf8] sm:$0xff] }
  0x33   :  { %10324 = vst [vmem:[#allocation69_spill] sm:$0xff] %v6891_v53  ;;  %10325 = vst [vmem:[#allocation70_spill] sm:$0xff] %v6893_v54  ;;  %v6895_v40 = vld [vmem:[#allocation2 + $0x100] sm:$0xff]  ;;  %v6897_v47 = vld [vmem:[#allocation2 + $0x108] sm:$0xff] }
  0x34   :  { %10326 = vst [vmem:[#allocation71_spill] sm:$0xff] %v6895_v40  ;;  %10327 = vst [vmem:[#allocation72_spill] sm:$0xff] %v6897_v47  ;;  %v6899_v39 = vld [vmem:[#allocation2 + $0x110] sm:$0xff]  ;;  %v6901_v46 = vld [vmem:[#allocation2 + $0x118] sm:$0xff] }
  0x35   :  { %10328 = vst [vmem:[#allocation73_spill] sm:$0xff] %v6899_v39  ;;  %10329 = vst [vmem:[#allocation74_spill] sm:$0xff] %v6901_v46  ;;  %v6903_v52 = vld [vmem:[#allocation2 + $0x120] sm:$0xff]  ;;  %v6905_v60 = vld [vmem:[#allocation2 + $0x128] sm:$0xff] }
  0x36   :  { %10330 = vst [vmem:[#allocation75_spill] sm:$0xff] %v6903_v52  ;;  %10331 = vst [vmem:[#allocation76_spill] sm:$0xff] %v6905_v60  ;;  %v6907_v61 = vld [vmem:[#allocation2 + $0x130] sm:$0xff]  ;;  %v6909_v59 = vld [vmem:[#allocation2 + $0x138] sm:$0xff] }
  0x37   :  { %10332 = vst [vmem:[#allocation77_spill] sm:$0xff] %v6907_v61  ;;  %10333 = vst [vmem:[#allocation78_spill] sm:$0xff] %v6909_v59  ;;  %v6911_v51 = vld [vmem:[#allocation2 + $0x140] sm:$0xff]  ;;  %v6913_v58 = vld [vmem:[#allocation2 + $0x148] sm:$0xff] }
  0x38   :  { %10334 = vst [vmem:[#allocation79_spill] sm:$0xff] %v6911_v51  ;;  %10335 = vst [vmem:[#allocation80_spill] sm:$0xff] %v6913_v58  ;;  %v6915_v54 = vld [vmem:[#allocation2 + $0x150] sm:$0xff]  ;;  %v6917_v40 = vld [vmem:[#allocation2 + $0x158] sm:$0xff] }
  0x39   :  { %10336 = vst [vmem:[#allocation81_spill] sm:$0xff] %v6915_v54  ;;  %10337 = vst [vmem:[#allocation82_spill] sm:$0xff] %v6917_v40  ;;  %v6919_v47 = vld [vmem:[#allocation2 + $0x160] sm:$0xff]  ;;  %v6921_v39 = vld [vmem:[#allocation2 + $0x168] sm:$0xff] }
  0x3a   :  { %10338 = vst [vmem:[#allocation83_spill] sm:$0xff] %v6919_v47  ;;  %10339 = vst [vmem:[#allocation84_spill] sm:$0xff] %v6921_v39  ;;  %v6923_v38 = vld [vmem:[#allocation2 + $0x170] sm:$0xff]  ;;  %v6925_v45 = vld [vmem:[#allocation2 + $0x178] sm:$0xff] }
  0x3b   :  { %10340 = vst [vmem:[#allocation85_spill] sm:$0xff] %v6923_v38  ;;  %10341 = vst [vmem:[#allocation86_spill] sm:$0xff] %v6925_v45  ;;  %v6927_v37 = vld [vmem:[#allocation2 + $0x180] sm:$0xff]  ;;  %v6929_v61 = vld [vmem:[#allocation2 + $0x188] sm:$0xff] }
  0x3c   :  { %10342 = vst [vmem:[#allocation87_spill] sm:$0xff] %v6927_v37  ;;  %10343 = vst [vmem:[#allocation88_spill] sm:$0xff] %v6929_v61  ;;  %v6931_v59 = vld [vmem:[#allocation2 + $0x190] sm:$0xff]  ;;  %v6933_v51 = vld [vmem:[#allocation2 + $0x198] sm:$0xff] }
  0x3d   :  { %10344 = vst [vmem:[#allocation89_spill] sm:$0xff] %v6931_v59  ;;  %10345 = vst [vmem:[#allocation90_spill] sm:$0xff] %v6933_v51  ;;  %v6935_v58 = vld [vmem:[#allocation2 + $0x1a0] sm:$0xff]  ;;  %v6937_v44 = vld [vmem:[#allocation2 + $0x1a8] sm:$0xff] }
  0x3e   :  { %10346 = vst [vmem:[#allocation91_spill] sm:$0xff] %v6935_v58  ;;  %10347 = vst [vmem:[#allocation92_spill] sm:$0xff] %v6937_v44  ;;  %v6939_v53 = vld [vmem:[#allocation2 + $0x1b0] sm:$0xff]  ;;  %v6941_v47 = vld [vmem:[#allocation2 + $0x1b8] sm:$0xff] }
  0x3f   :  { %10348 = vst [vmem:[#allocation93_spill] sm:$0xff] %v6939_v53  ;;  %10349 = vst [vmem:[#allocation94_spill] sm:$0xff] %v6941_v47  ;;  %v6943_v39 = vld [vmem:[#allocation2 + $0x1c0] sm:$0xff]  ;;  %v6945_v38 = vld [vmem:[#allocation2 + $0x1c8] sm:$0xff] }
  0x40   :  { %10350 = vst [vmem:[#allocation95_spill] sm:$0xff] %v6943_v39  ;;  %10351 = vst [vmem:[#allocation96_spill] sm:$0xff] %v6945_v38  ;;  %v6947_v45 = vld [vmem:[#allocation2 + $0x1d0] sm:$0xff]  ;;  %v6949_v37 = vld [vmem:[#allocation2 + $0x1d8] sm:$0xff] }
  0x41   :  { %10352 = vst [vmem:[#allocation97_spill] sm:$0xff] %v6947_v45  ;;  %10353 = vst [vmem:[#allocation98_spill] sm:$0xff] %v6949_v37  ;;  %v6951_v60 = vld [vmem:[#allocation2 + $0x1e0] sm:$0xff]  ;;  %v6953_v50 = vld [vmem:[#allocation2 + $0x1e8] sm:$0xff] }
  0x42   :  { %10354 = vst [vmem:[#allocation99_spill] sm:$0xff] %v6951_v60  ;;  %10355 = vst [vmem:[#allocation100_spill] sm:$0xff] %v6953_v50  ;;  %v6955_v51 = vld [vmem:[#allocation2 + $0x1f0] sm:$0xff]  ;;  %v6957_v58 = vld [vmem:[#allocation2 + $0x1f8] sm:$0xff] }
  0x43   :  { %10356 = vst [vmem:[#allocation101_spill] sm:$0xff] %v6955_v51  ;;  %10357 = vst [vmem:[#allocation102_spill] sm:$0xff] %v6957_v58  ;;  %v6959_v44 = vld [vmem:[#allocation2 + $0x200] sm:$0xff]  ;;  %v6961_v53 = vld [vmem:[#allocation2 + $0x208] sm:$0xff] }
  0x44   :  { %10358 = vst [vmem:[#allocation103_spill] sm:$0xff] %v6959_v44  ;;  %10359 = vst [vmem:[#allocation104_spill] sm:$0xff] %v6961_v53  ;;  %v6963_v47 = vld [vmem:[#allocation2 + $0x210] sm:$0xff]  ;;  %v6965_v57 = vld [vmem:[#allocation2 + $0x218] sm:$0xff] }
  0x45   :  { %10360 = vst [vmem:[#allocation105_spill] sm:$0xff] %v6963_v47  ;;  %10361 = vst [vmem:[#allocation106_spill] sm:$0xff] %v6965_v57  ;;  %v6967_v38 = vld [vmem:[#allocation2 + $0x220] sm:$0xff]  ;;  %v6969_v45 = vld [vmem:[#allocation2 + $0x228] sm:$0xff] }
  0x46   :  { %10362 = vst [vmem:[#allocation107_spill] sm:$0xff] %v6967_v38  ;;  %10363 = vst [vmem:[#allocation108_spill] sm:$0xff] %v6969_v45  ;;  %v6971_v37 = vld [vmem:[#allocation2 + $0x230] sm:$0xff]  ;;  %v6973_v60 = vld [vmem:[#allocation2 + $0x238] sm:$0xff] }
  0x47   :  { %10364 = vst [vmem:[#allocation109_spill] sm:$0xff] %v6971_v37  ;;  %10365 = vst [vmem:[#allocation110_spill] sm:$0xff] %v6973_v60  ;;  %v6975_v50 = vld [vmem:[#allocation2 + $0x240] sm:$0xff]  ;;  %v6977_v51 = vld [vmem:[#allocation2 + $0x248] sm:$0xff] }
  0x48   :  { %10366 = vst [vmem:[#allocation111_spill] sm:$0xff] %v6975_v50  ;;  %10367 = vst [vmem:[#allocation112_spill] sm:$0xff] %v6977_v51  ;;  %v6979_v40 = vld [vmem:[#allocation2 + $0x250] sm:$0xff]  ;;  %v6981_v44 = vld [vmem:[#allocation2 + $0x258] sm:$0xff] }
  0x49   :  { %10368 = vst [vmem:[#allocation113_spill] sm:$0xff] %v6979_v40  ;;  %10369 = vst [vmem:[#allocation114_spill] sm:$0xff] %v6981_v44  ;;  %v6983_v53 = vld [vmem:[#allocation2 + $0x260] sm:$0xff]  ;;  %v6985_v47 = vld [vmem:[#allocation2 + $0x268] sm:$0xff] }
  0x4a   :  { %10370 = vst [vmem:[#allocation115_spill] sm:$0xff] %v6983_v53  ;;  %10371 = vst [vmem:[#allocation116_spill] sm:$0xff] %v6985_v47  ;;  %v6987_v57 = vld [vmem:[#allocation2 + $0x270] sm:$0xff]  ;;  %v6989_v38 = vld [vmem:[#allocation2 + $0x278] sm:$0xff] }
  0x4b   :  { %10372 = vst [vmem:[#allocation117_spill] sm:$0xff] %v6987_v57  ;;  %10373 = vst [vmem:[#allocation118_spill] sm:$0xff] %v6989_v38  ;;  %v6991_v45 = vld [vmem:[#allocation2 + $0x280] sm:$0xff]  ;;  %v6993_v59 = vld [vmem:[#allocation2 + $0x288] sm:$0xff] }
  0x4c   :  { %10374 = vst [vmem:[#allocation119_spill] sm:$0xff] %v6991_v45  ;;  %10375 = vst [vmem:[#allocation120_spill] sm:$0xff] %v6993_v59  ;;  %v6995_v60 = vld [vmem:[#allocation2 + $0x290] sm:$0xff]  ;;  %v6997_v50 = vld [vmem:[#allocation2 + $0x298] sm:$0xff] }
  0x4d   :  { %10376 = vst [vmem:[#allocation121_spill] sm:$0xff] %v6995_v60  ;;  %10377 = vst [vmem:[#allocation122_spill] sm:$0xff] %v6997_v50  ;;  %v6999_v51 = vld [vmem:[#allocation2 + $0x2a0] sm:$0xff]  ;;  %v7001_v40 = vld [vmem:[#allocation2 + $0x2a8] sm:$0xff] }
  0x4e   :  { %10378 = vst [vmem:[#allocation123_spill] sm:$0xff] %v6999_v51  ;;  %10379 = vst [vmem:[#allocation124_spill] sm:$0xff] %v7001_v40  ;;  %v7003_v44 = vld [vmem:[#allocation2 + $0x2b0] sm:$0xff]  ;;  %v7005_v53 = vld [vmem:[#allocation2 + $0x2b8] sm:$0xff] }
  0x4f   :  { %10380 = vst [vmem:[#allocation125_spill] sm:$0xff] %v7003_v44  ;;  %10381 = vst [vmem:[#allocation126_spill] sm:$0xff] %v7005_v53  ;;  %v7007_v63 = vld [vmem:[#allocation2 + $0x2c0] sm:$0xff]  ;;  %v7009_v57 = vld [vmem:[#allocation2 + $0x2c8] sm:$0xff] }
  0x50   :  { %10382 = vst [vmem:[#allocation127_spill] sm:$0xff] %v7007_v63  ;;  %10383 = vst [vmem:[#allocation128_spill] sm:$0xff] %v7009_v57  ;;  %v7011_v38 = vld [vmem:[#allocation2 + $0x2d0] sm:$0xff]  ;;  %v7013_v45 = vld [vmem:[#allocation2 + $0x2d8] sm:$0xff] }
  0x51   :  { %10384 = vst [vmem:[#allocation129_spill] sm:$0xff] %v7011_v38  ;;  %10385 = vst [vmem:[#allocation130_spill] sm:$0xff] %v7013_v45  ;;  %v7015_v59 = vld [vmem:[#allocation2 + $0x2e0] sm:$0xff]  ;;  %v7017_v60 = vld [vmem:[#allocation2 + $0x2e8] sm:$0xff] }
  0x52   :  { %10386 = vst [vmem:[#allocation131_spill] sm:$0xff] %v7015_v59  ;;  %10387 = vst [vmem:[#allocation132_spill] sm:$0xff] %v7017_v60  ;;  %v7019_v50 = vld [vmem:[#allocation2 + $0x2f0] sm:$0xff]  ;;  %v7021_v52 = vld [vmem:[#allocation2 + $0x2f8] sm:$0xff] }
  0x53   :  { %10388 = vst [vmem:[#allocation133_spill] sm:$0xff] %v7019_v50  ;;  %10389 = vst [vmem:[#allocation134_spill] sm:$0xff] %v7021_v52  ;;  %v7023_v40 = vld [vmem:[#allocation2 + $0x300] sm:$0xff]  ;;  %v7025_v44 = vld [vmem:[#allocation2 + $0x308] sm:$0xff] }
  0x54   :  { %10390 = vst [vmem:[#allocation135_spill] sm:$0xff] %v7023_v40  ;;  %10391 = vst [vmem:[#allocation136_spill] sm:$0xff] %v7025_v44  ;;  %v7027_v53 = vld [vmem:[#allocation2 + $0x310] sm:$0xff]  ;;  %v7029_v63 = vld [vmem:[#allocation2 + $0x318] sm:$0xff] }
  0x55   :  { %10392 = vst [vmem:[#allocation137_spill] sm:$0xff] %v7027_v53  ;;  %10393 = vst [vmem:[#allocation138_spill] sm:$0xff] %v7029_v63  ;;  %v7031_v57 = vld [vmem:[#allocation2 + $0x320] sm:$0xff]  ;;  %v7033_v38 = vld [vmem:[#allocation2 + $0x328] sm:$0xff] }
  0x56   :  { %10394 = vst [vmem:[#allocation139_spill] sm:$0xff] %v7031_v57  ;;  %10395 = vst [vmem:[#allocation140_spill] sm:$0xff] %v7033_v38  ;;  %v7035_v49 = vld [vmem:[#allocation2 + $0x330] sm:$0xff]  ;;  %v7037_v59 = vld [vmem:[#allocation2 + $0x338] sm:$0xff] }
  0x57   :  { %10396 = vst [vmem:[#allocation141_spill] sm:$0xff] %v7035_v49  ;;  %10397 = vst [vmem:[#allocation142_spill] sm:$0xff] %v7037_v59  ;;  %v7039_v60 = vld [vmem:[#allocation2 + $0x340] sm:$0xff]  ;;  %v7041_v50 = vld [vmem:[#allocation2 + $0x348] sm:$0xff] }
  0x58   :  { %10398 = vst [vmem:[#allocation143_spill] sm:$0xff] %v7039_v60  ;;  %10399 = vst [vmem:[#allocation144_spill] sm:$0xff] %v7041_v50  ;;  %v7043_v52 = vld [vmem:[#allocation2 + $0x350] sm:$0xff]  ;;  %v7045_v40 = vld [vmem:[#allocation2 + $0x358] sm:$0xff] }
  0x59   :  { %10400 = vst [vmem:[#allocation145_spill] sm:$0xff] %v7043_v52  ;;  %10401 = vst [vmem:[#allocation146_spill] sm:$0xff] %v7045_v40  ;;  %v7047_v44 = vld [vmem:[#allocation2 + $0x360] sm:$0xff]  ;;  %v7049_v56 = vld [vmem:[#allocation2 + $0x368] sm:$0xff] }
  0x5a   :  { %10402 = vst [vmem:[#allocation147_spill] sm:$0xff] %v7047_v44  ;;  %10403 = vst [vmem:[#allocation148_spill] sm:$0xff] %v7049_v56  ;;  %v7051_v63 = vld [vmem:[#allocation2 + $0x370] sm:$0xff]  ;;  %v7053_v57 = vld [vmem:[#allocation2 + $0x378] sm:$0xff] }
  0x5b   :  { %10404 = vst [vmem:[#allocation149_spill] sm:$0xff] %v7051_v63  ;;  %10405 = vst [vmem:[#allocation150_spill] sm:$0xff] %v7053_v57  ;;  %v7055_v38 = vld [vmem:[#allocation2 + $0x380] sm:$0x33]  ;;  %v7057_v49 = vld [vmem:[#allocation2 + $0x388] sm:$0x33] }
  0x5c   :  { %10406 = vst [vmem:[#allocation151_spill] sm:$0xff] %v7055_v38  ;;  %10407 = vst [vmem:[#allocation152_spill] sm:$0xff] %v7057_v49  ;;  %v7059_v59 = vld [vmem:[#allocation2 + $0x390] sm:$0x33]  ;;  %v7061_v60 = vld [vmem:[#allocation2 + $0x398] sm:$0x33] }
  0x5d   :  { %10408 = vst [vmem:[#allocation153_spill] sm:$0xff] %v7059_v59  ;;  %10409 = vst [vmem:[#allocation154_spill] sm:$0xff] %v7061_v60  ;;  %v7063_v36 = vld [vmem:[#allocation2 + $0x3a0] sm:$0x33]  ;;  %v7065_v52 = vld [vmem:[#allocation2 + $0x3a8] sm:$0x33] }
  0x5e   :  { %10410 = vst [vmem:[#allocation155_spill] sm:$0xff] %v7063_v36  ;;  %10411 = vst [vmem:[#allocation156_spill] sm:$0xff] %v7065_v52  ;;  %v7067_v40 = vld [vmem:[#allocation2 + $0x3b0] sm:$0x33]  ;;  %v7072_v63 = vld [vmem:[%s9917_s3] sm:$0xff] }
  0x5f   :  { %10412 = vst [vmem:[#allocation157_spill] sm:$0xff] %v7067_v40  ;;  %10413 = vst [vmem:[#allocation158_spill] sm:$0xff] %v7072_v63  ;;  %v7077_v57 = vld [vmem:[%s9917_s3 + $0x8] sm:$0xff]  ;;  %v7082_v56 = vld [vmem:[%s9917_s3 + $0x10] sm:$0xff] }
  0x60   :  { %10414 = vst [vmem:[#allocation159_spill] sm:$0xff] %v7077_v57  ;;  %10415 = vst [vmem:[#allocation160_spill] sm:$0xff] %v7082_v56  ;;  %v7087_v52 = vld [vmem:[%s9917_s3 + $0x18] sm:$0xff]  ;;  %v7092_v40 = vld [vmem:[%s9917_s3 + $0x20] sm:$0xff] }
  0x61   :  { %10416 = vst [vmem:[#allocation161_spill] sm:$0xff] %v7087_v52  ;;  %10417 = vst [vmem:[#allocation162_spill] sm:$0xff] %v7092_v40  ;;  %v7097_v36 = vld [vmem:[%s9917_s3 + $0x28] sm:$0xff]  ;;  %v7102_v60 = vld [vmem:[%s9917_s3 + $0x30] sm:$0xff] }
  0x62   :  { %10418 = vst [vmem:[#allocation163_spill] sm:$0xff] %v7097_v36  ;;  %10419 = vst [vmem:[#allocation164_spill] sm:$0xff] %v7102_v60  ;;  %v7107_v44 = vld [vmem:[%s9917_s3 + $0x38] sm:$0xff]  ;;  %v7112_v52 = vld [vmem:[%s9917_s3 + $0x40] sm:$0xff] }
  0x63   :  { %10420 = vst [vmem:[#allocation165_spill] sm:$0xff] %v7107_v44  ;;  %10421 = vst [vmem:[#allocation166_spill] sm:$0xff] %v7112_v52  ;;  %v7117_v40 = vld [vmem:[%s9917_s3 + $0x48] sm:$0xff]  ;;  %v7122_v36 = vld [vmem:[%s9917_s3 + $0x50] sm:$0xff] }
  0x64   :  { %10422 = vst [vmem:[#allocation167_spill] sm:$0xff] %v7117_v40  ;;  %10423 = vst [vmem:[#allocation168_spill] sm:$0xff] %v7122_v36  ;;  %v7127_v60 = vld [vmem:[%s9917_s3 + $0x58] sm:$0xff]  ;;  %v7132_v44 = vld [vmem:[%s9917_s3 + $0x60] sm:$0xff] }
  0x65   :  { %10424 = vst [vmem:[#allocation169_spill] sm:$0xff] %v7127_v60  ;;  %10425 = vst [vmem:[#allocation170_spill] sm:$0xff] %v7132_v44  ;;  %v7137_v52 = vld [vmem:[%s9917_s3 + $0x68] sm:$0xff]  ;;  %v7142_v40 = vld [vmem:[%s9917_s3 + $0x70] sm:$0xff] }
  0x66   :  { %10426 = vst [vmem:[#allocation171_spill] sm:$0xff] %v7137_v52  ;;  %10427 = vst [vmem:[#allocation172_spill] sm:$0xff] %v7142_v40  ;;  %v7147_v36 = vld [vmem:[%s9917_s3 + $0x78] sm:$0xff]  ;;  %v7152_v60 = vld [vmem:[%s9917_s3 + $0x80] sm:$0xf] }
  0x67   :  { %10428 = vst [vmem:[#allocation173_spill] sm:$0xff] %v7147_v36  ;;  %10429 = vst [vmem:[#allocation174_spill] sm:$0xff] %v7152_v60  ;;  %v7157_v44 = vld [vmem:[%s9918_s4] sm:$0xff]  ;;  %v7162_v52 = vld [vmem:[%s9918_s4 + $0x8] sm:$0xff] }
  0x68   :  { %10430 = vst [vmem:[#allocation175_spill] sm:$0xff] %v7157_v44  ;;  %10431 = vst [vmem:[#allocation176_spill] sm:$0xff] %v7162_v52  ;;  %v7167_v40 = vld [vmem:[%s9918_s4 + $0x10] sm:$0xff]  ;;  %v7172_v36 = vld [vmem:[%s9918_s4 + $0x18] sm:$0xff] }
  0x69   :  { %10432 = vst [vmem:[#allocation177_spill] sm:$0xff] %v7167_v40  ;;  %10433 = vst [vmem:[#allocation178_spill] sm:$0xff] %v7172_v36  ;;  %v7177_v60 = vld [vmem:[%s9918_s4 + $0x20] sm:$0xff]  ;;  %v7182_v44 = vld [vmem:[%s9918_s4 + $0x28] sm:$0xff] }
  0x6a   :  { %10434 = vst [vmem:[#allocation179_spill] sm:$0xff] %v7177_v60  ;;  %10435 = vst [vmem:[#allocation180_spill] sm:$0xff] %v7182_v44  ;;  %v7187_v52 = vld [vmem:[%s9918_s4 + $0x30] sm:$0xff]  ;;  %v7192_v40 = vld [vmem:[%s9918_s4 + $0x38] sm:$0xff] }
  0x6b   :  { %10436 = vst [vmem:[#allocation181_spill] sm:$0xff] %v7187_v52  ;;  %10437 = vst [vmem:[#allocation182_spill] sm:$0xff] %v7192_v40  ;;  %v7197_v36 = vld [vmem:[%s9918_s4 + $0x40] sm:$0xff]  ;;  %v7202_v60 = vld [vmem:[%s9918_s4 + $0x48] sm:$0xff] }
  0x6c   :  { %10438 = vst [vmem:[#allocation183_spill] sm:$0xff] %v7197_v36  ;;  %10439 = vst [vmem:[#allocation184_spill] sm:$0xff] %v7202_v60  ;;  %v7207_v44 = vld [vmem:[%s9918_s4 + $0x50] sm:$0xff]  ;;  %v7212_v52 = vld [vmem:[%s9918_s4 + $0x58] sm:$0xff] }
  0x6d   :  { %10440 = vst [vmem:[#allocation185_spill] sm:$0xff] %v7207_v44  ;;  %10441 = vst [vmem:[#allocation186_spill] sm:$0xff] %v7212_v52  ;;  %v7217_v40 = vld [vmem:[%s9918_s4 + $0x60] sm:$0xff]  ;;  %v7222_v36 = vld [vmem:[%s9918_s4 + $0x68] sm:$0xff] }
  0x6e   :  { %10442 = vst [vmem:[#allocation187_spill] sm:$0xff] %v7217_v40  ;;  %10443 = vst [vmem:[#allocation188_spill] sm:$0xff] %v7222_v36  ;;  %v7227_v60 = vld [vmem:[%s9918_s4 + $0x70] sm:$0xff]  ;;  %v7232_v44 = vld [vmem:[%s9918_s4 + $0x78] sm:$0xff] }
  0x6f   :  { %10444 = vst [vmem:[#allocation189_spill] sm:$0xff] %v7227_v60  ;;  %10445 = vst [vmem:[#allocation190_spill] sm:$0xff] %v7232_v44  ;;  %v7237_v52 = vld [vmem:[%s9918_s4 + $0x80] sm:$0xf] }
  0x70   :  { %10446 = vst [vmem:[#allocation191_spill] sm:$0xff] %v7237_v52 }
  0x71 LB: > { %v10447_v32 = vld [vmem:[#allocation37_spill] sm:$0xff]  ;;  %v10448_v30 = vld [vmem:[#allocation35_spill] sm:$0xff]  ;;  %s228_s10 = smul.u32 24, %s6593_s9  ;;  %vm233_vm0 = vcmask 1045504   ;;  %s6598_s4 = smov 10   ;;  %vm247_vm1 = vcmask 80896   ;;  %s6593_s9 = sphi %s7239_s9, %s227_s9  }
  0x72   : > { %v10449_v28 = vld [vmem:[#allocation33_spill] sm:$0xff]  ;;  %v10450_v26 = vld [vmem:[#allocation31_spill] sm:$0xff]  ;;  %s6599_s13 = smov 126   ;;  %s6600_s14 = smov 127   ;;  %vm272_vm2 = vcmask 1039360   ;;  %vm291_vm3 = vcmask 1031168   ;;  %vm7400_vm7 = vmneg %vm247_vm1 }
  0x73   : > { %v10451_v24 = vld [vmem:[#allocation29_spill] sm:$0xff]  ;;  %v10452_v22 = vld [vmem:[#allocation27_spill] sm:$0xff]  ;;  %s229_s12 = scalar_lea.vmem %s9914_s0, %s228_s10  ;;  %s6601_s2 = smov 125   ;;  %vm310_vm4 = vcmask 1022976   ;;  %vm348_vm5 = vcmask 1006592   ;;  %vm329_vm6 = vcmask 1014784   ;;  %vm7421_vm9 = vmpackc.low %vm7400_vm7, %vm7400_vm7 }
  0x74   : > { %v10453_v20 = vld [vmem:[#allocation25_spill] sm:$0xff]  ;;  %v10454_v18 = vld [vmem:[#allocation23_spill] sm:$0xff]  ;;  %v230_v60 = vld [vmem:[%s229_s12] sm:$0xff]  ;;  %s6602_s15 = smov 124   ;;  %s6603_s16 = smov 123   ;;  %vm367_vm8 = vcmask 998400  }
  0x75   : > { %v10455_v16 = vld [vmem:[#allocation21_spill] sm:$0xff]  ;;  %v10456_v14 = vld [vmem:[#allocation19_spill] sm:$0xff]  ;;  %v232_v40 = vld [vmem:[%s229_s12 + $0x10] sm:$0x3f]  ;;  %s6604_s17 = smov 122   ;;  %s6605_s18 = smov 121  }
  0x76   : > { %v10457_v12 = vld [vmem:[#allocation17_spill] sm:$0xff]  ;;  %v10458_v10 = vld [vmem:[#allocation15_spill] sm:$0xff]  ;;  %v234_v52 = vsel %vm233_vm0, %v232_v40, 0.0  ;;  %s6606_s19 = smov 120   ;;  %s6607_s20 = smov 119   ;;  %vm6615_vm10 = vmmov 1  }
  0x77   : > { %v10459_v8 = vld [vmem:[#allocation13_spill] sm:$0xff]  ;;  %v10460_v6 = vld [vmem:[#allocation11_spill] sm:$0xff]  ;;  %s6608_s21 = smov 118   ;;  %s6609_s1 = smov 117   ;;  %vm4339_vm11 = vmpackc.low %vm6615_vm10, %vm7400_vm7  ;;  %vm386_vm12 = vcmask 990208   ;;  %vm405_vm13 = vcmask 982016  }
  0x78   : > { %v10461_v4 = vld [vmem:[#allocation9_spill] sm:$0xff]  ;;  %v10462_v2 = vld [vmem:[#allocation7_spill] sm:$0xff]  ;;  %s6610_s22 = smov 116   ;;  %s6611_s23 = smov 115   ;;  %vm424_vm14 = vcmask 973824   ;;  %vm443_vm15 = vcmask 965632  }
  0x79   : > { %v10463_v0 = vld [vmem:[#allocation5_spill] sm:$0xff]  ;;  %v231_v44 = vld [vmem:[%s229_s12 + $0x8] sm:$0xff]  ;;  %s6612_s24 = smov 114   ;;  %s6613_s25 = smov 113   ;;  %vm605_vm0 = vcmask 916480   ;;  %vm462_vm7 = vcmask 957440  }
  0x7a   : > { %v5157_v36 = vpack.i.bf16 %v231_v44, %v230_v60  ;;  %s6614_s26 = smov 112   ;;  %vm10056_vm10 = vcmask 949248   ;;  %s6616_s27 = smov 2  }
  0x7b   : > { %s6617_s28 = smov 5   ;;  %s4264_s29 = smul.u32 136, %s6593_s9 }
  0x7c   : > { %5158 = vrot.lane.b32.xlu0 %v5157_v36, %s6598_s4  ;;  %s227_s9 = sadd.s32 1, %s6593_s9  }
  0x7d   : > { %s9819_s7 = scalar_lea.vmem %s9919_s5, %s4264_s29  ;;  %p224_p8 = scmp.ge.s32.totalorder %s227_s9, 2  }
  0x80   : > { %242 = vrot.lane.b32.xlu0 %v234_v52, %s6598_s4 }
  0xee   : > { %v5159_v57 = vpop.permute.xlu0 %5158 }
  0xef   : > { %v5161_v56 = vunpack.i.h.bf16 %v5159_v57  ;;  %v5160_v63 = vunpack.i.l.bf16 %v5159_v57 }
  0xf1   : > { %v249_v59 = vsel %vm247_vm1, 0.0, %v5161_v56  ;;  %v252_v49 = vsel %vm247_vm1, %v5161_v56, 0.0  ;;  %v248_v43 = vsel %vm247_vm1, 0.0, %v5160_v63  ;;  %v251_v44 = vsel %vm247_vm1, %v5160_v63, 0.0 }
  0xf2   : > { %v5177_v60 = vpack.i.bf16 %v252_v49, %v249_v59  ;;  %v7254_v38 = vpack.i.bf16 %v251_v44, %v248_v43  ;;  %v7265_v36 = vpack.c.bf16 %v5161_v56, %v5160_v63  ;;  %v7279_v40 = vpop.permute.xlu0 %242  ;;  %v4314_v56 = vcombine.high %v10455_v16, %v10454_v18 }
  0xf3   : > { %v250_v43 = vsel %vm247_vm1, 0.0, %v7279_v40  ;;  %v253_v49 = vsel %vm247_vm1, %v7279_v40, 0.0 }
  0xf4   : > { %5178 = vrot.lane.b32.xlu0 %v5177_v60, %s6599_s13  ;;  %5163 = vrot.lane.b32.xlu1 %v7254_v38, %s6600_s14  ;;  %v5262_v52 = vpack.i.bf16 %v253_v49, %v250_v43 }
  0xf5   : > { %928 = vmatprep.mubr.bf16.mxu1 %v4314_v56 }
  0xf8   : > { %5183 = vrot.lane.b32.xlu0 %v7254_v38, %s6601_s2  ;;  %5168 = vrot.lane.b32.xlu1 %v5177_v60, %s6600_s14 }
  0xfc   : > { %5198 = vrot.lane.b32.xlu0 %v5177_v60, %s6602_s15  ;;  %5173 = vrot.lane.b32.xlu1 %v7254_v38, %s6599_s13 }
 0x100   : > { %5203 = vrot.lane.b32.xlu0 %v7254_v38, %s6603_s16  ;;  %5188 = vrot.lane.b32.xlu1 %v5177_v60, %s6601_s2 }
 0x104   : > { %5218 = vrot.lane.b32.xlu0 %v5177_v60, %s6604_s17  ;;  %5193 = vrot.lane.b32.xlu1 %v7254_v38, %s6602_s15 }
 0x108   : > { %5223 = vrot.lane.b32.xlu0 %v7254_v38, %s6605_s18  ;;  %5208 = vrot.lane.b32.xlu1 %v5177_v60, %s6603_s16 }
 0x10c   : > { %5238 = vrot.lane.b32.xlu0 %v5177_v60, %s6606_s19  ;;  %5213 = vrot.lane.b32.xlu1 %v7254_v38, %s6604_s17 }
 0x110   : > { %5243 = vrot.lane.b32.xlu0 %v7254_v38, %s6607_s20  ;;  %5228 = vrot.lane.b32.xlu1 %v5177_v60, %s6605_s18 }
 0x114   : > { %5258 = vrot.lane.b32.xlu0 %v5177_v60, %s6608_s21  ;;  %5233 = vrot.lane.b32.xlu1 %v7254_v38, %s6606_s19 }
 0x118   : > { %5263 = vrot.lane.b32.xlu0 %v5262_v52, %s6600_s14  ;;  %5248 = vrot.lane.b32.xlu1 %v5177_v60, %s6607_s20 }
 0x11c   : > { %5268 = vrot.lane.b32.xlu0 %v7254_v38, %s6609_s1  ;;  %5253 = vrot.lane.b32.xlu1 %v7254_v38, %s6608_s21 }
 0x120   : > { %5288 = vrot.lane.b32.xlu0 %v5262_v52, %s6601_s2  ;;  %5273 = vrot.lane.b32.xlu1 %v5177_v60, %s6609_s1 }
 0x124   : > { %5298 = vrot.lane.b32.xlu0 %v5262_v52, %s6603_s16  ;;  %5278 = vrot.lane.b32.xlu1 %v5262_v52, %s6599_s13 }
 0x128   : > { %5303 = vrot.lane.b32.xlu0 %v5177_v60, %s6610_s22  ;;  %5283 = vrot.lane.b32.xlu1 %v7254_v38, %s6610_s22 }
 0x12c   : > { %5308 = vrot.lane.b32.xlu0 %v7254_v38, %s6611_s23  ;;  %5293 = vrot.lane.b32.xlu1 %v5262_v52, %s6602_s15 }
 0x130   : > { %5328 = vrot.lane.b32.xlu0 %v5262_v52, %s6605_s18  ;;  %5313 = vrot.lane.b32.xlu1 %v5262_v52, %s6604_s17 }
 0x134   : > { %5333 = vrot.lane.b32.xlu0 %v5177_v60, %s6612_s24  ;;  %5318 = vrot.lane.b32.xlu1 %v5177_v60, %s6611_s23 }
 0x138   : > { %5338 = vrot.lane.b32.xlu0 %v7254_v38, %s6613_s25  ;;  %5323 = vrot.lane.b32.xlu1 %v7254_v38, %s6612_s24 }
 0x13c   : > { %5358 = vrot.lane.b32.xlu0 %v5262_v52, %s6607_s20  ;;  %5343 = vrot.lane.b32.xlu1 %v5262_v52, %s6606_s19 }
 0x140   : > { %5363 = vrot.lane.b32.xlu0 %v5177_v60, %s6614_s26  ;;  %5348 = vrot.lane.b32.xlu1 %v5177_v60, %s6613_s25 }
 0x144   : > { %5373 = vrot.lane.b32.xlu0 %v5262_v52, %s6609_s1  ;;  %5353 = vrot.lane.b32.xlu1 %v7254_v38, %s6614_s26 }
 0x148   : > { %5383 = vrot.lane.b32.xlu0 %v5262_v52, %s6611_s23  ;;  %5368 = vrot.lane.b32.xlu1 %v5262_v52, %s6608_s21 }
 0x14c   : > { %5393 = vrot.lane.b32.xlu0 %v5262_v52, %s6613_s25  ;;  %5378 = vrot.lane.b32.xlu1 %v5262_v52, %s6610_s22 }
 0x150   : > { %5388 = vrot.lane.b32.xlu1 %v5262_v52, %s6612_s24 }
 0x154   : > { %5398 = vrot.lane.b32.xlu1 %v5262_v52, %s6614_s26 }
 0x166   : > { %v5179_v57 = vpop.permute.xlu0 %5178  ;;  %v5164_v59 = vpop.permute.xlu1 %5163 }
 0x167   : > { %v5166_v63 = vunpack.i.h.bf16 %v5164_v59  ;;  %v5165_v44 = vunpack.i.l.bf16 %v5164_v59  ;;  %v5181_v54 = vunpack.i.h.bf16 %v5179_v57  ;;  %v5180_v61 = vunpack.i.l.bf16 %v5179_v57 }
 0x169   : > { %v7331_v60 = vsel %vm272_vm2, %v5165_v44, %v5166_v63  ;;  %v7378_v31 = vsel %vm291_vm3, %v5180_v61, %v5181_v54 }
 0x16a   : > { %v5184_v38 = vpop.permute.xlu0 %5183  ;;  %v5169_v43 = vpop.permute.xlu1 %5168  ;;  %v5402_v49 = vpack.i.bf16 %v5166_v63, %v7331_v60 }
 0x16b   : > { %v5171_v56 = vunpack.i.h.bf16 %v5169_v43  ;;  %v5170_v53 = vunpack.i.l.bf16 %v5169_v43  ;;  %v5186_v55 = vunpack.i.h.bf16 %v5184_v38  ;;  %v5185_v34 = vunpack.i.l.bf16 %v5184_v38 }
 0x16c   : > { %5403 = vrot.lane.b32.xlu0 %v5402_v49, %s6614_s26 }
 0x16d   : > { %v7336_v50 = vsel %vm272_vm2, %v5170_v53, %v5171_v56 }
 0x16e   : > { %v7338_v52 = vpop.permute.xlu0 %5198  ;;  %v5174_v51 = vpop.permute.xlu1 %5173  ;;  %v5407_v45 = vpack.i.bf16 %v5171_v56, %v7336_v50 }
 0x16f   : > { %v5176_v59 = vunpack.i.h.bf16 %v5174_v51  ;;  %v5175_v35 = vunpack.i.l.bf16 %v5174_v51  ;;  %v5201_v61 = vunpack.i.h.bf16 %v7338_v52  ;;  %v5200_v23 = vunpack.i.l.bf16 %v7338_v52 }
 0x170   : > { %5408 = vrot.lane.b32.xlu1 %v5407_v45, %s6614_s26 }
 0x171   : > { %v7343_v44 = vsel %vm291_vm3, %v5175_v35, %v5176_v59 }
 0x172   : > { %v7345_v63 = vpop.permute.xlu0 %5203  ;;  %v7347_v43 = vpop.permute.xlu1 %5188  ;;  %v5412_v53 = vpack.i.bf16 %v5176_v59, %v7343_v44 }
 0x173   : > { %v5191_v17 = vunpack.i.h.bf16 %v7347_v43  ;;  %v5190_v11 = vunpack.i.l.bf16 %v7347_v43 }
 0x174   : > { %5413 = vrot.lane.b32.xlu1 %v5412_v53, %s6614_s26 }
 0x176   : > { %v7351_v49 = vpop.permute.xlu0 %5218  ;;  %v7353_v42 = vpop.permute.xlu1 %5193 }
 0x177   : > { %v5221_v5 = vunpack.i.h.bf16 %v7351_v49  ;;  %v5196_v1 = vunpack.i.h.bf16 %v7353_v42  ;;  %v5195_v3 = vunpack.i.l.bf16 %v7353_v42 }
 0x17a   : > { %v7355_v56 = vpop.permute.xlu0 %5223  ;;  %v5209_v51 = vpop.permute.xlu1 %5208 }
 0x17b   : > { %v5210_v21 = vunpack.i.l.bf16 %v5209_v51 }
 0x17e   : > { %v7357_v45 = vpop.permute.xlu0 %5238  ;;  %v5214_v37 = vpop.permute.xlu1 %5213 }
 0x17f   : > { %v5215_v19 = vunpack.i.l.bf16 %v5214_v37 }
 0x182   : > { %v7359_v35 = vpop.permute.xlu0 %5243  ;;  %v7361_v47 = vpop.permute.xlu1 %5228 }
 0x186   : > { %v7363_v39 = vpop.permute.xlu0 %5258  ;;  %v7365_v58 = vpop.permute.xlu1 %5233 }
 0x18a   : > { %v5264_v59 = vpop.permute.xlu0 %5263  ;;  %v7367_v53 = vpop.permute.xlu1 %5248 }
 0x18b   : > { %v5266_v62 = vunpack.i.h.bf16 %v5264_v59  ;;  %v5265_v46 = vunpack.i.l.bf16 %v5264_v59  ;;  %v7385_v59 = vsel %vm310_vm4, %v5185_v34, %v5186_v55 }
 0x18d   : > { %v7370_v48 = vsel %vm272_vm2, %v5265_v46, %v5266_v62  ;;  %v5422_v46 = vpack.i.bf16 %v5181_v54, %v7378_v31  ;;  %v5216_v54 = vunpack.i.h.bf16 %v5214_v37 }
 0x18e   : > { %v7372_v41 = vpop.permute.xlu0 %5268  ;;  %v7374_v33 = vpop.permute.xlu1 %5253  ;;  %v5417_v29 = vpack.i.bf16 %v5266_v62, %v7370_v48  ;;  %v5211_v62 = vunpack.i.h.bf16 %v5209_v51  ;;  %v5220_v51 = vunpack.i.l.bf16 %v7351_v49 }
 0x18f   : > { %v368_v7 = vsel %vm367_vm8, %v5215_v19, %v5216_v54  ;;  %v7430_v19 = vsel %vm329_vm6, %v5200_v23, %v5201_v61  ;;  %v4298_v23 = vcombine.high %v10463_v0, %v10462_v2  ;;  %v5225_v54 = vunpack.i.l.bf16 %v7355_v56 }
 0x190   : > { %5418 = vrot.lane.b32.xlu0 %v5417_v29, %s6614_s26  ;;  %v5427_v29 = vpack.i.bf16 %v5186_v55, %v7385_v59  ;;  %v350_v52 = vsel %vm348_vm5, %v5210_v21, %v5211_v62  ;;  %v369_v62 = vsel %vm367_vm8, %v5220_v51, %v5221_v5 }
 0x191   : > { %v645_v42 = vpack.c.bf16 %v369_v62, %v368_v7  ;;  %896 = vmatprep.mubr.bf16.mxu0 %v4298_v23  ;;  %v5236_v62 = vunpack.i.h.bf16 %v7365_v58 }
 0x192   : > { %v5289_v57 = vpop.permute.xlu0 %5288  ;;  %v7381_v25 = vpop.permute.xlu1 %5273 }
 0x193   : > { %v5291_v38 = vunpack.i.h.bf16 %v5289_v57  ;;  %v5290_v27 = vunpack.i.l.bf16 %v5289_v57 }
 0x194   : > { %5423 = vrot.lane.b32.xlu0 %v5422_v46, %s6614_s26 }
 0x195   : > { %v7397_v55 = vsel %vm310_vm4, %v5290_v27, %v5291_v38 }
 0x196   : > { %v5299_v34 = vpop.permute.xlu0 %5298  ;;  %v5279_v13 = vpop.permute.xlu1 %5278  ;;  %v5447_v21 = vpack.i.bf16 %v5291_v38, %v7397_v55  ;;  %v4340_v38 = vpack.c.bf16 %v7331_v60, %v7279_v40  ;;  %v5452_v40 = vpack.i.bf16 %v5201_v61, %v7430_v19  ;;  %v7451_v60 = vsel %vm329_vm6, %v5195_v3, %v5196_v1 }
 0x197   : > { %v5301_v15 = vunpack.i.h.bf16 %v5299_v34  ;;  %v5300_v57 = vunpack.i.l.bf16 %v5299_v34  ;;  %v5281_v9 = vunpack.i.h.bf16 %v5279_v13  ;;  %v5280_v46 = vunpack.i.l.bf16 %v5279_v13 }
 0x198   : > { %5428 = vrot.lane.b32.xlu0 %v5427_v29, %s6614_s26  ;;  %v5230_v61 = vunpack.i.l.bf16 %v7361_v47  ;;  %v5442_v37 = vpack.i.bf16 %v5196_v1, %v7451_v60  ;;  %v5241_v1 = vunpack.i.h.bf16 %v7357_v45 }
 0x199   : > { %v351_v13 = vsel %vm348_vm5, %v5300_v57, %v5301_v15  ;;  %v7407_v43 = vsel %vm291_vm3, %v5280_v46, %v5281_v9  ;;  %v10466_v15 = vmov 0 }
 0x19a   : > { %v7409_v34 = vpop.permute.xlu0 %5303  ;;  %v7411_v49 = vpop.permute.xlu1 %5283  ;;  %v644_v29 = vpack.c.bf16 %v351_v13, %v350_v52  ;;  %v5432_v27 = vpack.i.bf16 %v5281_v9, %v7407_v43  ;;  %v10467_v15 = vsel %vm7421_vm9, 4294967295, %v10466_v15  ;;  %v7427_v9 = vsel %vm310_vm4, %v5190_v11, %v5191_v17 }
 0x19b   : > { %10468 = vst [vmem:[#allocation192_spill] sm:$0xff] %v10467_v15  ;;  %v5437_v7 = vpack.i.bf16 %v5191_v17, %v7427_v9  ;;  %v5231_v17 = vunpack.i.h.bf16 %v7361_v47 }
 0x19c   : > { %4548 = vmatprep.subr.bf16.mxu0 %v644_v29  ;;  %5108 = vmatprep.subr.bf16.mxu1 %v644_v29 }
 0x19d   : > { %5433 = vrot.lane.b32.xlu1 %v5432_v27, %s6614_s26  ;;  %5448 = vrot.lane.b32.xlu0 %v5447_v21, %s6614_s26 }
 0x19e   : > { %4549 = vmatpush3.bf16.msk.msra.mxu0 %vm7421_vm9, %v7265_v36  ;;  %5116 = vmatpush3.bf16.msk.msra.mxu1 %vm7421_vm9, %v7265_v36  ;;  %v7442_v5 = vpop.permute.xlu0 %5308  ;;  %v5294_v11 = vpop.permute.xlu1 %5293  ;;  %v5226_v36 = vunpack.i.h.bf16 %v7355_v56 }
 0x19f   : > { %4550 = vmatprep.subr.bf16.mxu0 %v645_v42  ;;  %5109 = vmatprep.subr.bf16.mxu1 %v645_v42  ;;  %v5296_v57 = vunpack.i.h.bf16 %v5294_v11  ;;  %v5295_v46 = vunpack.i.l.bf16 %v5294_v11  ;;  %v5235_v42 = vunpack.i.l.bf16 %v7365_v58  ;;  %v638_v58 = vpack.c.bf16 %v7370_v48, %v7336_v50 }
 0x1a0   : > { %v387_v21 = vsel %vm386_vm12, %v5225_v54, %v5226_v36  ;;  %v388_v54 = vsel %vm386_vm12, %v5230_v61, %v5231_v17  ;;  %v639_v48 = vpack.c.bf16 %v7378_v31, %v7343_v44  ;;  %v5245_v17 = vunpack.i.l.bf16 %v7359_v35 }
 0x1a1   : > { %5438 = vrot.lane.b32.xlu1 %v5437_v7, %s6614_s26  ;;  %5453 = vrot.lane.b32.xlu0 %v5452_v40, %s6614_s26  ;;  %v7461_v27 = vsel %vm329_vm6, %v5295_v46, %v5296_v57  ;;  %v5240_v40 = vunpack.i.l.bf16 %v7357_v45  ;;  %v640_v31 = vpack.c.bf16 %v7385_v59, %v7407_v43  ;;  %v5261_v43 = vunpack.i.h.bf16 %v7363_v39 }
 0x1a2   : > { %4551 = vmatpush3.bf16.msk.msra.mxu0 %vm4339_vm11, %v4340_v38  ;;  %5117 = vmatpush3.bf16.msk.msra.mxu1 %vm4339_vm11, %v4340_v38  ;;  %v5329_v3 = vpop.permute.xlu0 %5328  ;;  %v5314_v51 = vpop.permute.xlu1 %5313  ;;  %v5457_v36 = vpack.i.bf16 %v5296_v57, %v7461_v27  ;;  %v5246_v57 = vunpack.i.h.bf16 %v7359_v35  ;;  %vm10057_vm11 = vcmask 941056  }
 0x1a3   : > { %v5331_v52 = vunpack.i.h.bf16 %v5329_v3  ;;  %v5330_v56 = vunpack.i.l.bf16 %v5329_v3  ;;  %v5316_v13 = vunpack.i.h.bf16 %v5314_v51  ;;  %v5315_v29 = vunpack.i.l.bf16 %v5314_v51 }
 0x1a4   : > { %v406_v3 = vsel %vm405_vm13, %v5235_v42, %v5236_v62  ;;  %v407_v50 = vsel %vm405_vm13, %v5240_v40, %v5241_v1  ;;  %v425_v35 = vsel %vm424_vm14, %v5245_v17, %v5246_v57  ;;  %v5256_v42 = vunpack.i.h.bf16 %v7374_v33 }
 0x1a5   : > { %5443 = vrot.lane.b32.xlu1 %v5442_v37, %s6614_s26  ;;  %v370_v47 = vsel %vm367_vm8, %v5315_v29, %v5316_v13  ;;  %v389_v38 = vsel %vm386_vm12, %v5330_v56, %v5331_v52  ;;  %v648_v61 = vpack.c.bf16 %v407_v50, %v406_v3  ;;  %v5251_v37 = vunpack.i.h.bf16 %v7367_v53 }
 0x1a6   : > { %v7470_v11 = vpop.permute.xlu0 %5333  ;;  %v7472_v23 = vpop.permute.xlu1 %5318  ;;  %v646_v7 = vpack.c.bf16 %v387_v21, %v370_v47  ;;  %v647_v46 = vpack.c.bf16 %v389_v38, %v388_v54  ;;  %v5250_v52 = vunpack.i.l.bf16 %v7367_v53  ;;  %v5255_v47 = vunpack.i.l.bf16 %v7374_v33 }
 0x1a7   : > { %v641_v40 = vpack.c.bf16 %v7397_v55, %v7427_v9  ;;  %v5205_v3 = vunpack.i.l.bf16 %v7345_v63  ;;  %v642_v55 = vpack.c.bf16 %v7430_v19, %v7451_v60 }
 0x1a8   : > { %4552 = vmatprep.subr.bf16.mxu0 %v646_v7  ;;  %5110 = vmatprep.subr.bf16.mxu1 %v646_v7  ;;  %v5260_v7 = vunpack.i.l.bf16 %v7363_v39  ;;  %v444_v54 = vsel %vm443_vm15, %v5255_v47, %v5256_v42  ;;  %v4302_v42 = vcombine.high %v10461_v4, %v10460_v6 }
 0x1a9   : > { %5458 = vrot.lane.b32.xlu1 %v5457_v36, %s6614_s26  ;;  %4553 = vmatpush3.bf16.msra.mxu0 %v638_v58  ;;  %v426_v36 = vsel %vm424_vm14, %v5250_v52, %v5251_v37  ;;  %v5271_v37 = vunpack.i.h.bf16 %v7372_v41  ;;  %v5270_v52 = vunpack.i.l.bf16 %v7372_v41  ;;  %v4313_v41 = vcombine.low %v10455_v16, %v10454_v18 }
 0x1aa   : > { %5118 = vmatpush3.bf16.msra.mxu1 %v638_v58  ;;  %v7481_v51 = vpop.permute.xlu0 %5338  ;;  %v7483_v45 = vpop.permute.xlu1 %5323  ;;  %4554 = vmatprep.subr.bf16.mxu0 %v647_v46  ;;  %v445_v9 = vsel %vm443_vm15, %v5260_v7, %v5261_v43  ;;  %v4322_v43 = vcombine.high %v10451_v24, %v10450_v26  ;;  %v4305_v7 = vcombine.low %v10459_v8, %v10458_v10 }
 0x1ab   : > { %5111 = vmatprep.subr.bf16.mxu1 %v647_v46  ;;  %v5206_v46 = vunpack.i.h.bf16 %v7345_v63 }
 0x1ad   : > { %4555 = vmatpush3.bf16.msra.mxu0 %v639_v48 }
 0x1ae   : > { %5119 = vmatpush3.bf16.msra.mxu1 %v639_v48  ;;  %v5359_v56 = vpop.permute.xlu0 %5358  ;;  %v5344_v13 = vpop.permute.xlu1 %5343  ;;  %4556 = vmatprep.subr.bf16.mxu0 %v648_v61 }
 0x1af   : > { %v5361_v44 = vunpack.i.h.bf16 %v5359_v56  ;;  %v5360_v29 = vunpack.i.l.bf16 %v5359_v56  ;;  %v5346_v21 = vunpack.i.h.bf16 %v5344_v13  ;;  %v5345_v62 = vunpack.i.l.bf16 %v5344_v13  ;;  %5112 = vmatprep.subr.bf16.mxu1 %v648_v61 }
 0x1b0   : > { %v651_v61 = vpack.c.bf16 %v445_v9, %v444_v54  ;;  %v349_v56 = vsel %vm348_vm5, %v5205_v3, %v5206_v46  ;;  %v4326_v54 = vcombine.high %v10449_v28, %v10448_v30 }
 0x1b1   : > { %4557 = vmatpush3.bf16.msra.mxu0 %v640_v31  ;;  %v408_v53 = vsel %vm405_vm13, %v5345_v62, %v5346_v21  ;;  %v427_v38 = vsel %vm424_vm14, %v5360_v29, %v5361_v44  ;;  %v4297_v29 = vcombine.low %v10463_v0, %v10462_v2  ;;  %v463_v21 = vsel %vm462_vm7, %v5270_v52, %v5271_v37 }
 0x1b2   : > { %5120 = vmatpush3.bf16.msra.mxu1 %v640_v31  ;;  %v7499_v1 = vpop.permute.xlu1 %5348  ;;  %v649_v59 = vpack.c.bf16 %v425_v35, %v408_v53  ;;  %v650_v33 = vpack.c.bf16 %v427_v38, %v426_v36  ;;  %v5364_v58 = vpop.permute.xlu0 %5363  ;;  %v643_v31 = vpack.c.bf16 %v349_v56, %v7461_v27  ;;  %v4318_v27 = vcombine.high %v10453_v20, %v10452_v22 }
 0x1b3   : > { %v5366_v57 = vunpack.i.h.bf16 %v5364_v58  ;;  %v5365_v17 = vunpack.i.l.bf16 %v5364_v58  ;;  %v4301_v53 = vcombine.low %v10461_v4, %v10460_v6  ;;  %v4317_v38 = vcombine.low %v10453_v20, %v10452_v22 }
 0x1b4   : > { %4558 = vmatprep.subr.bf16.mxu0 %v649_v59  ;;  %5113 = vmatprep.subr.bf16.mxu1 %v649_v59  ;;  %v4306_v59 = vcombine.high %v10459_v8, %v10458_v10  ;;  %v4310_v36 = vcombine.high %v10457_v12, %v10456_v14  ;;  %v4329_v52 = vcombine.low %v10447_v32, %v10447_v32  ;;  %v5275_v56 = vunpack.i.l.bf16 %v7381_v25 }
 0x1b5   : > { %4559 = vmatpush3.bf16.msra.mxu0 %v641_v40  ;;  %v607_v44 = vsel %vm605_vm0, %v5365_v17, %v5366_v57 }
 0x1b6   : > { %5121 = vmatpush3.bf16.msra.mxu1 %v641_v40  ;;  %v5354_v48 = vpop.permute.xlu1 %5353  ;;  %4560 = vmatprep.subr.bf16.mxu0 %v650_v33  ;;  %v4321_v40 = vcombine.low %v10451_v24, %v10450_v26 }
 0x1b7   : > { %v5356_v39 = vunpack.i.h.bf16 %v5354_v48  ;;  %v5355_v50 = vunpack.i.l.bf16 %v5354_v48  ;;  %5114 = vmatprep.subr.bf16.mxu1 %v650_v33  ;;  %v5374_v33 = vpop.permute.xlu0 %5373  ;;  %v4309_v48 = vcombine.low %v10457_v12, %v10456_v14 }
 0x1b8   : > { %v5376_v57 = vunpack.i.h.bf16 %v5374_v33  ;;  %v5375_v17 = vunpack.i.l.bf16 %v5374_v33 }
 0x1b9   : > { %4561 = vmatpush3.bf16.msra.mxu0 %v642_v55  ;;  %v606_v13 = vsel %vm605_vm0, %v5355_v50, %v5356_v39  ;;  %v4325_v39 = vcombine.low %v10449_v28, %v10448_v30  ;;  %v4330_v50 = vcombine.high %v10447_v32, %v10447_v32  ;;  %v10494_v30 = vld [vmem:[#allocation39_spill] sm:$0xff] }
 0x1ba   : > { %5122 = vmatpush3.bf16.msra.mxu1 %v642_v55  ;;  %v5369_v63 = vpop.permute.xlu1 %5368  ;;  %4562 = vmatprep.subr.bf16.mxu0 %v651_v61  ;;  %v660_v35 = vpack.c.bf16 %v607_v44, %v606_v13 }
 0x1bb   : > { %v5371_v19 = vunpack.i.h.bf16 %v5369_v63  ;;  %v5370_v60 = vunpack.i.l.bf16 %v5369_v63  ;;  %5115 = vmatprep.subr.bf16.mxu1 %v651_v61  ;;  %v7546_v46 = vpop.permute.xlu0 %5383  ;;  %v5276_v63 = vunpack.i.h.bf16 %v7381_v25 }
 0x1bd   : > { %v446_v62 = vsel %vm443_vm15, %v5370_v60, %v5371_v19  ;;  %4563 = vmatpush3.bf16.msra.mxu0 %v643_v31  ;;  %v10469_v19 = vld [vmem:[#allocation8_spill] sm:$0xff]  ;;  %v10470_v60 = vld [vmem:[#allocation6_spill] sm:$0xff] }
 0x1be   : > { %5123 = vmatpush3.bf16.msra.mxu1 %v643_v31  ;;  %v652_v47 = vpack.c.bf16 %v463_v21, %v446_v62  ;;  %v7542_v58 = vpop.permute.xlu1 %5378  ;;  %v4300_v31 = vcombine.high %v10470_v60, %v10469_v19 }
 0x1bf   : > { %4618 = vmatprep.subr.bf16.mxu1 %v660_v35  ;;  %v7556_v55 = vpop.permute.xlu0 %5393  ;;  %v464_v35 = vsel %vm462_vm7, %v5275_v56, %v5276_v63 }
 0x1c0   : > { %897 = vmatmul.mubr.bf16.vlgmr.msra.gmra.mrb[0].mxu0 %v4297_v29  ;;  %v465_v29 = vsel %vm462_vm7, %v5375_v17, %v5376_v57 }
 0x1c1   : > { %929 = vmatmul.mubr.bf16.vlgmr.msra.gmra.mrb[0].mxu1 %v4313_v41  ;;  %904 = vmatprep.mubr.bf16.mxu0 %v4302_v42 }
 0x1c2   : > { %4619 = vmatpush3.bf16.msra.mxu1 %v652_v47  ;;  %936 = vmatprep.mubr.bf16.mxu1 %v4318_v27  ;;  %v7548_v3 = vpop.permute.xlu1 %5388  ;;  %v653_v47 = vpack.c.bf16 %v465_v29, %v464_v35  ;;  %v5306_v27 = vunpack.i.h.bf16 %v7409_v34 }
 0x1c6   : > { %v5399_v9 = vpop.permute.xlu1 %5398 }
 0x1c7   : > { %v5401_v61 = vunpack.i.h.bf16 %v5399_v9  ;;  %v5400_v37 = vunpack.i.l.bf16 %v5399_v9  ;;  %v5380_v9 = vunpack.i.l.bf16 %v7542_v58 }
 0x1c8   : > { %905 = vmatmul.mubr.bf16.gmra.mrb[4].mxu0 %v4301_v53  ;;  %v5305_v53 = vunpack.i.l.bf16 %v7409_v34 }
 0x1c9   : > { %937 = vmatmul.mubr.bf16.gmra.mrb[4].mxu1 %v4317_v38  ;;  %912 = vmatprep.mubr.bf16.mxu0 %v4306_v59  ;;  %v608_v21 = vsel %vm605_vm0, %v5400_v37, %v5401_v61  ;;  %v5286_v38 = vunpack.i.h.bf16 %v7411_v49  ;;  %v5285_v59 = vunpack.i.l.bf16 %v7411_v49  ;;  %v5311_v61 = vunpack.i.h.bf16 %v7442_v5 }
 0x1ca   : > { %944 = vmatprep.mubr.bf16.mxu1 %v4322_v43  ;;  %v5310_v37 = vunpack.i.l.bf16 %v7442_v5  ;;  %v5386_v5 = vunpack.i.h.bf16 %v7546_v46 }
 0x1cc   : > { %v501_v29 = vsel %vm10057_vm11, %v5310_v37, %v5311_v61 }
 0x1d0   : > { %913 = vmatmul.mubr.bf16.gmra.mrb[8].mxu0 %v4305_v7 }
 0x1d1   : > { %945 = vmatmul.mubr.bf16.gmra.mrb[8].mxu1 %v4321_v40  ;;  %920 = vmatprep.mubr.bf16.mxu0 %v4310_v36 }
 0x1d2   : > { %952 = vmatprep.mubr.bf16.mxu1 %v4326_v54 }
 0x1d8   : > { %921 = vmatmul.mubr.bf16.gmra.mrb[12].mxu0 %v4309_v48  ;;  %v483_v48 = vsel %vm10056_vm10, %v5305_v53, %v5306_v27  ;;  %v5321_v27 = vunpack.i.h.bf16 %v7472_v23  ;;  %v5320_v53 = vunpack.i.l.bf16 %v7472_v23  ;;  %v5335_v23 = vunpack.i.l.bf16 %v7470_v11 }
 0x1d9   : > { %953 = vmatmul.mubr.bf16.gmra.mrb[12].mxu1 %v4325_v39  ;;  %v482_v39 = vsel %vm10056_vm10, %v5285_v59, %v5286_v38 }
 0x1da   : > { %960 = vmatprep.mubr.bf16.mxu1 %v4330_v50  ;;  %v5381_v50 = vunpack.i.h.bf16 %v7542_v58 }
 0x1de   : > { %v5404_v13 = vpop.permute.xlu0 %5403 }
 0x1df   : > { %v5406_v44 = vunpack.i.h.bf16 %v5404_v13  ;;  %v5405_v41 = vunpack.i.l.bf16 %v5404_v13 }
 0x1e1   : > { %v609_v62 = vsel %vm605_vm0, %v5405_v41, %v5406_v44  ;;  %961 = vmatmul.mubr.bf16.gmra.mrb[16].mxu1 %v4329_v52  ;;  %v484_v44 = vsel %vm10056_vm10, %v5380_v9, %v5381_v50  ;;  %v5336_v50 = vunpack.i.h.bf16 %v7470_v11  ;;  %v502_v9 = vsel %vm10057_vm11, %v5320_v53, %v5321_v27 }
 0x1e2   : > { %v661_v42 = vpack.c.bf16 %v609_v62, %v608_v21  ;;  %4342 = vmatprep.mubr.msk.bf16.mxu1 %vm405_vm13, %v4300_v31  ;;  %v5409_v25 = vpop.permute.xlu1 %5408  ;;  %v654_v31 = vpack.c.bf16 %v483_v48, %v482_v39  ;;  %v655_v35 = vpack.c.bf16 %v501_v29, %v484_v44  ;;  %vm10058_vm10 = vcmask 932864  }
 0x1e3   : > { %v5411_v43 = vunpack.i.h.bf16 %v5409_v25  ;;  %v5410_v7 = vunpack.i.l.bf16 %v5409_v25  ;;  %v521_v44 = vsel %vm10058_vm10, %v5335_v23, %v5336_v50  ;;  %v5351_v53 = vunpack.i.h.bf16 %v7499_v1  ;;  %v10472_v50 = vld [vmem:[#allocation10_spill] sm:$0xff] }
 0x1e4   : > { %4620 = vmatprep.subr.bf16.mxu1 %v661_v42  ;;  %v5385_v42 = vunpack.i.l.bf16 %v7546_v46 }
 0x1e5   : > { %4621 = vmatpush3.bf16.msra.mxu1 %v653_v47  ;;  %v610_v17 = vsel %vm605_vm0, %v5410_v7, %v5411_v43 }
 0x1e6   : > { %v5414_v40 = vpop.permute.xlu1 %5413 }
 0x1e7   : > { %v5416_v34 = vunpack.i.h.bf16 %v5414_v40  ;;  %v5415_v57 = vunpack.i.l.bf16 %v5414_v40  ;;  %v5326_v40 = vunpack.i.h.bf16 %v7483_v45 }
 0x1e9   : > { %v612_v58 = vsel %vm605_vm0, %v5415_v57, %v5416_v34 }
 0x202   : > { %v5419_v36 = vpop.permute.xlu0 %5418 }
 0x203   : > { %v5421_v33 = vunpack.i.h.bf16 %v5419_v36  ;;  %v5420_v54 = vunpack.i.l.bf16 %v5419_v36  ;;  %v5325_v36 = vunpack.i.l.bf16 %v7483_v45 }
 0x205   : > { %v611_v49 = vsel %vm605_vm0, %v5420_v54, %v5421_v33  ;;  %v503_v33 = vsel %vm10057_vm11, %v5385_v42, %v5386_v5  ;;  %v520_v37 = vsel %vm10058_vm10, %v5325_v36, %v5326_v40  ;;  %vm10067_vm11 = vcmask 924672  }
 0x206   : > { %v5424_v52 = vpop.permute.xlu0 %5423  ;;  %v662_v63 = vpack.c.bf16 %v611_v49, %v610_v17  ;;  %v656_v61 = vpack.c.bf16 %v503_v33, %v502_v9  ;;  %v5396_v5 = vunpack.i.h.bf16 %v7556_v55  ;;  %v5395_v42 = vunpack.i.l.bf16 %v7556_v55 }
 0x207   : > { %v5426_v56 = vunpack.i.h.bf16 %v5424_v52  ;;  %v5425_v13 = vunpack.i.l.bf16 %v5424_v52  ;;  %v5391_v52 = vunpack.i.h.bf16 %v7548_v3 }
 0x208   : > { %4622 = vmatprep.subr.bf16.mxu1 %v662_v63  ;;  %v5390_v63 = vunpack.i.l.bf16 %v7548_v3  ;;  %v657_v3 = vpack.c.bf16 %v521_v44, %v520_v37  ;;  %v541_v55 = vsel %vm10067_vm11, %v5395_v42, %v5396_v5  ;;  %v10480_v44 = vld [vmem:[#allocation26_spill] sm:$0xff] }
 0x209   : > { %4623 = vmatpush3.bf16.msra.mxu1 %v654_v31  ;;  %v613_v41 = vsel %vm605_vm0, %v5425_v13, %v5426_v56  ;;  %v10484_v5 = vld [vmem:[#allocation34_spill] sm:$0xff] }
 0x20a   : > { %v5429_v21 = vpop.permute.xlu0 %5428  ;;  %v663_v62 = vpack.c.bf16 %v613_v41, %v612_v58  ;;  %v5341_v58 = vunpack.i.h.bf16 %v7481_v51  ;;  %v5340_v41 = vunpack.i.l.bf16 %v7481_v51 }
 0x20b   : > { %v5431_v47 = vunpack.i.h.bf16 %v5429_v21  ;;  %v5430_v25 = vunpack.i.l.bf16 %v5429_v21 }
 0x20c   : > { %4624 = vmatprep.subr.bf16.mxu1 %v663_v62  ;;  %v539_v51 = vsel %vm10067_vm11, %v5340_v41, %v5341_v58 }
 0x20d   : > { %4625 = vmatpush3.bf16.msra.mxu1 %v655_v35  ;;  %v615_v39 = vsel %vm605_vm0, %v5430_v25, %v5431_v47  ;;  %v522_v47 = vsel %vm10058_vm10, %v5390_v63, %v5391_v52  ;;  %vm860_vm10 = vcmask 1043456   ;;  %v10477_v63 = vld [vmem:[#allocation24_spill] sm:$0xff] }
 0x20e   : > { %v658_v36 = vpack.c.bf16 %v539_v51, %v522_v47 }
 0x20f   : > { %v5434_v38 = vpop.permute.xlu1 %5433  ;;  %v5449_v59 = vpop.permute.xlu0 %5448 }
 0x210   : > { %v5436_v43 = vunpack.i.h.bf16 %v5434_v38  ;;  %v5435_v7 = vunpack.i.l.bf16 %v5434_v38  ;;  %v5451_v54 = vunpack.i.h.bf16 %v5449_v59  ;;  %v5450_v48 = vunpack.i.l.bf16 %v5449_v59 }
 0x211   : > { %v5350_v38 = vunpack.i.l.bf16 %v7499_v1  ;;  %v4299_v1 = vcombine.low %v10470_v60, %v10469_v19 }
 0x212   : > { %v614_v46 = vsel %vm605_vm0, %v5435_v7, %v5436_v43  ;;  %v617_v31 = vsel %vm605_vm0, %v5450_v48, %v5451_v54 }
 0x213   : > { %v5439_v34 = vpop.permute.xlu1 %5438  ;;  %v5454_v57 = vpop.permute.xlu0 %5453  ;;  %v664_v17 = vpack.c.bf16 %v615_v39, %v614_v46  ;;  %v540_v54 = vsel %vm10067_vm11, %v5350_v38, %v5351_v53  ;;  %v10471_v39 = vld [vmem:[#allocation12_spill] sm:$0xff]  ;;  %vm1097_vm11 = vcmask 15360  }
 0x214   : > { %v5441_v49 = vunpack.i.h.bf16 %v5439_v34  ;;  %v5440_v45 = vunpack.i.l.bf16 %v5439_v34  ;;  %v5456_v56 = vunpack.i.h.bf16 %v5454_v57  ;;  %v5455_v13 = vunpack.i.l.bf16 %v5454_v57  ;;  %v10473_v34 = vld [vmem:[#allocation16_spill] sm:$0xff]  ;;  %v10474_v57 = vld [vmem:[#allocation14_spill] sm:$0xff] }
 0x215   : > { %4626 = vmatprep.subr.bf16.mxu1 %v664_v17  ;;  %v659_v46 = vpack.c.bf16 %v541_v55, %v540_v54  ;;  %v4304_v23 = vcombine.high %v10472_v50, %v10471_v39  ;;  %v4303_v9 = vcombine.low %v10472_v50, %v10471_v39  ;;  %v4308_v17 = vcombine.high %v10474_v57, %v10473_v34 }
 0x216   : > { %4627 = vmatpush3.bf16.msra.mxu1 %v656_v61  ;;  %v616_v11 = vsel %vm605_vm0, %v5440_v45, %v5441_v49  ;;  %v619_v27 = vsel %vm605_vm0, %v5455_v13, %v5456_v56  ;;  %v4307_v49 = vcombine.low %v10474_v57, %v10473_v34  ;;  %v10475_v45 = vld [vmem:[#allocation20_spill] sm:$0xff]  ;;  %v10476_v61 = vld [vmem:[#allocation18_spill] sm:$0xff] }
 0x217   : > { %v5444_v29 = vpop.permute.xlu1 %5443  ;;  %v665_v21 = vpack.c.bf16 %v617_v31, %v616_v11  ;;  %v4312_v37 = vcombine.high %v10476_v61, %v10475_v45  ;;  %v4311_v52 = vcombine.low %v10476_v61, %v10475_v45  ;;  %v10478_v56 = vld [vmem:[#allocation22_spill] sm:$0xff]  ;;  %v10479_v31 = vld [vmem:[#allocation28_spill] sm:$0xff] }
 0x218   : > { %v5446_v62 = vunpack.i.h.bf16 %v5444_v29  ;;  %v5445_v35 = vunpack.i.l.bf16 %v5444_v29  ;;  %v4316_v13 = vcombine.high %v10478_v56, %v10477_v63  ;;  %v4315_v11 = vcombine.low %v10478_v56, %v10477_v63  ;;  %v10481_v29 = vld [vmem:[#allocation32_spill] sm:$0xff] }
 0x219   : > { %4628 = vmatprep.subr.bf16.mxu1 %v665_v21  ;;  %v4320_v58 = vcombine.high %v10480_v44, %v10479_v31  ;;  %v4319_v41 = vcombine.low %v10480_v44, %v10479_v31  ;;  %v10482_v21 = vld [vmem:[#allocation30_spill] sm:$0xff] }
 0x21a   : > { %4629 = vmatpush3.bf16.msra.mxu1 %v657_v3  ;;  %v618_v25 = vsel %vm605_vm0, %v5445_v35, %v5446_v62  ;;  %v4324_v62 = vcombine.high %v10482_v21, %v10481_v29  ;;  %v4323_v35 = vcombine.low %v10482_v21, %v10481_v29  ;;  %v10483_v3 = vld [vmem:[#allocation36_spill] sm:$0xff]  ;;  %v10493_v29 = vld [vmem:[#allocation46_spill] sm:$0xff] }
 0x21b   : > { %v5459_v59 = vpop.permute.xlu1 %5458  ;;  %v666_v43 = vpack.c.bf16 %v619_v27, %v618_v25  ;;  %v4328_v42 = vcombine.high %v10484_v5, %v10483_v3  ;;  %v4327_v47 = vcombine.low %v10484_v5, %v10483_v3  ;;  %v10485_v25 = vld [vmem:[#allocation38_spill] sm:$0xff]  ;;  %v4352_v31 = vcombine.high %v10494_v30, %v10493_v29 }
 0x21c   : > { %v5461_v7 = vunpack.i.h.bf16 %v5459_v59  ;;  %v5460_v40 = vunpack.i.l.bf16 %v5459_v59  ;;  %v4332_v27 = vcombine.high %v10485_v25, %v10485_v25  ;;  %v4331_v51 = vcombine.low %v10485_v25, %v10485_v25 }
 0x21d   : > { %4630 = vmatprep.subr.bf16.mxu1 %v666_v43  ;;  %3228 = vmatprep.mubr.bf16.mxu0 %v4352_v31 }
 0x21e   : > { %4631 = vmatpush3.bf16.msra.mxu1 %v658_v36  ;;  %v620_v33 = vsel %vm605_vm0, %v5460_v40, %v5461_v7 }
 0x21f   : > { %v667_v48 = vpack.c.bf16 %v620_v33, %v620_v33 }
 0x221   : > { %5124 = vmatprep.subr.msk.bf16.mxu1 %vm860_vm10, %v667_v48 }
 0x222   : > { %4633 = vmatpush3.bf16.msra.mxu1 %v659_v46 }
 0x225   : > { %1001 = vmatmul.mubr.bf16.vlgmr.msra.gmra.mrb[20].mxu1 %v4299_v1 }
 0x226   : > { %4343 = vmatprep.mubr.msk.bf16.mxu1 %vm405_vm13, %v4304_v23 }
 0x22d   : > { %1009 = vmatmul.mubr.bf16.gmra.mrb[24].mxu1 %v4303_v9 }
 0x22e   : > { %4344 = vmatprep.mubr.msk.bf16.mxu1 %vm405_vm13, %v4308_v17 }
 0x235   : > { %1017 = vmatmul.mubr.bf16.gmra.mrb[28].mxu1 %v4307_v49 }
 0x236   : > { %4345 = vmatprep.mubr.msk.bf16.mxu1 %vm405_vm13, %v4312_v37 }
 0x23d   : > { %1025 = vmatmul.mubr.bf16.gmra.mrb[32].mxu1 %v4311_v52 }
 0x23e   : > { %4346 = vmatprep.mubr.msk.bf16.mxu1 %vm405_vm13, %v4316_v13 }
 0x245   : > { %1033 = vmatmul.mubr.bf16.gmra.mrb[36].mxu1 %v4315_v11 }
 0x246   : > { %4347 = vmatprep.mubr.msk.bf16.mxu1 %vm405_vm13, %v4320_v58 }
 0x24d   : > { %1041 = vmatmul.mubr.bf16.gmra.mrb[40].mxu1 %v4319_v41 }
 0x24e   : > { %4348 = vmatprep.mubr.msk.bf16.mxu1 %vm405_vm13, %v4324_v62 }
 0x255   : > { %1049 = vmatmul.mubr.bf16.gmra.mrb[44].mxu1 %v4323_v35 }
 0x256   : > { %4349 = vmatprep.mubr.msk.bf16.mxu1 %vm405_vm13, %v4328_v42 }
 0x25d   : > { %1057 = vmatmul.mubr.bf16.gmra.mrb[48].mxu1 %v4327_v47 }
 0x25e   : > { %4350 = vmatprep.mubr.msk.bf16.mxu1 %vm405_vm13, %v4332_v27 }
 0x265   : > { %1065 = vmatmul.mubr.bf16.gmra.mrb[52].mxu1 %v4331_v51 }
 0x293   : > { %v4564_v53 = vpop.f32.mrb[0].mxu0 }
 0x294   : > { %v4588_v38 = vpop.f32.mrb[0].mxu1  ;;  %v4565_v59 = vpop.f32.mrb[1].mxu0 }
 0x295   : > { %v4589_v43 = vpop.f32.mrb[1].mxu1  ;;  %v4566_v7 = vadd.f32 %v4565_v59, %v4564_v53  ;;  %v4567_v40 = vpop.f32.mrb[2].mxu0 }
 0x296   : > { %v7659_v36 = vadd.f32 %v4589_v43, %v4588_v38  ;;  %v4591_v55 = vpop.f32.mrb[2].mxu1  ;;  %v4568_v33 = vpop.f32.mrb[3].mxu0 }
 0x297   : > { %v4592_v54 = vpop.f32.mrb[3].mxu1  ;;  %v4569_v48 = vadd.f32 %v4568_v33, %v4567_v40 }
 0x298   : > { %v7661_v46 = vadd.f32 %v4592_v54, %v4591_v55 }
 0x29b   : > { %v4570_v1 = vpop.f32.mrb[4].mxu0 }
 0x29c   : > { %v4594_v23 = vpop.f32.mrb[4].mxu1  ;;  %v4571_v9 = vpop.f32.mrb[5].mxu0 }
 0x29d   : > { %v4595_v17 = vpop.f32.mrb[5].mxu1  ;;  %v4572_v49 = vadd.f32 %v4571_v9, %v4570_v1  ;;  %v4573_v37 = vpop.f32.mrb[6].mxu0 }
 0x29e   : > { %v7663_v52 = vadd.f32 %v4595_v17, %v4594_v23  ;;  %v4597_v13 = vpop.f32.mrb[6].mxu1  ;;  %v4574_v11 = vpop.f32.mrb[7].mxu0 }
 0x29f   : > { %v4598_v58 = vpop.f32.mrb[7].mxu1  ;;  %v4575_v41 = vadd.f32 %v4574_v11, %v4573_v37 }
 0x2a0   : > { %v7665_v62 = vadd.f32 %v4598_v58, %v4597_v13 }
 0x2a3   : > { %v4576_v35 = vpop.f32.mrb[8].mxu0 }
 0x2a4   : > { %v4600_v42 = vpop.f32.mrb[8].mxu1  ;;  %v4577_v47 = vpop.f32.mrb[9].mxu0 }
 0x2a5   : > { %v4601_v27 = vpop.f32.mrb[9].mxu1  ;;  %v4578_v51 = vadd.f32 %v4577_v47, %v4576_v35  ;;  %v4579_v53 = vpop.f32.mrb[10].mxu0 }
 0x2a6   : > { %v7667_v38 = vadd.f32 %v4601_v27, %v4600_v42  ;;  %v4603_v59 = vpop.f32.mrb[10].mxu1  ;;  %v4580_v43 = vpop.f32.mrb[11].mxu0 }
 0x2a7   : > { %v4604_v40 = vpop.f32.mrb[11].mxu1  ;;  %v4581_v55 = vadd.f32 %v4580_v43, %v4579_v53 }
 0x2a8   : > { %v7669_v33 = vadd.f32 %v4604_v40, %v4603_v59 }
 0x2ab   : > { %v4582_v54 = vpop.f32.mrb[12].mxu0 }
 0x2ac   : > { %v4606_v1 = vpop.f32.mrb[12].mxu1  ;;  %v4583_v23 = vpop.f32.mrb[13].mxu0 }
 0x2ad   : > { %v4607_v9 = vpop.f32.mrb[13].mxu1  ;;  %v4584_v17 = vadd.f32 %v4583_v23, %v4582_v54  ;;  %v4585_v37 = vpop.f32.mrb[14].mxu0 }
 0x2ae   : > { %v7671_v13 = vadd.f32 %v4607_v9, %v4606_v1  ;;  %v4609_v11 = vpop.f32.mrb[14].mxu1  ;;  %v4586_v58 = vpop.f32.mrb[15].mxu0 }
 0x2af   : > { %v4610_v35 = vpop.f32.mrb[15].mxu1  ;;  %v4587_v47 = vadd.f32 %v4586_v58, %v4585_v37 }
 0x2b0   : > { %v7673_v42 = vadd.f32 %v4610_v35, %v4609_v11 }
 0x2b4   : > { %v4612_v27 = vpop.f32.mrb[16].mxu1 }
 0x2b5   : > { %v4613_v0 = vpop.f32.mrb[17].mxu1 }
 0x2b6   : > { %v7675_v2 = vadd.f32 %v4613_v0, %v4612_v27  ;;  %v4615_v53 = vpop.f32.mrb[18].mxu1 }
 0x2b7   : > { %v4616_v59 = vpop.f32.mrb[19].mxu1 }
 0x2f8   : > { %v4634_v43 = vpop.f32.mrb[20].mxu1 }
 0x2f9   : > { %v4635_v40 = vpop.f32.mrb[21].mxu1 }
 0x2fa   : > { %v4636_v3 = vadd.f32 %v4635_v40, %v4634_v43  ;;  %v4637_v4 = vpop.f32.mrb[22].mxu1 }
 0x2fb   : > { %v4638_v54 = vpop.f32.mrb[23].mxu1 }
 0x2fc   : > { %v1003_v23 = vadd.f32 %v4636_v3, %v4566_v7  ;;  %v4639_v1 = vadd.f32 %v4638_v54, %v4637_v4 }
 0x2fe   : > { %v1006_v9 = vadd.f32 %v4639_v1, %v4569_v48 }
 0x300   : > { %v5462_v5 = vpack.i.bf16 %v1006_v9, %v1003_v23  ;;  %v4640_v6 = vpop.f32.mrb[24].mxu1 }
 0x301   : > { %v4641_v8 = vpop.f32.mrb[25].mxu1 }
 0x302   : > { %5463 = vrot.lane.b32.xlu0 %v5462_v5, %s6616_s27  ;;  %v4642_v37 = vadd.f32 %v4641_v8, %v4640_v6  ;;  %v4643_v11 = vpop.f32.mrb[26].mxu1 }
 0x303   : > { %v4644_v58 = vpop.f32.mrb[27].mxu1 }
 0x304   : > { %v1011_v0 = vadd.f32 %v4642_v37, %v4572_v49  ;;  %v4645_v35 = vadd.f32 %v4644_v58, %v4643_v11 }
 0x306   : > { %v1014_v27 = vadd.f32 %v4645_v35, %v4575_v41 }
 0x308   : > { %v5467_v53 = vpack.i.bf16 %v1014_v27, %v1011_v0  ;;  %v4646_v59 = vpop.f32.mrb[28].mxu1 }
 0x309   : > { %v4647_v10 = vpop.f32.mrb[29].mxu1 }
 0x30a   : > { %5468 = vrot.lane.b32.xlu1 %v5467_v53, %s6616_s27  ;;  %v4648_v43 = vadd.f32 %v4647_v10, %v4646_v59  ;;  %v4649_v40 = vpop.f32.mrb[30].mxu1 }
 0x30b   : > { %v4650_v3 = vpop.f32.mrb[31].mxu1 }
 0x30c   : > { %v1019_v4 = vadd.f32 %v4648_v43, %v4578_v51  ;;  %v4651_v7 = vadd.f32 %v4650_v3, %v4649_v40 }
 0x30e   : > { %v1022_v48 = vadd.f32 %v4651_v7, %v4581_v55 }
 0x310   : > { %v1072_v54 = vsel %vm860_vm10, %v1022_v48, 0.0  ;;  %v4652_v23 = vpop.f32.mrb[32].mxu1  ;;  %v1272_v41 = vrot.slane %v1022_v48, 4 }
 0x311   : > { %v4653_v5 = vpop.f32.mrb[33].mxu1  ;;  %v5472_v6 = vpack.i.bf16 %v1072_v54, %v1019_v4 }
 0x312   : > { %v4654_v8 = vadd.f32 %v4653_v5, %v4652_v23  ;;  %v4655_v1 = vpop.f32.mrb[34].mxu1 }
 0x313   : > { %v4656_v49 = vpop.f32.mrb[35].mxu1  ;;  %5473 = vrot.lane.b32.xlu0 %v5472_v6, %s6616_s27 }
 0x314   : > { %v1027_v9 = vadd.f32 %v4654_v8, %v4584_v17  ;;  %v4657_v37 = vadd.f32 %v4656_v49, %v4655_v1 }
 0x316   : > { %v1273_v11 = vrot.slane %v1027_v9, 4  ;;  %v1030_v58 = vadd.f32 %v4657_v37, %v4587_v47 }
 0x318   : > { %v1275_v10 = vrot.slane %v1030_v58, 4  ;;  %v4658_v0 = vpop.f32.mrb[36].mxu1  ;;  %v1274_v51 = vsel %vm860_vm10, %v1272_v41, %v1273_v11 }
 0x319   : > { %v4659_v35 = vpop.f32.mrb[37].mxu1 }
 0x31a   : > { %v4660_v55 = vadd.f32 %v4659_v35, %v4658_v0  ;;  %v4661_v27 = vpop.f32.mrb[38].mxu1  ;;  %v1276_v53 = vsel %vm860_vm10, %v1273_v11, %v1275_v10 }
 0x31b   : > { %v4662_v59 = vpop.f32.mrb[39].mxu1  ;;  %v5477_v43 = vpack.i.bf16 %v1276_v53, %v1274_v51 }
 0x31c   : > { %v1035_v40 = vadd.f32 %v4660_v55, %v7659_v36  ;;  %v4663_v3 = vadd.f32 %v4662_v59, %v4661_v27 }
 0x31d   : > { %5478 = vrot.lane.b32.xlu1 %v5477_v43, %s6617_s28 }
 0x31e   : > { %v1277_v17 = vrot.slane %v1035_v40, 4  ;;  %v1038_v4 = vadd.f32 %v4663_v3, %v7661_v46 }
 0x320   : > { %v1279_v47 = vrot.slane %v1038_v4, 4  ;;  %v4664_v7 = vpop.f32.mrb[40].mxu1  ;;  %v1278_v48 = vsel %vm860_vm10, %v1275_v10, %v1277_v17 }
 0x321   : > { %v4665_v54 = vpop.f32.mrb[41].mxu1 }
 0x322   : > { %v4666_v23 = vadd.f32 %v4665_v54, %v4664_v7  ;;  %v4667_v5 = vpop.f32.mrb[42].mxu1  ;;  %v1280_v6 = vsel %vm860_vm10, %v1277_v17, %v1279_v47 }
 0x323   : > { %v4668_v8 = vpop.f32.mrb[43].mxu1  ;;  %v5482_v1 = vpack.i.bf16 %v1280_v6, %v1278_v48 }
 0x324   : > { %v1043_v49 = vadd.f32 %v4666_v23, %v7663_v52  ;;  %v4669_v36 = vadd.f32 %v4668_v8, %v4667_v5 }
 0x325   : > { %5483 = vrot.lane.b32.xlu0 %v5482_v1, %s6617_s28 }
 0x326   : > { %v1281_v41 = vrot.slane %v1043_v49, 4  ;;  %v1046_v9 = vadd.f32 %v4669_v36, %v7665_v62 }
 0x328   : > { %v4670_v37 = vpop.f32.mrb[44].mxu1  ;;  %v1282_v46 = vsel %vm860_vm10, %v1279_v47, %v1281_v41  ;;  %v1284_v11 = vsel %vm860_vm10, %v1281_v41, 0.0 }
 0x329   : > { %v4671_v58 = vpop.f32.mrb[45].mxu1  ;;  %v5487_v10 = vpack.i.bf16 %v1284_v11, %v1282_v46 }
 0x32a   : > { %v4672_v0 = vadd.f32 %v4671_v58, %v4670_v37  ;;  %v4673_v51 = vpop.f32.mrb[46].mxu1 }
 0x32b   : > { %v4674_v35 = vpop.f32.mrb[47].mxu1  ;;  %5488 = vrot.lane.b32.xlu1 %v5487_v10, %s6617_s28 }
 0x32c   : > { %v1051_v55 = vadd.f32 %v4672_v0, %v7667_v38  ;;  %v4675_v27 = vadd.f32 %v4674_v35, %v4673_v51 }
 0x32e   : > { %v1054_v52 = vadd.f32 %v4675_v27, %v7669_v33  ;;  %v5492_v53 = vpack.i.bf16 %v1051_v55, %v1046_v9 }
 0x330   : > { %v4676_v59 = vpop.f32.mrb[48].mxu1  ;;  %5493 = vrot.lane.b32.xlu0 %v5492_v53, %s6598_s4 }
 0x331   : > { %v4677_v62 = vpop.f32.mrb[49].mxu1 }
 0x332   : > { %v4678_v43 = vadd.f32 %v4677_v62, %v4676_v59  ;;  %v4679_v40 = vpop.f32.mrb[50].mxu1 }
 0x333   : > { %v4680_v3 = vpop.f32.mrb[51].mxu1 }
 0x334   : > { %v1059_v17 = vadd.f32 %v4678_v43, %v7671_v13  ;;  %v4681_v4 = vadd.f32 %v4680_v3, %v4679_v40 }
 0x336   : > { %v1062_v47 = vadd.f32 %v4681_v4, %v7673_v42  ;;  %v5497_v7 = vpack.i.bf16 %v1059_v17, %v1054_v52 }
 0x338   : > { %v4682_v48 = vpop.f32.mrb[52].mxu1  ;;  %5498 = vrot.lane.b32.xlu1 %v5497_v7, %s6598_s4 }
 0x339   : > { %v4683_v38 = vpop.f32.mrb[53].mxu1 }
 0x33a   : > { %v4684_v54 = vadd.f32 %v4683_v38, %v4682_v48  ;;  %v4685_v33 = vpop.f32.mrb[54].mxu1 }
 0x33b   : > { %v4686_v23 = vpop.f32.mrb[55].mxu1 }
 0x33c   : > { %v1067_v5 = vadd.f32 %v4684_v54, %v7675_v2 }
 0x33e   : > { %v1689_v6 = vsel %vm860_vm10, %v1067_v5, 0.0  ;;  %vm1304_vm10 = vcmask 39936  }
 0x33f   : > { %v5502_v8 = vpack.i.bf16 %v1689_v6, %v1062_v47 }
 0x341   : > { %5503 = vrot.lane.b32.xlu0 %v5502_v8, %s6598_s4 }
 0x374   : > { %v5464_v1 = vpop.permute.xlu0 %5463 }
 0x375   : > { %v7697_v13 = vunpack.i.h.bf16 %v5464_v1  ;;  %v7699_v42 = vunpack.i.l.bf16 %v5464_v1 }
 0x377   : > { %v1099_v36 = vsel %vm1097_vm11, 0.0, %v7697_v13  ;;  %v1105_v2 = vsel %vm1097_vm11, %v7697_v13, 0.0  ;;  %v1098_v41 = vsel %vm1097_vm11, 0.0, %v7699_v42  ;;  %v1104_v37 = vsel %vm1097_vm11, %v7699_v42, 0.0 }
 0x378   : > { %v5527_v9 = vpack.i.bf16 %v1105_v2, %v1099_v36  ;;  %v5507_v46 = vpack.i.bf16 %v1104_v37, %v1098_v41 }
 0x37a   : > { %5528 = vrot.lane.b32.xlu0 %v5527_v9, %s6600_s14  ;;  %5508 = vrot.lane.b32.xlu1 %v5507_v46, %s6600_s14 }
 0x37c   : > { %v5469_v11 = vpop.permute.xlu1 %5468 }
 0x37d   : > { %v7713_v58 = vunpack.i.h.bf16 %v5469_v11  ;;  %v7715_v10 = vunpack.i.l.bf16 %v5469_v11 }
 0x37e   : > { %5533 = vrot.lane.b32.xlu0 %v5527_v9, %s6599_s13  ;;  %5513 = vrot.lane.b32.xlu1 %v5507_v46, %s6599_s13 }
 0x37f   : > { %v1101_v51 = vsel %vm1097_vm11, 0.0, %v7713_v58  ;;  %v1107_v35 = vsel %vm1097_vm11, %v7713_v58, 0.0  ;;  %v1100_v27 = vsel %vm1097_vm11, 0.0, %v7715_v10  ;;  %v1106_v52 = vsel %vm1097_vm11, %v7715_v10, 0.0 }
 0x380   : > { %v5567_v62 = vpack.i.bf16 %v1107_v35, %v1101_v51  ;;  %v5547_v40 = vpack.i.bf16 %v1106_v52, %v1100_v27 }
 0x382   : > { %5538 = vrot.lane.b32.xlu0 %v5527_v9, %s6601_s2  ;;  %5518 = vrot.lane.b32.xlu1 %v5507_v46, %s6601_s2 }
 0x385   : > { %v5474_v55 = vpop.permute.xlu0 %5473 }
 0x386   : > { %5543 = vrot.lane.b32.xlu0 %v5527_v9, %s6602_s15  ;;  %v7732_v53 = vunpack.i.h.bf16 %v5474_v55  ;;  %v7734_v59 = vunpack.i.l.bf16 %v5474_v55  ;;  %5523 = vrot.lane.b32.xlu1 %v5507_v46, %s6602_s15 }
 0x388   : > { %v1103_v47 = vsel %vm1097_vm11, 0.0, %v7732_v53  ;;  %v1109_v7 = vsel %vm1097_vm11, %v7732_v53, 0.0  ;;  %v1102_v48 = vsel %vm1097_vm11, 0.0, %v7734_v59  ;;  %v1108_v38 = vsel %vm1097_vm11, %v7734_v59, 0.0 }
 0x389   : > { %v5607_v5 = vpack.i.bf16 %v1109_v7, %v1103_v47  ;;  %v5587_v8 = vpack.i.bf16 %v1108_v38, %v1102_v48 }
 0x38a   : > { %5568 = vrot.lane.b32.xlu0 %v5567_v62, %s6600_s14  ;;  %5548 = vrot.lane.b32.xlu1 %v5547_v40, %s6600_s14 }
 0x38e   : > { %5573 = vrot.lane.b32.xlu0 %v5567_v62, %s6599_s13  ;;  %5553 = vrot.lane.b32.xlu1 %v5547_v40, %s6599_s13 }
 0x38f   : > { %v5479_v3 = vpop.permute.xlu1 %5478 }
 0x390   : > { %v7745_v17 = vunpack.i.h.bf16 %v5479_v3  ;;  %v7747_v4 = vunpack.i.l.bf16 %v5479_v3 }
 0x392   : > { %5578 = vrot.lane.b32.xlu0 %v5567_v62, %s6601_s2  ;;  %5558 = vrot.lane.b32.xlu1 %v5547_v40, %s6601_s2  ;;  %v1305_v9 = vsel %vm1304_vm10, 0.0, %v7747_v4  ;;  %v1311_v37 = vsel %vm1304_vm10, %v7747_v4, 0.0  ;;  %v1306_v46 = vsel %vm1304_vm10, 0.0, %v7745_v17  ;;  %v1312_v11 = vsel %vm1304_vm10, %v7745_v17, 0.0 }
 0x393   : > { %v5627_v55 = vpack.i.bf16 %v1311_v37, %v1305_v9  ;;  %v5677_v27 = vpack.i.bf16 %v1312_v11, %v1306_v46 }
 0x396   : > { %5583 = vrot.lane.b32.xlu0 %v5567_v62, %s6602_s15  ;;  %5563 = vrot.lane.b32.xlu1 %v5547_v40, %s6602_s15 }
 0x397   : > { %v5484_v54 = vpop.permute.xlu0 %5483 }
 0x398   : > { %v7759_v33 = vunpack.i.h.bf16 %v5484_v54  ;;  %v7761_v23 = vunpack.i.l.bf16 %v5484_v54 }
 0x39a   : > { %5608 = vrot.lane.b32.xlu0 %v5607_v5, %s6600_s14  ;;  %5588 = vrot.lane.b32.xlu1 %v5587_v8, %s6600_s14 }
 0x39d   : > { %v7785_v51 = vpop.permute.xlu1 %5488 }
 0x39e   : > { %5613 = vrot.lane.b32.xlu0 %v5607_v5, %s6599_s13  ;;  %5593 = vrot.lane.b32.xlu1 %v5587_v8, %s6599_s13  ;;  %v7949_v26 = vunpack.i.h.bf16 %v7785_v51 }
 0x3a2   : > { %v5494_v36 = vpop.permute.xlu0 %5493  ;;  %5618 = vrot.lane.b32.xlu0 %v5607_v5, %s6601_s2  ;;  %5598 = vrot.lane.b32.xlu1 %v5587_v8, %s6601_s2 }
 0x3a3   : > { %v7772_v2 = vunpack.i.h.bf16 %v5494_v36  ;;  %v7774_v41 = vunpack.i.l.bf16 %v5494_v36 }
 0x3a5   : > { %10486 = vst [vmem:[#allocation193_spill] sm:$0xff] %v7772_v2  ;;  %10487 = vst [vmem:[#allocation194_spill] sm:$0xff] %v7774_v41  ;;  %v1721_v36 = vsel %vm247_vm1, %v7772_v2, 0.0  ;;  %v1714_v46 = vsel %vm247_vm1, 0.0, %v7774_v41 }
 0x3a6   : > { %5623 = vrot.lane.b32.xlu0 %v5607_v5, %s6602_s15  ;;  %5603 = vrot.lane.b32.xlu1 %v5587_v8, %s6602_s15  ;;  %v1715_v8 = vsel %vm247_vm1, 0.0, %v7772_v2 }
 0x3a7   : > { %v7833_v38 = vpack.i.bf16 %v1721_v36, %v1715_v8  ;;  %v1307_v36 = vsel %vm1304_vm10, 0.0, %v7761_v23 }
 0x3aa   : > { %v5499_v52 = vpop.permute.xlu1 %5498  ;;  %5628 = vrot.lane.b32.xlu0 %v5627_v55, %s6600_s14  ;;  %5678 = vrot.lane.b32.xlu1 %v5677_v27, %s6600_s14 }
 0x3ab   : > { %v7792_v62 = vunpack.i.h.bf16 %v5499_v52  ;;  %v7794_v40 = vunpack.i.l.bf16 %v5499_v52  ;;  %v1720_v52 = vsel %vm247_vm1, %v7774_v41, 0.0 }
 0x3ac   : > { %v7845_v6 = vpack.i.bf16 %v1720_v52, %v1714_v46 }
 0x3ad   : > { %10488 = vst [vmem:[#allocation195_spill] sm:$0xff] %v7792_v62  ;;  %10489 = vst [vmem:[#allocation196_spill] sm:$0xff] %v7794_v40  ;;  %v1717_v54 = vsel %vm247_vm1, 0.0, %v7792_v62  ;;  %v1723_v5 = vsel %vm247_vm1, %v7792_v62, 0.0  ;;  %v1716_v9 = vsel %vm247_vm1, 0.0, %v7794_v40  ;;  %v1722_v37 = vsel %vm247_vm1, %v7794_v40, 0.0 }
 0x3ae   : > { %5633 = vrot.lane.b32.xlu0 %v5627_v55, %s6599_s13  ;;  %5683 = vrot.lane.b32.xlu1 %v5677_v27, %s6599_s13  ;;  %v7827_v11 = vpack.i.bf16 %v1723_v5, %v1717_v54  ;;  %v7838_v35 = vpack.i.bf16 %v1722_v37, %v1716_v9  ;;  %10492 = vst [vmem:[#allocation199_spill] sm:$0xff] %v7845_v6  ;;  %v1308_v9 = vsel %vm1304_vm10, 0.0, %v7759_v33  ;;  %v1314_v37 = vsel %vm1304_vm10, %v7759_v33, 0.0 }
 0x3af   : > { %v5777_v52 = vpack.i.bf16 %v1314_v37, %v1308_v9  ;;  %v7898_v9 = vunpack.i.l.bf16 %v7785_v51 }
 0x3b2   : > { %5638 = vrot.lane.b32.xlu0 %v5627_v55, %s6601_s2  ;;  %5688 = vrot.lane.b32.xlu1 %v5677_v27, %s6601_s2 }
 0x3b3   : > { %v5504_v47 = vpop.permute.xlu0 %5503 }
 0x3b4   : > { %v7803_v7 = vunpack.i.h.bf16 %v5504_v47  ;;  %v7805_v48 = vunpack.i.l.bf16 %v5504_v47 }
 0x3b6   : > { %10490 = vst [vmem:[#allocation197_spill] sm:$0xff] %v7803_v7  ;;  %10491 = vst [vmem:[#allocation198_spill] sm:$0xff] %v7805_v48  ;;  %5643 = vrot.lane.b32.xlu0 %v5627_v55, %s6602_s15  ;;  %5693 = vrot.lane.b32.xlu1 %v5677_v27, %s6602_s15  ;;  %v1719_v47 = vsel %vm247_vm1, 0.0, %v7803_v7  ;;  %v1725_v3 = vsel %vm247_vm1, %v7803_v7, 0.0  ;;  %v1718_v54 = vsel %vm247_vm1, 0.0, %v7805_v48  ;;  %v1724_v5 = vsel %vm247_vm1, %v7805_v48, 0.0 }
 0x3b7   : > { %v7847_v1 = vpack.i.bf16 %v1725_v3, %v1719_v47  ;;  %v7851_v8 = vpack.i.bf16 %v1724_v5, %v1718_v54  ;;  %v1313_v3 = vsel %vm1304_vm10, %v7761_v23, 0.0  ;;  %vm4477_vm1 = vmneg %vm1097_vm11  ;;  %v10497_v48 = vpack.c.bf16 %v7697_v13, %v7699_v42 }
 0x3b8   : > { %v5727_v46 = vpack.i.bf16 %v1313_v3, %v1307_v36  ;;  %vm7965_vm11 = vmpackc.low %vm4477_vm1, %vm4477_vm1  ;;  %v10498_v13 = vpack.c.bf16 %v7713_v58, %v7715_v10 }
 0x3b9   : > { %vm4492_vm1 = vmneg %vm1304_vm10 }
 0x3ba   : > { %5648 = vrot.lane.b32.xlu0 %v5627_v55, %s6603_s16  ;;  %5698 = vrot.lane.b32.xlu1 %v5677_v27, %s6603_s16 }
 0x3be   : > { %5653 = vrot.lane.b32.xlu0 %v5627_v55, %s6604_s17  ;;  %5703 = vrot.lane.b32.xlu1 %v5677_v27, %s6604_s17 }
 0x3c2   : > { %5658 = vrot.lane.b32.xlu0 %v5627_v55, %s6605_s18  ;;  %5708 = vrot.lane.b32.xlu1 %v5677_v27, %s6605_s18 }
 0x3c6   : > { %5663 = vrot.lane.b32.xlu0 %v5627_v55, %s6606_s19  ;;  %5713 = vrot.lane.b32.xlu1 %v5677_v27, %s6606_s19 }
 0x3ca   : > { %5668 = vrot.lane.b32.xlu0 %v5627_v55, %s6607_s20  ;;  %5718 = vrot.lane.b32.xlu1 %v5677_v27, %s6607_s20 }
 0x3ce   : > { %5673 = vrot.lane.b32.xlu0 %v5627_v55, %s6608_s21  ;;  %5723 = vrot.lane.b32.xlu1 %v5677_v27, %s6608_s21 }
 0x3d2   : > { %5728 = vrot.lane.b32.xlu0 %v5727_v46, %s6600_s14  ;;  %5778 = vrot.lane.b32.xlu1 %v5777_v52, %s6600_s14 }
 0x3d6   : > { %5733 = vrot.lane.b32.xlu0 %v5727_v46, %s6599_s13  ;;  %5783 = vrot.lane.b32.xlu1 %v5777_v52, %s6599_s13 }
 0x3da   : > { %5738 = vrot.lane.b32.xlu0 %v5727_v46, %s6601_s2  ;;  %5788 = vrot.lane.b32.xlu1 %v5777_v52, %s6601_s2 }
 0x3de   : > { %5743 = vrot.lane.b32.xlu0 %v5727_v46, %s6602_s15  ;;  %5793 = vrot.lane.b32.xlu1 %v5777_v52, %s6602_s15 }
 0x3e2   : > { %5748 = vrot.lane.b32.xlu0 %v5727_v46, %s6603_s16  ;;  %5798 = vrot.lane.b32.xlu1 %v5777_v52, %s6603_s16 }
 0x3e6   : > { %5753 = vrot.lane.b32.xlu0 %v5727_v46, %s6604_s17  ;;  %5803 = vrot.lane.b32.xlu1 %v5777_v52, %s6604_s17 }
 0x3ea   : > { %5758 = vrot.lane.b32.xlu0 %v5727_v46, %s6605_s18  ;;  %5808 = vrot.lane.b32.xlu1 %v5777_v52, %s6605_s18 }
 0x3ec   : > { %v7881_v55 = vpop.permute.xlu0 %5528  ;;  %v7883_v27 = vpop.permute.xlu1 %5508 }
 0x3ed   : > { %v5530_v60 = vunpack.i.l.bf16 %v7881_v55  ;;  %v5511_v61 = vunpack.i.h.bf16 %v7883_v27 }
 0x3ee   : > { %5763 = vrot.lane.b32.xlu0 %v5727_v46, %s6606_s19  ;;  %5813 = vrot.lane.b32.xlu1 %v5777_v52, %s6606_s19 }
 0x3f0   : > { %v7887_v47 = vpop.permute.xlu0 %5533  ;;  %v7889_v54 = vpop.permute.xlu1 %5513 }
 0x3f2   : > { %5768 = vrot.lane.b32.xlu0 %v5727_v46, %s6607_s20  ;;  %5818 = vrot.lane.b32.xlu1 %v5777_v52, %s6607_s20 }
 0x3f4   : > { %v5539_v5 = vpop.permute.xlu0 %5538  ;;  %v5519_v36 = vpop.permute.xlu1 %5518 }
 0x3f5   : > { %v5541_v20 = vunpack.i.h.bf16 %v5539_v5  ;;  %v5540_v21 = vunpack.i.l.bf16 %v5539_v5  ;;  %v5521_v24 = vunpack.i.h.bf16 %v5519_v36  ;;  %v5520_v25 = vunpack.i.l.bf16 %v5519_v36 }
 0x3f6   : > { %5773 = vrot.lane.b32.xlu0 %v5727_v46, %s6608_s21  ;;  %5823 = vrot.lane.b32.xlu1 %v5777_v52, %s6608_s21  ;;  %v1309_v46 = vsel %vm1304_vm10, 0.0, %v7898_v9  ;;  %v1315_v52 = vsel %vm1304_vm10, %v7898_v9, 0.0 }
 0x3f7   : > { %v7920_v12 = vpack.i.bf16 %v1315_v52, %v1309_v46  ;;  %v1219_v39 = vsel %vm310_vm4, %v5540_v21, %v5541_v20  ;;  %v1218_v51 = vsel %vm310_vm4, %v5520_v25, %v5521_v24 }
 0x3f8   : > { %v7895_v3 = vpop.permute.xlu0 %5543  ;;  %v7900_v37 = vpop.permute.xlu1 %5523 }
 0x3f9   : > { %v5546_v31 = vunpack.i.h.bf16 %v7895_v3  ;;  %v5525_v25 = vunpack.i.l.bf16 %v7900_v37 }
 0x3fa   : > { %5863 = vrot.lane.b32.xlu0 %v7845_v6, %s6606_s19  ;;  %5828 = vrot.lane.b32.xlu1 %v7845_v6, %s6600_s14 }
 0x3fc   : > { %v7906_v43 = vpop.permute.xlu0 %5568  ;;  %v7912_v0 = vpop.permute.xlu1 %5548 }
 0x3fd   : > { %v5550_v58 = vunpack.i.l.bf16 %v7912_v0 }
 0x3fe   : > { %5868 = vrot.lane.b32.xlu0 %v7845_v6, %s6607_s20  ;;  %5833 = vrot.lane.b32.xlu1 %v7845_v6, %s6599_s13 }
 0x400   : > { %v7918_v49 = vpop.permute.xlu0 %5573  ;;  %v7922_v14 = vpop.permute.xlu1 %5553 }
 0x402   : > { %5893 = vrot.lane.b32.xlu0 %v7920_v12, %s6600_s14  ;;  %5838 = vrot.lane.b32.xlu1 %v7845_v6, %s6601_s2 }
 0x404   : > { %v5579_v16 = vpop.permute.xlu0 %5578  ;;  %v5559_v18 = vpop.permute.xlu1 %5558 }
 0x405   : > { %v5581_v44 = vunpack.i.h.bf16 %v5579_v16  ;;  %v5580_v50 = vunpack.i.l.bf16 %v5579_v16  ;;  %v5561_v56 = vunpack.i.h.bf16 %v5559_v18  ;;  %v5560_v57 = vunpack.i.l.bf16 %v5559_v18 }
 0x406   : > { %5903 = vrot.lane.b32.xlu0 %v7920_v12, %s6599_s13  ;;  %5843 = vrot.lane.b32.xlu1 %v7845_v6, %s6602_s15  ;;  %v5510_v18 = vunpack.i.l.bf16 %v7883_v27 }
 0x407   : > { %v1221_v27 = vsel %vm310_vm4, %v5580_v50, %v5581_v44  ;;  %v1316_v50 = vsel %vm1304_vm10, %v7949_v26, 0.0 }
 0x408   : > { %v7932_v19 = vpop.permute.xlu0 %5583  ;;  %v7934_v46 = vpop.permute.xlu1 %5563 }
 0x40a   : > { %5913 = vrot.lane.b32.xlu0 %v7920_v12, %s6601_s2  ;;  %5848 = vrot.lane.b32.xlu1 %v7845_v6, %s6603_s16 }
 0x40c   : > { %v7940_v52 = vpop.permute.xlu0 %5608  ;;  %v7942_v22 = vpop.permute.xlu1 %5588 }
 0x40d   : > { %v5611_v16 = vunpack.i.h.bf16 %v7940_v52 }
 0x40e   : > { %5923 = vrot.lane.b32.xlu0 %v7920_v12, %s6602_s15  ;;  %5853 = vrot.lane.b32.xlu1 %v7845_v6, %s6604_s17 }
 0x410   : > { %v5614_v28 = vpop.permute.xlu0 %5613  ;;  %v5594_v5 = vpop.permute.xlu1 %5593 }
 0x411   : > { %v5616_v32 = vunpack.i.h.bf16 %v5614_v28  ;;  %v5615_v34 = vunpack.i.l.bf16 %v5614_v28  ;;  %v5596_v36 = vunpack.i.h.bf16 %v5594_v5  ;;  %v5595_v45 = vunpack.i.l.bf16 %v5594_v5 }
 0x412   : > { %5933 = vrot.lane.b32.xlu0 %v7920_v12, %s6603_s16  ;;  %5858 = vrot.lane.b32.xlu1 %v7845_v6, %s6605_s18  ;;  %v5531_v5 = vunpack.i.h.bf16 %v7881_v55  ;;  %v1220_v55 = vsel %vm310_vm4, %v5560_v57, %v5561_v56  ;;  %v1310_v57 = vsel %vm1304_vm10, 0.0, %v7949_v26  ;;  %v1146_v56 = vsel %vm272_vm2, %v5510_v18, %v5511_v61  ;;  %vm8070_vm10 = vmpackc.low %vm4492_vm1, %vm4492_vm1 }
 0x413   : > { %v1187_v28 = vsel %vm291_vm3, %v5615_v34, %v5616_v32  ;;  %v1186_v21 = vsel %vm291_vm3, %v5595_v45, %v5596_v36  ;;  %v5545_v32 = vunpack.i.l.bf16 %v7895_v3  ;;  %v2467_v34 = vpack.c.bf16 %v1219_v39, %v1218_v51 }
 0x414   : > { %v5619_v20 = vpop.permute.xlu0 %5618  ;;  %v5599_v63 = vpop.permute.xlu1 %5598  ;;  %v2466_v24 = vpack.c.bf16 %v1187_v28, %v1186_v21  ;;  %v5526_v45 = vunpack.i.h.bf16 %v7900_v37  ;;  %v2468_v44 = vpack.c.bf16 %v1221_v27, %v1220_v55  ;;  %v5586_v18 = vunpack.i.h.bf16 %v7932_v19 }
 0x415   : > { %v5621_v36 = vunpack.i.h.bf16 %v5619_v20  ;;  %v5620_v28 = vunpack.i.l.bf16 %v5619_v20  ;;  %v5601_v21 = vunpack.i.h.bf16 %v5599_v63  ;;  %v5600_v3 = vunpack.i.l.bf16 %v5599_v63 }
 0x416   : > { %5943 = vrot.lane.b32.xlu0 %v7920_v12, %s6604_s17  ;;  %5873 = vrot.lane.b32.xlu1 %v7845_v6, %s6608_s21  ;;  %v1147_v63 = vsel %vm272_vm2, %v5530_v60, %v5531_v5  ;;  %v1254_v60 = vsel %vm329_vm6, %v5525_v25, %v5526_v45  ;;  %v1255_v61 = vsel %vm329_vm6, %v5545_v32, %v5546_v31  ;;  %v5571_v20 = vunpack.i.h.bf16 %v7906_v43 }
 0x417   : > { %4688 = vmatprep.subr.bf16.mxu0 %v2466_v24  ;;  %v1223_v51 = vsel %vm310_vm4, %v5620_v28, %v5621_v36  ;;  %v5570_v5 = vunpack.i.l.bf16 %v7906_v43  ;;  %v5551_v24 = vunpack.i.h.bf16 %v7912_v0  ;;  %v5566_v55 = vunpack.i.h.bf16 %v7934_v46 }
 0x418   : > { %4689 = vmatpush3.bf16.msk.msra.mxu0 %vm7965_vm11, %v10497_v48  ;;  %v7985_v39 = vpop.permute.xlu0 %5623  ;;  %v7987_v37 = vpop.permute.xlu1 %5603  ;;  %v1222_v48 = vsel %vm310_vm4, %v5600_v3, %v5601_v21  ;;  %v5565_v45 = vunpack.i.l.bf16 %v7934_v46  ;;  %v10499_v0 = vpack.c.bf16 %v7732_v53, %v7734_v59  ;;  %v2461_v46 = vpack.c.bf16 %v1147_v63, %v1146_v56 }
 0x419   : > { %4690 = vmatprep.subr.bf16.mxu0 %v2467_v34  ;;  %v5585_v34 = vunpack.i.l.bf16 %v7932_v19  ;;  %v2469_v43 = vpack.c.bf16 %v1223_v51, %v1222_v48  ;;  %v5536_v19 = vunpack.i.h.bf16 %v7887_v47  ;;  %v2470_v25 = vpack.c.bf16 %v1255_v61, %v1254_v60 }
 0x41a   : > { %5953 = vrot.lane.b32.xlu0 %v7920_v12, %s6605_s18  ;;  %5878 = vrot.lane.b32.xlu1 %v7845_v6, %s6614_s26  ;;  %v8034_v27 = vpack.i.bf16 %v1316_v50, %v1310_v57  ;;  %v1149_v36 = vsel %vm272_vm2, %v5570_v5, %v5571_v20  ;;  %v1148_v28 = vsel %vm272_vm2, %v5550_v58, %v5551_v24  ;;  %v5610_v21 = vunpack.i.l.bf16 %v7940_v52 }
 0x41b   : > { %v1256_v53 = vsel %vm329_vm6, %v5565_v45, %v5566_v55  ;;  %v1257_v59 = vsel %vm329_vm6, %v5585_v34, %v5586_v18  ;;  %v5591_v3 = vunpack.i.h.bf16 %v7942_v22  ;;  %v5590_v57 = vunpack.i.l.bf16 %v7942_v22 }
 0x41c   : > { %4691 = vmatpush3.bf16.msk.msra.mxu0 %vm7965_vm11, %v10498_v13  ;;  %v8004_v42 = vpop.permute.xlu0 %5628  ;;  %v8014_v10 = vpop.permute.xlu1 %5678  ;;  %v5626_v50 = vunpack.i.h.bf16 %v7985_v39  ;;  %v5625_v63 = vunpack.i.l.bf16 %v7985_v39  ;;  %v5606_v56 = vunpack.i.h.bf16 %v7987_v37  ;;  %v5535_v48 = vunpack.i.l.bf16 %v7887_v47 }
 0x41d   : > { %4692 = vmatprep.subr.bf16.mxu0 %v2468_v44  ;;  %v5605_v44 = vunpack.i.l.bf16 %v7987_v37  ;;  %v5516_v52 = vunpack.i.h.bf16 %v7889_v54  ;;  %v5515_v61 = vunpack.i.l.bf16 %v7889_v54  ;;  %v2462_v39 = vpack.c.bf16 %v1149_v36, %v1148_v28 }
 0x41e   : > { %5963 = vrot.lane.b32.xlu0 %v7920_v12, %s6606_s19  ;;  %5883 = vrot.lane.b32.xlu1 %v7845_v6, %s6609_s1  ;;  %v1151_v37 = vsel %vm272_vm2, %v5610_v21, %v5611_v16  ;;  %v1150_v47 = vsel %vm272_vm2, %v5590_v57, %v5591_v3  ;;  %v2471_v24 = vpack.c.bf16 %v1257_v59, %v1256_v53  ;;  %v5575_v28 = vunpack.i.l.bf16 %v7918_v49 }
 0x41f   : > { %v1259_v34 = vsel %vm329_vm6, %v5625_v63, %v5626_v50  ;;  %v2463_v36 = vpack.c.bf16 %v1151_v37, %v1150_v47  ;;  %v5556_v53 = vunpack.i.h.bf16 %v7922_v14  ;;  %v5555_v59 = vunpack.i.l.bf16 %v7922_v14 }
 0x420   : > { %4693 = vmatpush3.bf16.msk.msra.mxu0 %vm7965_vm11, %v10499_v0  ;;  %v8029_v31 = vpop.permute.xlu0 %5633  ;;  %v8032_v32 = vpop.permute.xlu1 %5683  ;;  %v1183_v0 = vsel %vm291_vm3, %v5535_v48, %v5536_v19  ;;  %v10502_v19 = vpack.c.bf16 %v7759_v33, %v7761_v23  ;;  %v10503_v50 = vpack.c.bf16 %v7745_v17, %v7747_v4  ;;  %v10505_v48 = vld [vmem:[#allocation53_spill] sm:$0xff] }
 0x421   : > { %4694 = vmatprep.subr.bf16.mxu0 %v2469_v43  ;;  %v1184_v57 = vsel %vm291_vm3, %v5555_v59, %v5556_v53  ;;  %v10514_v53 = vld [vmem:[#allocation95_spill] sm:$0xff] }
 0x422   : > { %5973 = vrot.lane.b32.xlu0 %v7920_v12, %s6607_s20  ;;  %5888 = vrot.lane.b32.xlu1 %v7845_v6, %s6612_s24 }
 0x424   : > { %4695 = vmatpush3.bf16.msra.mxu0 %v2461_v46  ;;  %v5639_v13 = vpop.permute.xlu0 %5638  ;;  %v5689_v22 = vpop.permute.xlu1 %5688  ;;  %v1182_v46 = vsel %vm291_vm3, %v5515_v61, %v5516_v52  ;;  %v10508_v61 = vld [vmem:[#allocation74_spill] sm:$0xff] }
 0x425   : > { %v5641_v51 = vunpack.i.h.bf16 %v5639_v13  ;;  %v5640_v60 = vunpack.i.l.bf16 %v5639_v13  ;;  %4696 = vmatprep.subr.bf16.mxu0 %v2470_v25  ;;  %v5691_v20 = vunpack.i.h.bf16 %v5689_v22  ;;  %v5690_v5 = vunpack.i.l.bf16 %v5689_v22  ;;  %v10504_v13 = vld [vmem:[#allocation60_spill] sm:$0xff] }
 0x426   : > { %5983 = vrot.lane.b32.xlu0 %v7920_v12, %s6608_s21  ;;  %5898 = vrot.lane.b32.xlu1 %v8034_v27, %s6600_s14  ;;  %v1258_v12 = vsel %vm329_vm6, %v5605_v44, %v5606_v56  ;;  %v5576_v25 = vunpack.i.h.bf16 %v7918_v49  ;;  %v2464_v14 = vpack.c.bf16 %v1183_v0, %v1182_v46  ;;  %v4351_v56 = vcombine.low %v10494_v30, %v10493_v29  ;;  %v10533_v30 = vld [vmem:[#allocation48_spill] sm:$0xff] }
 0x427   : > { %v1425_v58 = vsel %vm310_vm4, %v5640_v60, %v5641_v51  ;;  %v1426_v18 = vsel %vm310_vm4, %v5690_v5, %v5691_v20  ;;  %v2472_v16 = vpack.c.bf16 %v1259_v34, %v1258_v12  ;;  %v4366_v52 = vcombine.high %v10505_v48, %v10504_v13  ;;  %v10509_v20 = vld [vmem:[#allocation67_spill] sm:$0xff]  ;;  %v10512_v12 = vld [vmem:[#allocation81_spill] sm:$0xff] }
 0x428   : > { %4697 = vmatpush3.bf16.msra.mxu0 %v2462_v39  ;;  %v8063_v54 = vpop.permute.xlu0 %5643  ;;  %v8068_v55 = vpop.permute.xlu1 %5693  ;;  %v2482_v45 = vpack.c.bf16 %v1426_v18, %v1425_v58  ;;  %v1185_v49 = vsel %vm291_vm3, %v5575_v28, %v5576_v25  ;;  %v4365_v60 = vcombine.low %v10505_v48, %v10504_v13  ;;  %v4380_v5 = vcombine.high %v10509_v20, %v10508_v61  ;;  %v10511_v18 = vld [vmem:[#allocation88_spill] sm:$0xff]  ;;  %v10513_v28 = vld [vmem:[#allocation102_spill] sm:$0xff] }
 0x429   : > { %4698 = vmatprep.subr.bf16.mxu0 %v2471_v24  ;;  %v2465_v63 = vpack.c.bf16 %v1185_v49, %v1184_v57  ;;  %v4379_v24 = vcombine.low %v10509_v20, %v10508_v61  ;;  %v4394_v34 = vcombine.high %v10512_v12, %v10511_v18  ;;  %v4393_v25 = vcombine.low %v10512_v12, %v10511_v18 }
 0x42a   : > { %5993 = vrot.lane.b32.xlu0 %v7833_v38, %s6600_s14  ;;  %5908 = vrot.lane.b32.xlu1 %v8034_v27, %s6599_s13  ;;  %v4408_v59 = vcombine.high %v10514_v53, %v10513_v28 }
 0x42b   : > { %4758 = vmatprep.subr.bf16.mxu1 %v2482_v45 }
 0x42c   : > { %4699 = vmatpush3.bf16.msra.mxu0 %v2463_v36  ;;  %4759 = vmatpush3.bf16.msk.msra.mxu1 %vm8070_vm10, %v10502_v19  ;;  %v8089_v21 = vpop.permute.xlu0 %5648  ;;  %v8091_v3 = vpop.permute.xlu1 %5698 }
 0x42d   : > { %4700 = vmatprep.subr.bf16.mxu0 %v2472_v16 }
 0x42e   : > { %5998 = vrot.lane.b32.xlu0 %v7833_v38, %s6599_s13  ;;  %5918 = vrot.lane.b32.xlu1 %v8034_v27, %s6601_s2 }
 0x430   : > { %4701 = vmatpush3.bf16.msra.mxu0 %v2464_v14  ;;  %v8099_v33 = vpop.permute.xlu0 %5653  ;;  %v8101_v23 = vpop.permute.xlu1 %5703 }
 0x431   : > { %4702 = vmatprep.subr.msk.bf16.mxu0 %vm8070_vm10, %v10503_v50 }
 0x432   : > { %6003 = vrot.lane.b32.xlu0 %v7833_v38, %s6601_s2  ;;  %5928 = vrot.lane.b32.xlu1 %v8034_v27, %s6602_s15 }
 0x434   : > { %4703 = vmatpush3.bf16.msra.mxu0 %v2465_v63  ;;  %v8114_v44 = vpop.permute.xlu0 %5658  ;;  %v8118_v17 = vpop.permute.xlu1 %5708 }
 0x436   : > { %6008 = vrot.lane.b32.xlu0 %v7833_v38, %s6602_s15  ;;  %5938 = vrot.lane.b32.xlu1 %v8034_v27, %s6603_s16 }
 0x437   : > { %3229 = vmatmul.mubr.bf16.vlgmr.msra.gmra.mrb[16].mxu0 %v4351_v56 }
 0x438   : > { %v8124_v4 = vpop.permute.xlu0 %5663  ;;  %3236 = vmatprep.mubr.bf16.mxu0 %v4366_v52  ;;  %v8126_v51 = vpop.permute.xlu1 %5713 }
 0x439   : > { %10506 = vst [vmem:[#allocation200_spill] sm:$0xff] %v8124_v4  ;;  %10507 = vst [vmem:[#allocation201_spill] sm:$0xff] %v8126_v51  ;;  %v5701_v51 = vunpack.i.h.bf16 %v8091_v3  ;;  %v5656_v4 = vunpack.i.h.bf16 %v8099_v33 }
 0x43a   : > { %6013 = vrot.lane.b32.xlu0 %v7833_v38, %s6603_s16  ;;  %5948 = vrot.lane.b32.xlu1 %v8034_v27, %s6604_s17 }
 0x43c   : > { %v8134_v22 = vpop.permute.xlu0 %5668  ;;  %v8138_v39 = vpop.permute.xlu1 %5718 }
 0x43e   : > { %6018 = vrot.lane.b32.xlu0 %v7833_v38, %s6604_s17  ;;  %5958 = vrot.lane.b32.xlu1 %v8034_v27, %s6605_s18 }
 0x43f   : > { %3237 = vmatmul.mubr.bf16.gmra.mrb[20].mxu0 %v4365_v60  ;;  %v4505_v60 = vpack.c.bf16 %v7949_v26, %v7898_v9  ;;  %v10517_v26 = vld [vmem:[#allocation47_spill] sm:$0xff]  ;;  %v10518_v9 = vld [vmem:[#allocation40_spill] sm:$0xff] }
 0x440   : > { %v8144_v37 = vpop.permute.xlu0 %5673  ;;  %3244 = vmatprep.mubr.bf16.mxu0 %v4380_v5  ;;  %v8146_v47 = vpop.permute.xlu1 %5723  ;;  %v4407_v5 = vcombine.low %v10514_v53, %v10513_v28  ;;  %v10523_v28 = vld [vmem:[#allocation144_spill] sm:$0xff] }
 0x441   : > { %10510 = vst [vmem:[#allocation202_spill] sm:$0xff] %v8146_v47 }
 0x442   : > { %6033 = vrot.lane.b32.xlu0 %v7833_v38, %s6605_s18  ;;  %5968 = vrot.lane.b32.xlu1 %v8034_v27, %s6606_s19 }
 0x444   : > { %v8154_v58 = vpop.permute.xlu0 %5728  ;;  %v8158_v45 = vpop.permute.xlu1 %5778 }
 0x446   : > { %6038 = vrot.lane.b32.xlu0 %v7833_v38, %s6608_s21  ;;  %5978 = vrot.lane.b32.xlu1 %v8034_v27, %s6607_s20 }
 0x447   : > { %3245 = vmatmul.mubr.bf16.gmra.mrb[24].mxu0 %v4379_v24 }
 0x448   : > { %v8164_v0 = vpop.permute.xlu0 %5733  ;;  %3252 = vmatprep.mubr.bf16.mxu0 %v4394_v34  ;;  %v8166_v46 = vpop.permute.xlu1 %5783  ;;  %v10515_v34 = vld [vmem:[#allocation116_spill] sm:$0xff] }
 0x44a   : > { %6043 = vrot.lane.b32.xlu0 %v7833_v38, %s6614_s26  ;;  %5988 = vrot.lane.b32.xlu1 %v8034_v27, %s6608_s21 }
 0x44c   : > { %v5739_v36 = vpop.permute.xlu0 %5738  ;;  %v5789_v14 = vpop.permute.xlu1 %5788 }
 0x44d   : > { %v5741_v16 = vunpack.i.h.bf16 %v5739_v36  ;;  %v5740_v19 = vunpack.i.l.bf16 %v5739_v36  ;;  %v5791_v49 = vunpack.i.h.bf16 %v5789_v14  ;;  %v5790_v57 = vunpack.i.l.bf16 %v5789_v14 }
 0x44e   : > { %6048 = vrot.lane.b32.xlu0 %v7833_v38, %s6609_s1  ;;  %6023 = vrot.lane.b32.xlu1 %v7833_v38, %s6606_s19 }
 0x44f   : > { %v1427_v27 = vsel %vm310_vm4, %v5740_v19, %v5741_v16  ;;  %3253 = vmatmul.mubr.bf16.gmra.mrb[28].mxu0 %v4393_v25  ;;  %v1428_v63 = vsel %vm310_vm4, %v5790_v57, %v5791_v49  ;;  %v10516_v25 = vld [vmem:[#allocation109_spill] sm:$0xff]  ;;  %v4354_v16 = vcombine.high %v10518_v9, %v10517_v26  ;;  %v10520_v57 = vld [vmem:[#allocation130_spill] sm:$0xff] }
 0x450   : > { %v8181_v50 = vpop.permute.xlu0 %5743  ;;  %3260 = vmatprep.mubr.bf16.mxu0 %v4408_v59  ;;  %v8184_v56 = vpop.permute.xlu1 %5793  ;;  %v2483_v52 = vpack.c.bf16 %v1428_v63, %v1427_v27  ;;  %v4422_v36 = vcombine.high %v10516_v25, %v10515_v34  ;;  %v4421_v14 = vcombine.low %v10516_v25, %v10515_v34  ;;  %v10521_v27 = vld [vmem:[#allocation123_spill] sm:$0xff]  ;;  %v10534_v34 = vld [vmem:[#allocation41_spill] sm:$0xff] }
 0x451   : > { %3332 = vmatprep.mubr.bf16.mxu1 %v4354_v16  ;;  %v4436_v63 = vcombine.high %v10521_v27, %v10520_v57  ;;  %v4356_v48 = vcombine.high %v10534_v34, %v10533_v30  ;;  %v5685_v34 = vunpack.i.l.bf16 %v8032_v32 }
 0x452   : > { %6053 = vrot.lane.b32.xlu0 %v7833_v38, %s6612_s24  ;;  %6028 = vrot.lane.b32.xlu1 %v7833_v38, %s6607_s20 }
 0x453   : > { %4760 = vmatprep.subr.bf16.mxu1 %v2483_v52 }
 0x454   : > { %4761 = vmatpush3.bf16.msk.msra.mxu1 %vm8070_vm10, %v4505_v60  ;;  %v8196_v24 = vpop.permute.xlu0 %5748  ;;  %v8200_v59 = vpop.permute.xlu1 %5798 }
 0x456   : > { %6088 = vrot.lane.b32.xlu0 %v7838_v35, %s6606_s19  ;;  %6058 = vrot.lane.b32.xlu1 %v7838_v35, %s6600_s14 }
 0x457   : > { %3261 = vmatmul.mubr.bf16.gmra.mrb[32].mxu0 %v4407_v5 }
 0x458   : > { %v8208_v19 = vpop.permute.xlu0 %5753  ;;  %3268 = vmatprep.mubr.bf16.mxu0 %v4422_v36  ;;  %v8210_v43 = vpop.permute.xlu1 %5803 }
 0x45a   : > { %6093 = vrot.lane.b32.xlu0 %v7838_v35, %s6607_s20  ;;  %6063 = vrot.lane.b32.xlu1 %v7838_v35, %s6599_s13 }
 0x45c   : > { %v8218_v49 = vpop.permute.xlu0 %5758  ;;  %v8222_v52 = vpop.permute.xlu1 %5808 }
 0x45d   : > { %10519 = vst [vmem:[#allocation203_spill] sm:$0xff] %v8218_v49  ;;  %10522 = vst [vmem:[#allocation204_spill] sm:$0xff] %v8222_v52  ;;  %v5745_v49 = vunpack.i.l.bf16 %v8181_v50 }
 0x45e   : > { %6118 = vrot.lane.b32.xlu0 %v7827_v11, %s6600_s14  ;;  %6068 = vrot.lane.b32.xlu1 %v7838_v35, %s6601_s2 }
 0x45f   : > { %3269 = vmatmul.mubr.bf16.gmra.mrb[36].mxu0 %v4421_v14  ;;  %v4435_v14 = vcombine.low %v10521_v27, %v10520_v57 }
 0x460   : > { %v5764_v60 = vpop.permute.xlu0 %5763  ;;  %3276 = vmatprep.mubr.bf16.mxu0 %v4436_v63  ;;  %v5814_v16 = vpop.permute.xlu1 %5813 }
 0x461   : > { %v5766_v5 = vunpack.i.h.bf16 %v5764_v60  ;;  %v5765_v36 = vunpack.i.l.bf16 %v5764_v60  ;;  %v5816_v12 = vunpack.i.h.bf16 %v5814_v16  ;;  %v5815_v13 = vunpack.i.l.bf16 %v5814_v16  ;;  %v10524_v16 = vld [vmem:[#allocation137_spill] sm:$0xff] }
 0x462   : > { %6123 = vrot.lane.b32.xlu0 %v7827_v11, %s6599_s13  ;;  %6073 = vrot.lane.b32.xlu1 %v7838_v35, %s6602_s15  ;;  %v4450_v29 = vcombine.high %v10524_v16, %v10523_v28 }
 0x463   : > { %v1607_v18 = vsel %vm405_vm13, %v5765_v36, %v5766_v5  ;;  %v1608_v25 = vsel %vm405_vm13, %v5815_v13, %v5816_v12  ;;  %v4449_v12 = vcombine.low %v10524_v16, %v10523_v28  ;;  %v10529_v36 = vld [vmem:[#allocation151_spill] sm:$0xff] }
 0x464   : > { %v8233_v20 = vpop.permute.xlu0 %5768  ;;  %v8238_v63 = vpop.permute.xlu1 %5818  ;;  %v2498_v60 = vpack.c.bf16 %v1608_v25, %v1607_v18  ;;  %v4463_v27 = vcombine.low %v10529_v36, %v10529_v36 }
 0x466   : > { %6128 = vrot.lane.b32.xlu0 %v7827_v11, %s6601_s2  ;;  %6078 = vrot.lane.b32.xlu1 %v7838_v35, %s6603_s16 }
 0x467   : > { %4828 = vmatprep.subr.bf16.mxu0 %v2498_v60  ;;  %3277 = vmatmul.mubr.bf16.gmra.mrb[40].mxu0 %v4435_v14  ;;  %v4464_v60 = vcombine.high %v10529_v36, %v10529_v36 }
 0x468   : > { %v8246_v5 = vpop.permute.xlu0 %5773  ;;  %v8248_v13 = vpop.permute.xlu1 %5823  ;;  %3284 = vmatprep.mubr.bf16.mxu0 %v4450_v29 }
 0x469   : > { %10525 = vst [vmem:[#allocation205_spill] sm:$0xff] %v8246_v5  ;;  %10526 = vst [vmem:[#allocation206_spill] sm:$0xff] %v8248_v13 }
 0x46a   : > { %6133 = vrot.lane.b32.xlu0 %v7827_v11, %s6602_s15  ;;  %6083 = vrot.lane.b32.xlu1 %v7838_v35, %s6604_s17 }
 0x46c   : > { %v8254_v18 = vpop.permute.xlu0 %5863  ;;  %v8258_v25 = vpop.permute.xlu1 %5828 }
 0x46d   : > { %10527 = vst [vmem:[#allocation207_spill] sm:$0xff] %v8254_v18  ;;  %10528 = vst [vmem:[#allocation208_spill] sm:$0xff] %v8258_v25  ;;  %v5830_v18 = vunpack.i.l.bf16 %v8258_v25 }
 0x46e   : > { %6138 = vrot.lane.b32.xlu0 %v7827_v11, %s6603_s16  ;;  %6098 = vrot.lane.b32.xlu1 %v7838_v35, %s6605_s18 }
 0x46f   : > { %3285 = vmatmul.mubr.bf16.gmra.mrb[44].mxu0 %v4449_v12 }
 0x470   : > { %v8266_v29 = vpop.permute.xlu0 %5868  ;;  %v8268_v14 = vpop.permute.xlu1 %5833  ;;  %3292 = vmatprep.mubr.bf16.mxu0 %v4464_v60 }
 0x471   : > { %10530 = vst [vmem:[#allocation209_spill] sm:$0xff] %v8266_v29  ;;  %10531 = vst [vmem:[#allocation210_spill] sm:$0xff] %v8268_v14  ;;  %v5835_v6 = vunpack.i.l.bf16 %v8268_v14 }
 0x472   : > { %6143 = vrot.lane.b32.xlu0 %v7827_v11, %s6604_s17  ;;  %6103 = vrot.lane.b32.xlu1 %v7838_v35, %s6608_s21 }
 0x474   : > { %v8274_v16 = vpop.permute.xlu0 %5893  ;;  %v8278_v28 = vpop.permute.xlu1 %5838 }
 0x475   : > { %10532 = vst [vmem:[#allocation211_spill] sm:$0xff] %v8278_v28  ;;  %v5686_v28 = vunpack.i.h.bf16 %v8032_v32  ;;  %v5650_v32 = vunpack.i.l.bf16 %v8089_v21 }
 0x476   : > { %6158 = vrot.lane.b32.xlu0 %v7827_v11, %s6605_s18  ;;  %6108 = vrot.lane.b32.xlu1 %v7838_v35, %s6614_s26 }
 0x477   : > { %3293 = vmatmul.mubr.bf16.gmra.mrb[48].mxu0 %v4463_v27 }
 0x478   : > { %v8286_v12 = vpop.permute.xlu0 %5903  ;;  %v8288_v60 = vpop.permute.xlu1 %5843  ;;  %3436 = vmatprep.mubr.bf16.mxu0 %v4356_v48 }
 0x479   : > { %10535 = vst [vmem:[#allocation212_spill] sm:$0xff] %v8288_v60 }
 0x47a   : > { %6163 = vrot.lane.b32.xlu0 %v7827_v11, %s6608_s21  ;;  %6113 = vrot.lane.b32.xlu1 %v7838_v35, %s6611_s23 }
 0x47c   : > { %v8294_v36 = vpop.permute.xlu0 %5913  ;;  %v8296_v53 = vpop.permute.xlu1 %5848 }
 0x47d   : > { %10536 = vst [vmem:[#allocation213_spill] sm:$0xff] %v8296_v53  ;;  %v5680_v53 = vunpack.i.l.bf16 %v8014_v10  ;;  %v5916_v5 = vunpack.i.h.bf16 %v8294_v36 }
 0x47e   : > { %6168 = vrot.lane.b32.xlu0 %v7827_v11, %s6614_s26  ;;  %6148 = vrot.lane.b32.xlu1 %v7827_v11, %s6606_s19 }
 0x480   : > { %v8302_v27 = vpop.permute.xlu0 %5923  ;;  %v8304_v57 = vpop.permute.xlu1 %5853 }
 0x481   : > { %10537 = vst [vmem:[#allocation214_spill] sm:$0xff] %v8304_v57  ;;  %v5681_v57 = vunpack.i.h.bf16 %v8014_v10  ;;  %v5635_v10 = vunpack.i.l.bf16 %v8029_v31 }
 0x482   : > { %6173 = vrot.lane.b32.xlu0 %v7827_v11, %s6611_s23  ;;  %6153 = vrot.lane.b32.xlu1 %v7827_v11, %s6607_s20 }
 0x483   : > { %v8354_v60 = vsel %vm272_vm2, %v5680_v53, %v5681_v57  ;;  %v5696_v53 = vunpack.i.h.bf16 %v8068_v55  ;;  %v5695_v57 = vunpack.i.l.bf16 %v8068_v55  ;;  %v8384_v55 = vsel %vm291_vm3, %v5685_v34, %v5686_v28 }
 0x484   : > { %v8310_v48 = vpop.permute.xlu0 %5933  ;;  %v8312_v61 = vpop.permute.xlu1 %5858  ;;  %v5700_v34 = vunpack.i.l.bf16 %v8091_v3 }
 0x485   : > { %10538 = vst [vmem:[#allocation215_spill] sm:$0xff] %v8312_v61  ;;  %v5630_v61 = vunpack.i.l.bf16 %v8004_v42 }
 0x486   : > { %6208 = vrot.lane.b32.xlu0 %v7851_v8, %s6606_s19  ;;  %6178 = vrot.lane.b32.xlu1 %v7851_v8, %s6600_s14 }
 0x488   : > { %v8318_v7 = vpop.permute.xlu0 %5943  ;;  %v8320_v40 = vpop.permute.xlu1 %5873 }
 0x489   : > { %10539 = vst [vmem:[#allocation216_spill] sm:$0xff] %v8318_v7  ;;  %10540 = vst [vmem:[#allocation217_spill] sm:$0xff] %v8320_v40  ;;  %v5631_v40 = vunpack.i.h.bf16 %v8004_v42  ;;  %v5636_v42 = vunpack.i.h.bf16 %v8029_v31 }
 0x48a   : > { %6213 = vrot.lane.b32.xlu0 %v7851_v8, %s6607_s20  ;;  %6183 = vrot.lane.b32.xlu1 %v7851_v8, %s6599_s13 }
 0x48b   : > { %v8375_v31 = vsel %vm291_vm3, %v5635_v10, %v5636_v42  ;;  %v8393_v10 = vsel %vm329_vm6, %v5695_v57, %v5696_v53  ;;  %v5781_v57 = vunpack.i.h.bf16 %v8158_v45 }
 0x48c   : > { %v8326_v62 = vpop.permute.xlu0 %5953  ;;  %v8328_v15 = vpop.permute.xlu1 %5878 }
 0x48d   : > { %10541 = vst [vmem:[#allocation218_spill] sm:$0xff] %v8326_v62  ;;  %10542 = vst [vmem:[#allocation219_spill] sm:$0xff] %v8328_v15 }
 0x48e   : > { %6238 = vrot.lane.b32.xlu0 %v7847_v1, %s6600_s14  ;;  %6188 = vrot.lane.b32.xlu1 %v7851_v8, %s6601_s2 }
 0x490   : > { %v8334_v41 = vpop.permute.xlu0 %5963  ;;  %v8336_v2 = vpop.permute.xlu1 %5883 }
 0x491   : > { %10543 = vst [vmem:[#allocation220_spill] sm:$0xff] %v8336_v2  ;;  %v8351_v2 = vsel %vm272_vm2, %v5630_v61, %v5631_v40  ;;  %v5646_v40 = vunpack.i.h.bf16 %v8063_v54  ;;  %v5645_v61 = vunpack.i.l.bf16 %v8063_v54 }
 0x492   : > { %6243 = vrot.lane.b32.xlu0 %v7847_v1, %s6599_s13  ;;  %6193 = vrot.lane.b32.xlu1 %v7851_v8, %s6602_s15 }
 0x493   : > { %v8390_v42 = vsel %vm329_vm6, %v5645_v61, %v5646_v40  ;;  %v5655_v40 = vunpack.i.l.bf16 %v8099_v33  ;;  %v5731_v61 = vunpack.i.h.bf16 %v8154_v58  ;;  %v5730_v33 = vunpack.i.l.bf16 %v8154_v58 }
 0x494   : > { %v8346_v15 = vpop.permute.xlu0 %5973  ;;  %v8348_v29 = vpop.permute.xlu1 %5888  ;;  %v5746_v58 = vunpack.i.h.bf16 %v8181_v50 }
 0x495   : > { %10544 = vst [vmem:[#allocation221_spill] sm:$0xff] %v8346_v15  ;;  %10545 = vst [vmem:[#allocation222_spill] sm:$0xff] %v8348_v29 }
 0x496   : > { %6248 = vrot.lane.b32.xlu0 %v7847_v1, %s6601_s2  ;;  %6198 = vrot.lane.b32.xlu1 %v7851_v8, %s6603_s16 }
 0x498   : > { %v8368_v29 = vpop.permute.xlu0 %5983  ;;  %v8370_v30 = vpop.permute.xlu1 %5898 }
 0x499   : > { %10546 = vst [vmem:[#allocation223_spill] sm:$0xff] %v8368_v29  ;;  %v5651_v29 = vunpack.i.h.bf16 %v8089_v21  ;;  %v10548_v21 = vunpack.i.h.bf16 %v8258_v25  ;;  %v5915_v25 = vunpack.i.l.bf16 %v8294_v36 }
 0x49a   : > { %6253 = vrot.lane.b32.xlu0 %v7847_v1, %s6602_s15  ;;  %6203 = vrot.lane.b32.xlu1 %v7851_v8, %s6604_s17 }
 0x49b   : > { %v8410_v53 = vsel %vm272_vm2, %v5830_v18, %v10548_v21  ;;  %v5796_v21 = vunpack.i.h.bf16 %v8184_v56 }
 0x49c   : > { %v8387_v62 = vpop.permute.xlu0 %5993  ;;  %v8399_v28 = vpop.permute.xlu1 %5908  ;;  %10549 = vst [vmem:[#allocation225_spill] sm:$0xff] %v8410_v53  ;;  %v5795_v53 = vunpack.i.l.bf16 %v8184_v56  ;;  %v2485_v56 = vpack.c.bf16 %v8393_v10, %v8390_v42 }
 0x49d   : > { %10547 = vst [vmem:[#allocation224_spill] sm:$0xff] %v8387_v62  ;;  %v5995_v54 = vunpack.i.l.bf16 %v8387_v62  ;;  %v10550_v3 = vunpack.i.h.bf16 %v8387_v62  ;;  %v5780_v62 = vunpack.i.l.bf16 %v8158_v45  ;;  %v10553_v45 = vunpack.i.h.bf16 %v8268_v14 }
 0x49e   : > { %6258 = vrot.lane.b32.xlu0 %v7847_v1, %s6603_s16  ;;  %6218 = vrot.lane.b32.xlu1 %v7851_v8, %s6605_s18  ;;  %v8461_v14 = vsel %vm348_vm5, %v5650_v32, %v5651_v29  ;;  %v1464_v29 = vsel %vm329_vm6, %v5795_v53, %v5796_v21  ;;  %v5935_v32 = vunpack.i.l.bf16 %v8310_v48 }
 0x49f   : > { %v8417_v13 = vsel %vm272_vm2, %v5995_v54, %v10550_v3  ;;  %v8441_v54 = vsel %vm291_vm3, %v5835_v6, %v10553_v45  ;;  %v5706_v45 = vunpack.i.h.bf16 %v8101_v23 }
 0x4a0   : > { %10551 = vst [vmem:[#allocation226_spill] sm:$0xff] %v8417_v13  ;;  %v8424_v18 = vpop.permute.xlu0 %5998  ;;  %v5919_v52 = vpop.permute.xlu1 %5918  ;;  %10554 = vst [vmem:[#allocation228_spill] sm:$0xff] %v8441_v54 }
 0x4a1   : > { %10552 = vst [vmem:[#allocation227_spill] sm:$0xff] %v8424_v18  ;;  %v6000_v3 = vunpack.i.l.bf16 %v8424_v18  ;;  %v5921_v15 = vunpack.i.h.bf16 %v5919_v52  ;;  %v5920_v36 = vunpack.i.l.bf16 %v5919_v52  ;;  %v10555_v13 = vunpack.i.h.bf16 %v8424_v18 }
 0x4a2   : > { %6263 = vrot.lane.b32.xlu0 %v7847_v1, %s6604_s17  ;;  %6223 = vrot.lane.b32.xlu1 %v7851_v8, %s6614_s26  ;;  %v1429_v52 = vsel %vm310_vm4, %v5915_v25, %v5916_v5  ;;  %v1356_v5 = vsel %vm272_vm2, %v5780_v62, %v5781_v57  ;;  %v8471_v25 = vsel %vm348_vm5, %v5700_v34, %v5701_v51  ;;  %v5936_v62 = vunpack.i.h.bf16 %v8310_v48 }
 0x4a3   : > { %v8446_v7 = vsel %vm291_vm3, %v6000_v3, %v10555_v13  ;;  %v1430_v47 = vsel %vm310_vm4, %v5920_v36, %v5921_v15  ;;  %v5705_v13 = vunpack.i.l.bf16 %v8101_v23  ;;  %v1355_v15 = vsel %vm272_vm2, %v5730_v33, %v5731_v61 }
 0x4a4   : > { %10556 = vst [vmem:[#allocation229_spill] sm:$0xff] %v8446_v7  ;;  %v8450_v50 = vpop.permute.xlu0 %6003  ;;  %v5929_v3 = vpop.permute.xlu1 %5928  ;;  %v2484_v18 = vpack.c.bf16 %v1430_v47, %v1429_v52  ;;  %v5901_v23 = vunpack.i.h.bf16 %v8370_v30  ;;  %v5900_v47 = vunpack.i.l.bf16 %v8370_v30  ;;  %v10558_v51 = vpack.c.bf16 %v8354_v60, %v8351_v2 }
 0x4a5   : > { %10557 = vst [vmem:[#allocation230_spill] sm:$0xff] %v8450_v50  ;;  %v8464_v50 = vsel %vm367_vm8, %v5655_v40, %v5656_v4  ;;  %v1463_v4 = vsel %vm329_vm6, %v5745_v49, %v5746_v58  ;;  %v5931_v42 = vunpack.i.h.bf16 %v5929_v3  ;;  %v5930_v10 = vunpack.i.l.bf16 %v5929_v3 }
 0x4a6   : > { %6278 = vrot.lane.b32.xlu0 %v7827_v11, %s6609_s1  ;;  %6228 = vrot.lane.b32.xlu1 %v7851_v8, %s6608_s21  ;;  %v8487_v30 = vsel %vm367_vm8, %v5705_v13, %v5706_v45  ;;  %v5896_v40 = vunpack.i.h.bf16 %v8274_v16  ;;  %v5895_v49 = vunpack.i.l.bf16 %v8274_v16  ;;  %v2477_v53 = vpack.c.bf16 %v1356_v5, %v1355_v15 }
 0x4a7   : > { %4762 = vmatprep.subr.bf16.mxu1 %v2484_v18  ;;  %v5926_v48 = vunpack.i.h.bf16 %v8302_v27  ;;  %v5925_v57 = vunpack.i.l.bf16 %v8302_v27  ;;  %v5671_v2 = vunpack.i.h.bf16 %v8134_v22  ;;  %v5736_v60 = vunpack.i.h.bf16 %v8164_v0 }
 0x4a8   : > { %4763 = vmatpush3.bf16.msra.mxu1 %v10558_v51  ;;  %v8484_v34 = vpop.permute.xlu0 %6008  ;;  %v5939_v61 = vpop.permute.xlu1 %5938  ;;  %v1358_v21 = vsel %vm272_vm2, %v5900_v47, %v5901_v23  ;;  %v2486_v16 = vpack.c.bf16 %v1464_v29, %v1463_v4  ;;  %v5735_v58 = vunpack.i.l.bf16 %v8164_v0  ;;  %v1501_v36 = vsel %vm348_vm5, %v5935_v32, %v5936_v62 }
 0x4a9   : > { %4764 = vmatprep.subr.bf16.mxu1 %v2485_v56  ;;  %v5941_v33 = vunpack.i.h.bf16 %v5939_v61  ;;  %v5940_v18 = vunpack.i.l.bf16 %v5939_v61  ;;  %v1466_v56 = vsel %vm329_vm6, %v5930_v10, %v5931_v42  ;;  %v5786_v45 = vunpack.i.h.bf16 %v8166_v46 }
 0x4aa   : > { %6288 = vrot.lane.b32.xlu0 %v7827_v11, %s6612_s24  ;;  %6233 = vrot.lane.b32.xlu1 %v7851_v8, %s6611_s23  ;;  %v5785_v13 = vunpack.i.l.bf16 %v8166_v46  ;;  %v1357_v3 = vsel %vm272_vm2, %v5895_v49, %v5896_v40  ;;  %v5670_v0 = vunpack.i.l.bf16 %v8134_v22  ;;  %v5751_v23 = vunpack.i.h.bf16 %v8196_v24 }
 0x4ab   : > { %v1502_v27 = vsel %vm348_vm5, %v5940_v18, %v5941_v33  ;;  %v2478_v47 = vpack.c.bf16 %v1358_v21, %v1357_v3  ;;  %v1465_v4 = vsel %vm329_vm6, %v5925_v57, %v5926_v48  ;;  %v5750_v29 = vunpack.i.l.bf16 %v8196_v24 }
 0x4ac   : > { %4765 = vmatpush3.bf16.msra.mxu1 %v2477_v53  ;;  %v8503_v52 = vpop.permute.xlu0 %6013  ;;  %v8509_v15 = vpop.permute.xlu1 %5948  ;;  %v2490_v5 = vpack.c.bf16 %v1502_v27, %v1501_v36  ;;  %v5801_v46 = vunpack.i.h.bf16 %v8200_v59  ;;  %v5800_v62 = vunpack.i.l.bf16 %v8200_v59  ;;  %v2487_v32 = vpack.c.bf16 %v1466_v56, %v1465_v4 }
 0x4ad   : > { %4766 = vmatprep.subr.bf16.mxu1 %v2486_v16  ;;  %v5721_v22 = vunpack.i.h.bf16 %v8138_v39  ;;  %v5720_v42 = vunpack.i.l.bf16 %v8138_v39  ;;  %v2479_v51 = vpack.c.bf16 %v8384_v55, %v8375_v31  ;;  %v2488_v24 = vpack.c.bf16 %v8471_v25, %v8461_v14 }
 0x4ae   : > { %6313 = vrot.lane.b32.xlu0 %v7833_v38, %s6610_s22  ;;  %6268 = vrot.lane.b32.xlu1 %v7847_v1, %s6606_s19  ;;  %v5661_v59 = vunpack.i.h.bf16 %v8114_v44  ;;  %v5660_v40 = vunpack.i.l.bf16 %v8114_v44  ;;  %v1391_v49 = vsel %vm291_vm3, %v5735_v58, %v5736_v60  ;;  %v1392_v61 = vsel %vm291_vm3, %v5785_v13, %v5786_v45 }
 0x4af   : > { %4829 = vmatpush3.bf16.msra.mxu0 %v2490_v5  ;;  %v5711_v39 = vunpack.i.h.bf16 %v8118_v17  ;;  %v5710_v48 = vunpack.i.l.bf16 %v8118_v17  ;;  %v2491_v14 = vpack.c.bf16 %v8487_v30, %v8464_v50  ;;  %v8542_v31 = vsel %vm424_vm14, %v5670_v0, %v5671_v2 }
 0x4b0   : > { %4767 = vmatpush3.bf16.msra.mxu1 %v2478_v47  ;;  %v8523_v10 = vpop.permute.xlu0 %6018  ;;  %v8533_v53 = vpop.permute.xlu1 %5958  ;;  %v5911_v55 = vunpack.i.h.bf16 %v8399_v28  ;;  %v5910_v25 = vunpack.i.l.bf16 %v8399_v28  ;;  %v1499_v57 = vsel %vm348_vm5, %v5750_v29, %v5751_v23  ;;  %v1500_v33 = vsel %vm348_vm5, %v5800_v62, %v5801_v46 }
 0x4b1   : > { %4768 = vmatprep.subr.bf16.mxu1 %v2487_v32  ;;  %v5966_v18 = vunpack.i.h.bf16 %v8334_v41  ;;  %v5965_v60 = vunpack.i.l.bf16 %v8334_v41  ;;  %v2480_v30 = vpack.c.bf16 %v1392_v61, %v1391_v49  ;;  %v1642_v2 = vsel %vm424_vm14, %v5720_v42, %v5721_v22  ;;  %v10559_v49 = vld [vmem:[#allocation61_spill] sm:$0xff]  ;;  %v10560_v61 = vld [vmem:[#allocation54_spill] sm:$0xff] }
 0x4b2   : > { %6323 = vrot.lane.b32.xlu0 %v7833_v38, %s6613_s25  ;;  %6273 = vrot.lane.b32.xlu1 %v7838_v35, %s6609_s1  ;;  %v5756_v21 = vunpack.i.h.bf16 %v8208_v19  ;;  %v5755_v28 = vunpack.i.l.bf16 %v8208_v19  ;;  %v5906_v16 = vunpack.i.h.bf16 %v8286_v12  ;;  %v5905_v58 = vunpack.i.l.bf16 %v8286_v12 }
 0x4b3   : > { %v5806_v27 = vunpack.i.h.bf16 %v8210_v43  ;;  %v2489_v45 = vpack.c.bf16 %v1500_v33, %v1499_v57  ;;  %v5805_v13 = vunpack.i.l.bf16 %v8210_v43  ;;  %v5771_v3 = vunpack.i.h.bf16 %v8233_v20 }
 0x4b4   : > { %4769 = vmatpush3.bf16.msra.mxu1 %v2479_v51  ;;  %v8552_v50 = vpop.permute.xlu0 %6033  ;;  %v5969_v36 = vpop.permute.xlu1 %5968  ;;  %v5770_v19 = vunpack.i.l.bf16 %v8233_v20  ;;  %v1394_v5 = vsel %vm291_vm3, %v5910_v25, %v5911_v55  ;;  %v5821_v12 = vunpack.i.h.bf16 %v8238_v63  ;;  %v5820_v0 = vunpack.i.l.bf16 %v8238_v63 }
 0x4b5   : > { %4770 = vmatprep.subr.bf16.mxu1 %v2488_v24  ;;  %v5971_v56 = vunpack.i.h.bf16 %v5969_v36  ;;  %v5970_v41 = vunpack.i.l.bf16 %v5969_v36  ;;  %v1609_v47 = vsel %vm405_vm13, %v5965_v60, %v5966_v18  ;;  %v5676_v4 = vunpack.i.h.bf16 %v8144_v37  ;;  %v10561_v60 = vld [vmem:[#allocation202_spill] sm:$0xff] }
 0x4b6   : > { %6333 = vrot.lane.b32.xlu0 %v7827_v11, %s6610_s22  ;;  %6283 = vrot.lane.b32.xlu1 %v7838_v35, %s6612_s24  ;;  %v5675_v20 = vunpack.i.l.bf16 %v8144_v37  ;;  %v1393_v29 = vsel %vm291_vm3, %v5905_v58, %v5906_v16  ;;  %v1535_v32 = vsel %vm367_vm8, %v5755_v28, %v5756_v21  ;;  %v2500_v22 = vpack.c.bf16 %v1642_v2, %v8542_v31  ;;  %v10562_v2 = vld [vmem:[#allocation216_spill] sm:$0xff]  ;;  %v10563_v58 = vld [vmem:[#allocation221_spill] sm:$0xff] }
 0x4b7   : > { %v1610_v43 = vsel %vm405_vm13, %v5970_v41, %v5971_v56  ;;  %v2481_v63 = vpack.c.bf16 %v1394_v5, %v1393_v29  ;;  %v4353_v42 = vcombine.low %v10518_v9, %v10517_v26  ;;  %v1536_v51 = vsel %vm367_vm8, %v5805_v13, %v5806_v27 }
 0x4b8   : > { %4771 = vmatpush3.bf16.msra.mxu1 %v2480_v30  ;;  %v8570_v23 = vpop.permute.xlu0 %6038  ;;  %v5979_v46 = vpop.permute.xlu1 %5978  ;;  %v2499_v62 = vpack.c.bf16 %v1610_v43, %v1609_v47  ;;  %v5951_v37 = vunpack.i.h.bf16 %v8509_v15  ;;  %v5950_v24 = vunpack.i.l.bf16 %v8509_v15  ;;  %v4368_v55 = vcombine.high %v10560_v61, %v10559_v49 }
 0x4b9   : > { %4772 = vmatprep.subr.bf16.mxu1 %v2489_v45  ;;  %v5981_v25 = vunpack.i.h.bf16 %v5979_v46  ;;  %v5980_v57 = vunpack.i.l.bf16 %v5979_v46  ;;  %v1643_v33 = vsel %vm424_vm14, %v5770_v19, %v5771_v3  ;;  %v1644_v18 = vsel %vm424_vm14, %v5820_v0, %v5821_v12 }
 0x4ba   : > { %6338 = vrot.lane.b32.xlu0 %v7847_v1, %s6605_s18  ;;  %6293 = vrot.lane.b32.xlu1 %v7847_v1, %s6607_s20  ;;  %v5726_v30 = vunpack.i.h.bf16 %v10561_v60  ;;  %v5725_v15 = vunpack.i.l.bf16 %v10561_v60  ;;  %v5946_v21 = vunpack.i.h.bf16 %v10562_v2  ;;  %v5945_v28 = vunpack.i.l.bf16 %v10562_v2 }
 0x4bb   : > { %4830 = vmatprep.subr.bf16.mxu0 %v2499_v62  ;;  %v5976_v36 = vunpack.i.h.bf16 %v10563_v58  ;;  %v2492_v27 = vpack.c.bf16 %v1536_v51, %v1535_v32  ;;  %v1569_v56 = vsel %vm386_vm12, %v5660_v40, %v5661_v59  ;;  %v1538_v41 = vsel %vm367_vm8, %v5950_v24, %v5951_v37  ;;  %v10566_v62 = vld [vmem:[#allocation75_spill] sm:$0xff]  ;;  %v10567_v32 = vld [vmem:[#allocation68_spill] sm:$0xff]  ;;  %v10569_v37 = vld [vmem:[#allocation206_spill] sm:$0xff] }
 0x4bc   : > { %4773 = vmatpush3.bf16.msra.mxu1 %v2481_v63  ;;  %4831 = vmatpush3.bf16.msra.mxu0 %v2491_v14  ;;  %v8590_v31 = vpop.permute.xlu0 %6043  ;;  %v8598_v16 = vpop.permute.xlu1 %5988  ;;  %v5975_v14 = vunpack.i.l.bf16 %v10563_v58  ;;  %v2501_v45 = vpack.c.bf16 %v1644_v18, %v1643_v33  ;;  %v1570_v13 = vsel %vm386_vm12, %v5710_v48, %v5711_v39  ;;  %v1646_v44 = vsel %vm424_vm14, %v5980_v57, %v5981_v25  ;;  %v10564_v39 = vld [vmem:[#allocation203_spill] sm:$0xff]  ;;  %v10570_v33 = vld [vmem:[#allocation200_spill] sm:$0xff] }
 0x4bd   : > { %4832 = vmatprep.subr.bf16.mxu0 %v2500_v22  ;;  %v1677_v59 = vsel %vm443_vm15, %v5675_v20, %v5676_v4  ;;  %v1537_v40 = vsel %vm367_vm8, %v5945_v28, %v5946_v21  ;;  %v1678_v5 = vsel %vm443_vm15, %v5725_v15, %v5726_v30  ;;  %v4367_v17 = vcombine.low %v10560_v61, %v10559_v49  ;;  %v10565_v4 = vld [vmem:[#allocation204_spill] sm:$0xff]  ;;  %v10568_v22 = vld [vmem:[#allocation205_spill] sm:$0xff]  ;;  %v10629_v61 = vld [vmem:[#allocation42_spill] sm:$0xff] }
 0x4be   : > { %6343 = vrot.lane.b32.xlu0 %v7847_v1, %s6614_s26  ;;  %6298 = vrot.lane.b32.xlu1 %v7851_v8, %s6609_s1  ;;  %v10152_v12 = vmov 0   ;;  %v5761_v48 = vunpack.i.h.bf16 %v10564_v39  ;;  %v5760_v0 = vunpack.i.l.bf16 %v10564_v39  ;;  %v2493_v47 = vpack.c.bf16 %v1538_v41, %v1537_v40 }
 0x4bf   : > { %3333 = vmatmul.mubr.bf16.vlgmr.msra.gmra.mrb[56].mxu1 %v4353_v42  ;;  %6527 = vset.pattern.permute.xlu1 %v10152_v12  ;;  %v1645_v43 = vsel %vm424_vm14, %v5975_v14, %v5976_v36  ;;  %v5811_v20 = vunpack.i.h.bf16 %v10565_v4  ;;  %v5810_v29 = vunpack.i.l.bf16 %v10565_v4  ;;  %v4382_v63 = vcombine.high %v10567_v32, %v10566_v62  ;;  %v10571_v36 = vld [vmem:[#allocation199_spill] sm:$0xff] }
 0x4c0   : > { %4833 = vmatpush3.bf16.msra.mxu0 %v2492_v27  ;;  %v8617_v3 = vpop.permute.xlu0 %6048  ;;  %3340 = vmatprep.mubr.bf16.mxu1 %v4368_v55  ;;  %v8622_v19 = vpop.permute.xlu1 %6023  ;;  %v2502_v46 = vpack.c.bf16 %v1646_v44, %v1645_v43  ;;  %v5776_v42 = vunpack.i.h.bf16 %v10568_v22  ;;  %v5775_v51 = vunpack.i.l.bf16 %v10568_v22  ;;  %v5826_v24 = vunpack.i.h.bf16 %v10569_v37  ;;  %v10576_v22 = vld [vmem:[#allocation89_spill] sm:$0xff] }
 0x4c1   : > { %4834 = vmatprep.subr.bf16.mxu0 %v2501_v45  ;;  %6528 = vset.pattern.permute.xlu0 %v10152_v12  ;;  %v5825_v55 = vunpack.i.l.bf16 %v10569_v37  ;;  %v5666_v18 = vunpack.i.h.bf16 %v10570_v33  ;;  %v5665_v60 = vunpack.i.l.bf16 %v10570_v33  ;;  %v2494_v30 = vpack.c.bf16 %v1570_v13, %v1569_v56  ;;  %v10572_v13 = vld [vmem:[#allocation201_spill] sm:$0xff] }
 0x4c2   : > { %6348 = vrot.lane.b32.xlu0 %v7847_v1, %s6608_s21  ;;  %6303 = vrot.lane.b32.xlu1 %v7851_v8, %s6612_s24  ;;  %v2503_v15 = vpack.c.bf16 %v1678_v5, %v1677_v59  ;;  %v1571_v2 = vsel %vm386_vm12, %v5760_v0, %v5761_v48  ;;  %v1572_v21 = vsel %vm386_vm12, %v5810_v29, %v5811_v20  ;;  %v5961_v28 = vunpack.i.h.bf16 %v8533_v53  ;;  %v10573_v59 = vld [vmem:[#allocation218_spill] sm:$0xff] }
 0x4c3   : > { %v5960_v58 = vunpack.i.l.bf16 %v8533_v53  ;;  %v5991_v14 = vunpack.i.h.bf16 %v8598_v16  ;;  %v5990_v27 = vunpack.i.l.bf16 %v8598_v16  ;;  %v1679_v56 = vsel %vm443_vm15, %v5775_v51, %v5776_v42  ;;  %v10574_v16 = vld [vmem:[#allocation223_spill] sm:$0xff]  ;;  %v10577_v42 = vld [vmem:[#allocation82_spill] sm:$0xff] }
 0x4c4   : > { %4835 = vmatpush3.bf16.msra.mxu0 %v2493_v47  ;;  %v8644_v25 = vpop.permute.xlu0 %6053  ;;  %v8646_v57 = vpop.permute.xlu1 %6028  ;;  %v1680_v45 = vsel %vm443_vm15, %v5825_v55, %v5826_v24  ;;  %v5716_v44 = vunpack.i.h.bf16 %v10572_v13  ;;  %v5715_v53 = vunpack.i.l.bf16 %v10572_v13  ;;  %v5956_v40 = vunpack.i.h.bf16 %v10573_v59 }
 0x4c5   : > { %4836 = vmatprep.subr.bf16.mxu0 %v2502_v46  ;;  %v5955_v5 = vunpack.i.l.bf16 %v10573_v59  ;;  %v5986_v39 = vunpack.i.h.bf16 %v10574_v16  ;;  %v5985_v48 = vunpack.i.l.bf16 %v10574_v16  ;;  %v2495_v0 = vpack.c.bf16 %v1572_v21, %v1571_v2  ;;  %v10584_v59 = vld [vmem:[#allocation208_spill] sm:$0xff] }
 0x4c6   : > { %6353 = vrot.lane.b32.xlu0 %v7847_v1, %s6611_s23  ;;  %6308 = vrot.lane.b32.xlu1 %v10571_v36, %s6610_s22  ;;  %v1574_v47 = vsel %vm386_vm12, %v5960_v58, %v5961_v28  ;;  %v2504_v43 = vpack.c.bf16 %v1680_v45, %v1679_v56  ;;  %v4381_v4 = vcombine.low %v10567_v32, %v10566_v62  ;;  %v6026_v20 = vunpack.i.h.bf16 %v8622_v19  ;;  %v10580_v28 = vld [vmem:[#allocation224_spill] sm:$0xff] }
 0x4c7   : > { %3341 = vmatmul.mubr.bf16.gmra.mrb[60].mxu1 %v4367_v17  ;;  %v6025_v29 = vunpack.i.l.bf16 %v8622_v19  ;;  %v4396_v51 = vcombine.high %v10577_v42, %v10576_v22  ;;  %v1605_v37 = vsel %vm405_vm13, %v5665_v60, %v5666_v18  ;;  %v1606_v24 = vsel %vm405_vm13, %v5715_v53, %v5716_v44  ;;  %v10579_v60 = vld [vmem:[#allocation226_spill] sm:$0xff]  ;;  %v10583_v53 = vld [vmem:[#allocation225_spill] sm:$0xff] }
 0x4c8   : > { %4837 = vmatpush3.bf16.msra.mxu0 %v2494_v30  ;;  %v8660_v41 = vpop.permute.xlu0 %6088  ;;  %3348 = vmatprep.mubr.bf16.mxu1 %v4382_v63  ;;  %v8668_v17 = vpop.permute.xlu1 %6058  ;;  %v1682_v63 = vsel %vm443_vm15, %v5990_v27, %v5991_v14  ;;  %v1573_v55 = vsel %vm386_vm12, %v5955_v5, %v5956_v40  ;;  %v10578_v30 = vld [vmem:[#allocation207_spill] sm:$0xff]  ;;  %v1681_v21 = vsel %vm443_vm15, %v5985_v48, %v5986_v39  ;;  %v10581_v58 = vunpack.i.h.bf16 %v10580_v28  ;;  %v10582_v27 = vld [vmem:[#allocation230_spill] sm:$0xff]  ;;  %v10586_v48 = vld [vmem:[#allocation48_spill] sm:$0xff] }
 0x4c9   : > { %4838 = vmatprep.subr.bf16.mxu0 %v2503_v15  ;;  %v5866_v15 = vunpack.i.h.bf16 %v10578_v30  ;;  %v5865_v19 = vunpack.i.l.bf16 %v10578_v30  ;;  %v2496_v2 = vpack.c.bf16 %v1574_v47, %v1573_v55  ;;  %v2505_v18 = vpack.c.bf16 %v1682_v63, %v1681_v21  ;;  %v10591_v21 = vld [vmem:[#allocation210_spill] sm:$0xff] }
 0x4ca   : > { %6358 = vrot.lane.b32.xlu0 %v7847_v1, %s6609_s1  ;;  %6318 = vrot.lane.b32.xlu1 %v10571_v36, %s6613_s25  ;;  %v6382_v14 = vpack.i.bf16 %v10581_v58, %v10579_v60  ;;  %v6006_v56 = vunpack.i.h.bf16 %v10582_v27  ;;  %v6005_v45 = vunpack.i.l.bf16 %v10582_v27  ;;  %v2015_v44 = vsel %vm405_vm13, %v6025_v29, %v6026_v20  ;;  %v10589_v29 = vld [vmem:[#allocation62_spill] sm:$0xff]  ;;  %v10593_v58 = vld [vmem:[#allocation227_spill] sm:$0xff] }
 0x4cb   : > { %v10585_v40 = vunpack.i.h.bf16 %v10584_v59  ;;  %v2497_v39 = vpack.c.bf16 %v1606_v24, %v1605_v37  ;;  %v2014_v20 = vsel %vm405_vm13, %v5865_v19, %v5866_v15  ;;  %v4395_v24 = vcombine.low %v10577_v42, %v10576_v22  ;;  %v10596_v59 = vld [vmem:[#allocation96_spill] sm:$0xff]  ;;  %v10620_v42 = vld [vmem:[#allocation111_spill] sm:$0xff] }
 0x4cc   : > { %4839 = vmatpush3.bf16.msra.mxu0 %v2495_v0  ;;  %v8681_v46 = vpop.permute.xlu0 %6093  ;;  %v8689_v33 = vpop.permute.xlu1 %6063  ;;  %v10587_v0 = vld [vmem:[#allocation41_spill] sm:$0xff]  ;;  %v2530_v37 = vpack.c.bf16 %v2015_v44, %v2014_v20  ;;  %v10594_v15 = vunpack.i.h.bf16 %v10593_v58 }
 0x4cd   : > { %10575 = vst [vmem:[#allocation202_spill] sm:$0xff] %v8681_v46  ;;  %4840 = vmatprep.subr.bf16.mxu0 %v2504_v43  ;;  %v6367_v5 = vpack.i.bf16 %v10585_v40, %v10583_v53  ;;  %v4355_v47 = vcombine.low %v10587_v0, %v10586_v48  ;;  %v10588_v43 = vld [vmem:[#allocation211_spill] sm:$0xff]  ;;  %v6066_v30 = vunpack.i.h.bf16 %v8689_v33 }
 0x4ce   : > { %6363 = vrot.lane.b32.xlu0 %v7847_v1, %s6612_s24  ;;  %6328 = vrot.lane.b32.xlu1 %v7838_v35, %s6610_s22  ;;  %v5840_v63 = vunpack.i.l.bf16 %v10588_v43  ;;  %v6387_v19 = vpack.i.bf16 %v10594_v15, %v8446_v7 }
 0x4cf   : > { %3349 = vmatmul.mubr.bf16.gmra.mrb[64].mxu1 %v4381_v4  ;;  %v5841_v4 = vunpack.i.h.bf16 %v10588_v43 }
 0x4d0   : > { %4841 = vmatpush3.bf16.msra.mxu0 %v2496_v2  ;;  %v6119_v13 = vpop.permute.xlu0 %6118  ;;  %3356 = vmatprep.mubr.bf16.mxu1 %v4396_v51  ;;  %v8707_v16 = vpop.permute.xlu1 %6068  ;;  %v10590_v51 = vld [vmem:[#allocation55_spill] sm:$0xff]  ;;  %v6065_v2 = vunpack.i.l.bf16 %v8689_v33 }
 0x4d1   : > { %4842 = vmatprep.subr.bf16.mxu0 %v2505_v18  ;;  %v4370_v55 = vcombine.high %v10590_v51, %v10589_v29  ;;  %v10592_v18 = vunpack.i.h.bf16 %v10591_v21  ;;  %v10595_v33 = vld [vmem:[#allocation103_spill] sm:$0xff]  ;;  %v6121_v44 = vunpack.i.h.bf16 %v6119_v13  ;;  %v8736_v20 = vsel %vm310_vm4, %v5840_v63, %v5841_v4 }
 0x4d2   : > { %6383 = vrot.lane.b32.xlu0 %v6382_v14, %s6614_s26  ;;  %6368 = vrot.lane.b32.xlu1 %v6367_v5, %s6614_s26  ;;  %v8729_v14 = vsel %vm310_vm4, %v6005_v45, %v6006_v56  ;;  %v4410_v40 = vcombine.high %v10596_v59, %v10595_v33  ;;  %v6120_v5 = vunpack.i.l.bf16 %v6119_v13  ;;  %v6061_v21 = vunpack.i.h.bf16 %v8668_v17 }
 0x4d3   : > { %v6372_v28 = vpack.i.bf16 %v10592_v18, %v8441_v54  ;;  %v6060_v45 = vunpack.i.l.bf16 %v8668_v17  ;;  %v6392_v13 = vpack.i.bf16 %v6006_v56, %v8729_v14  ;;  %v6377_v17 = vpack.i.bf16 %v5841_v4, %v8736_v20  ;;  %v10599_v4 = vld [vmem:[#allocation76_spill] sm:$0xff] }
 0x4d4   : > { %4843 = vmatpush3.bf16.msra.mxu0 %v2497_v39  ;;  %v6124_v27 = vpop.permute.xlu0 %6123  ;;  %v8733_v43 = vpop.permute.xlu1 %6073  ;;  %v8742_v39 = vsel %vm291_vm3, %v6065_v2, %v6066_v30  ;;  %v8753_v58 = vsel %vm272_vm2, %v6120_v5, %v6121_v44  ;;  %v4369_v56 = vcombine.low %v10590_v51, %v10589_v29  ;;  %v6071_v12 = vunpack.i.h.bf16 %v8707_v16  ;;  %v10638_v54 = vld [vmem:[#allocation220_spill] sm:$0xff] }
 0x4d5   : > { %v6126_v48 = vunpack.i.h.bf16 %v6124_v27  ;;  %v6125_v0 = vunpack.i.l.bf16 %v6124_v27  ;;  %4968 = vmatprep.subr.bf16.mxu0 %v2530_v37  ;;  %10597 = vst [vmem:[#allocation216_spill] sm:$0xff] %v8742_v39  ;;  %v8756_v15 = vsel %vm272_vm2, %v6060_v45, %v6061_v21  ;;  %v10602_v45 = vld [vmem:[#allocation117_spill] sm:$0xff]  ;;  %v5886_v7 = vunpack.i.h.bf16 %v10638_v54 }
 0x4d6   : > { %6388 = vrot.lane.b32.xlu0 %v6387_v19, %s6614_s26  ;;  %6373 = vrot.lane.b32.xlu1 %v6372_v28, %s6614_s26  ;;  %v4409_v19 = vcombine.low %v10596_v59, %v10595_v33  ;;  %v6397_v27 = vpack.i.bf16 %v6061_v21, %v8756_v15  ;;  %v10619_v33 = vld [vmem:[#allocation118_spill] sm:$0xff]  ;;  %v10628_v59 = vld [vmem:[#allocation49_spill] sm:$0xff] }
 0x4d7   : > { %v8745_v18 = vsel %vm291_vm3, %v6125_v0, %v6126_v48  ;;  %3437 = vmatmul.mubr.bf16.vlgmr.msra.gmra.mrb[52].mxu0 %v4355_v47  ;;  %3357 = vmatmul.mubr.bf16.gmra.mrb[68].mxu1 %v4395_v24  ;;  %v6412_v47 = vpack.i.bf16 %v6121_v44, %v8753_v58  ;;  %v10600_v24 = vld [vmem:[#allocation69_spill] sm:$0xff]  ;;  %v6070_v44 = vunpack.i.l.bf16 %v8707_v16  ;;  %v4358_v62 = vcombine.high %v10629_v61, %v10628_v59 }
 0x4d8   : > { %10598 = vst [vmem:[#allocation221_spill] sm:$0xff] %v8745_v18  ;;  %v6129_v37 = vpop.permute.xlu0 %6128  ;;  %3444 = vmatprep.mubr.bf16.mxu0 %v4370_v55  ;;  %v6079_v2 = vpop.permute.xlu1 %6078  ;;  %3364 = vmatprep.mubr.bf16.mxu1 %v4410_v40  ;;  %v4384_v28 = vcombine.high %v10600_v24, %v10599_v4  ;;  %v6417_v21 = vpack.i.bf16 %v6126_v48, %v8745_v18 }
 0x4d9   : > { %v6131_v40 = vunpack.i.h.bf16 %v6129_v37  ;;  %v6130_v5 = vunpack.i.l.bf16 %v6129_v37  ;;  %v6081_v63 = vunpack.i.h.bf16 %v6079_v2  ;;  %v6080_v6 = vunpack.i.l.bf16 %v6079_v2 }
 0x4da   : > { %6393 = vrot.lane.b32.xlu0 %v6392_v13, %s6614_s26  ;;  %6378 = vrot.lane.b32.xlu1 %v6377_v17, %s6614_s26  ;;  %v10603_v13 = vld [vmem:[#allocation110_spill] sm:$0xff]  ;;  %v6402_v37 = vpack.i.bf16 %v6066_v30, %v8742_v39  ;;  %v8786_v2 = vsel %vm310_vm4, %v6070_v44, %v6071_v12  ;;  %v4383_v30 = vcombine.low %v10600_v24, %v10599_v4  ;;  %v10636_v39 = vld [vmem:[#allocation217_spill] sm:$0xff] }
 0x4db   : > { %v4424_v17 = vcombine.high %v10603_v13, %v10602_v45  ;;  %v8781_v22 = vsel %vm310_vm4, %v6130_v5, %v6131_v40  ;;  %v1908_v48 = vsel %vm348_vm5, %v6080_v6, %v6081_v63  ;;  %v6407_v6 = vpack.i.bf16 %v6071_v12, %v8786_v2 }
 0x4dc   : > { %v8763_v55 = vpop.permute.xlu0 %6133  ;;  %v8770_v0 = vpop.permute.xlu1 %6083 }
 0x4dd   : > { %10601 = vst [vmem:[#allocation203_spill] sm:$0xff] %v8770_v0 }
 0x4de   : > { %6413 = vrot.lane.b32.xlu0 %v6412_v47, %s6614_s26  ;;  %6398 = vrot.lane.b32.xlu1 %v6397_v27, %s6614_s26  ;;  %v6422_v47 = vpack.i.bf16 %v6131_v40, %v8781_v22  ;;  %v10607_v27 = vld [vmem:[#allocation83_spill] sm:$0xff] }
 0x4df   : > { %3445 = vmatmul.mubr.bf16.gmra.mrb[56].mxu0 %v4369_v56  ;;  %3365 = vmatmul.mubr.bf16.gmra.mrb[72].mxu1 %v4409_v19  ;;  %v10606_v19 = vld [vmem:[#allocation90_spill] sm:$0xff] }
 0x4e0   : > { %v6139_v9 = vpop.permute.xlu0 %6138  ;;  %3452 = vmatprep.mubr.bf16.mxu0 %v4384_v28  ;;  %v8783_v16 = vpop.permute.xlu1 %6098  ;;  %3372 = vmatprep.mubr.bf16.mxu1 %v4424_v17  ;;  %v4398_v5 = vcombine.high %v10607_v27, %v10606_v19  ;;  %v4423_v17 = vcombine.low %v10603_v13, %v10602_v45  ;;  %v4397_v12 = vcombine.low %v10607_v27, %v10606_v19  ;;  %v10622_v45 = vld [vmem:[#allocation152_spill] sm:$0xff] }
 0x4e1   : > { %v6141_v26 = vunpack.i.h.bf16 %v6139_v9  ;;  %v6140_v29 = vunpack.i.l.bf16 %v6139_v9  ;;  %10604 = vst [vmem:[#allocation204_spill] sm:$0xff] %v8783_v16 }
 0x4e2   : > { %6418 = vrot.lane.b32.xlu0 %v6417_v21, %s6614_s26  ;;  %6403 = vrot.lane.b32.xlu1 %v6402_v37, %s6614_s26 }
 0x4e3   : > { %v1909_v56 = vsel %vm348_vm5, %v6140_v29, %v6141_v26  ;;  %v10609_v26 = vld [vmem:[#allocation131_spill] sm:$0xff]  ;;  %v10610_v29 = vld [vmem:[#allocation124_spill] sm:$0xff] }
 0x4e4   : > { %v8795_v9 = vpop.permute.xlu0 %6143  ;;  %v2522_v28 = vpack.c.bf16 %v1909_v56, %v1908_v48  ;;  %v8802_v63 = vpop.permute.xlu1 %6103  ;;  %v4438_v44 = vcombine.high %v10610_v29, %v10609_v26  ;;  %v10614_v48 = vld [vmem:[#allocation104_spill] sm:$0xff]  ;;  %v10615_v56 = vld [vmem:[#allocation97_spill] sm:$0xff] }
 0x4e5   : > { %10605 = vst [vmem:[#allocation205_spill] sm:$0xff] %v8795_v9  ;;  %10608 = vst [vmem:[#allocation206_spill] sm:$0xff] %v8802_v63  ;;  %v4412_v4 = vcombine.high %v10615_v56, %v10614_v48 }
 0x4e6   : > { %6423 = vrot.lane.b32.xlu0 %v6422_v47, %s6614_s26  ;;  %4969 = vmatpush3.bf16.msra.mxu0 %v2522_v28  ;;  %v4437_v47 = vcombine.low %v10610_v29, %v10609_v26  ;;  %v4411_v26 = vcombine.low %v10615_v56, %v10614_v48 }
 0x4e7   : > { %6408 = vrot.lane.b32.xlu1 %v6407_v6, %s6614_s26  ;;  %3453 = vmatmul.mubr.bf16.gmra.mrb[60].mxu0 %v4383_v30  ;;  %v10616_v30 = vld [vmem:[#allocation145_spill] sm:$0xff]  ;;  %v10617_v6 = vld [vmem:[#allocation138_spill] sm:$0xff] }
 0x4e8   : > { %v8808_v40 = vpop.permute.xlu0 %6158  ;;  %3460 = vmatprep.mubr.bf16.mxu0 %v4398_v5  ;;  %3373 = vmatmul.mubr.bf16.gmra.mrb[76].mxu1 %v4423_v17  ;;  %v8810_v21 = vpop.permute.xlu1 %6108  ;;  %v4452_v5 = vcombine.high %v10617_v6, %v10616_v30  ;;  %v6091_v17 = vunpack.i.h.bf16 %v8660_v41 }
 0x4e9   : > { %10611 = vst [vmem:[#allocation200_spill] sm:$0xff] %v8808_v40  ;;  %10612 = vst [vmem:[#allocation199_spill] sm:$0xff] %v8810_v21  ;;  %3380 = vmatprep.mubr.bf16.mxu1 %v4438_v44  ;;  %v6090_v44 = vunpack.i.l.bf16 %v8660_v41  ;;  %v4426_v41 = vcombine.high %v10620_v42, %v10619_v33  ;;  %v10635_v40 = vld [vmem:[#allocation139_spill] sm:$0xff] }
 0x4eb   : > { %v2016_v32 = vsel %vm405_vm13, %v6090_v44, %v6091_v17 }
 0x4ec   : > { %v8814_v37 = vpop.permute.xlu0 %6163  ;;  %v8820_v28 = vpop.permute.xlu1 %6113 }
 0x4ed   : > { %10613 = vst [vmem:[#allocation201_spill] sm:$0xff] %v8814_v37 }
 0x4ef   : > { %3461 = vmatmul.mubr.bf16.gmra.mrb[64].mxu0 %v4397_v12 }
 0x4f0   : > { %v8826_v13 = vpop.permute.xlu0 %6168  ;;  %3468 = vmatprep.mubr.bf16.mxu0 %v4412_v4  ;;  %3381 = vmatmul.mubr.bf16.gmra.mrb[80].mxu1 %v4437_v47  ;;  %v6149_v19 = vpop.permute.xlu1 %6148  ;;  %v4451_v4 = vcombine.low %v10617_v6, %v10616_v30  ;;  %v10624_v30 = vld [vmem:[#allocation209_spill] sm:$0xff] }
 0x4f1   : > { %10618 = vst [vmem:[#allocation218_spill] sm:$0xff] %v8826_v13  ;;  %3388 = vmatprep.mubr.bf16.mxu1 %v4452_v5  ;;  %v6151_v24 = vunpack.i.h.bf16 %v6149_v19  ;;  %v6150_v27 = vunpack.i.l.bf16 %v6149_v19  ;;  %v4466_v19 = vcombine.high %v10622_v45, %v10622_v45  ;;  %v5871_v51 = vunpack.i.h.bf16 %v10624_v30 }
 0x4f3   : > { %v2017_v12 = vsel %vm405_vm13, %v6150_v27, %v6151_v24  ;;  %v10623_v24 = vld [vmem:[#allocation212_spill] sm:$0xff] }
 0x4f4   : > { %v8830_v29 = vpop.permute.xlu0 %6173  ;;  %v8838_v47 = vpop.permute.xlu1 %6153  ;;  %v2531_v5 = vpack.c.bf16 %v2017_v12, %v2016_v32  ;;  %v5846_v27 = vunpack.i.h.bf16 %v10623_v24  ;;  %v5845_v44 = vunpack.i.l.bf16 %v10623_v24  ;;  %v4425_v32 = vcombine.low %v10620_v42, %v10619_v33 }
 0x4f5   : > { %10621 = vst [vmem:[#allocation223_spill] sm:$0xff] %v8838_v47  ;;  %v4465_v24 = vcombine.low %v10622_v45, %v10622_v45  ;;  %v10631_v45 = vld [vmem:[#allocation213_spill] sm:$0xff] }
 0x4f6   : > { %4970 = vmatprep.subr.bf16.mxu0 %v2531_v5  ;;  %v10627_v5 = vld [vmem:[#allocation125_spill] sm:$0xff]  ;;  %v8863_v33 = vsel %vm329_vm6, %v5845_v44, %v5846_v27  ;;  %v5851_v21 = vunpack.i.h.bf16 %v10631_v45 }
 0x4f7   : > { %3469 = vmatmul.mubr.bf16.gmra.mrb[68].mxu0 %v4411_v26  ;;  %v5870_v26 = vunpack.i.l.bf16 %v10624_v30 }
 0x4f8   : > { %v8842_v48 = vpop.permute.xlu0 %6208  ;;  %3476 = vmatprep.mubr.bf16.mxu0 %v4426_v41  ;;  %3389 = vmatmul.mubr.bf16.gmra.mrb[84].mxu1 %v4451_v4  ;;  %v6179_v17 = vpop.permute.xlu1 %6178  ;;  %v10626_v4 = vld [vmem:[#allocation132_spill] sm:$0xff] }
 0x4f9   : > { %3396 = vmatprep.mubr.bf16.mxu1 %v4466_v19  ;;  %v6181_v49 = vunpack.i.h.bf16 %v6179_v17  ;;  %v6180_v6 = vunpack.i.l.bf16 %v6179_v17  ;;  %v4440_v19 = vcombine.high %v10627_v5, %v10626_v4  ;;  %v8867_v13 = vsel %vm424_vm14, %v5870_v26, %v5871_v51 }
 0x4fa   : > { %10630 = vst [vmem:[#allocation226_spill] sm:$0xff] %v8867_v13 }
 0x4fb   : > { %v8851_v12 = vsel %vm272_vm2, %v6180_v6, %v6181_v49 }
 0x4fc   : > { %v8853_v41 = vpop.permute.xlu0 %6213  ;;  %v6427_v17 = vpack.i.bf16 %v6181_v49, %v8851_v12  ;;  %v6184_v56 = vpop.permute.xlu1 %6183  ;;  %v8870_v49 = vpack.i.bf16 %v5846_v27, %v8863_v33 }
 0x4fd   : > { %10625 = vst [vmem:[#allocation207_spill] sm:$0xff] %v8853_v41  ;;  %v6186_v30 = vunpack.i.h.bf16 %v6184_v56  ;;  %v6185_v6 = vunpack.i.l.bf16 %v6184_v56  ;;  %v5850_v56 = vunpack.i.l.bf16 %v10631_v45  ;;  %v10634_v41 = vld [vmem:[#allocation146_spill] sm:$0xff] }
 0x4fe   : > { %6428 = vrot.lane.b32.xlu1 %v6427_v17, %s6614_s26 }
 0x4ff   : > { %3477 = vmatmul.mubr.bf16.gmra.mrb[72].mxu0 %v4425_v32  ;;  %v1802_v17 = vsel %vm291_vm3, %v6185_v6, %v6186_v30 }
 0x500   : > { %v6239_v42 = vpop.permute.xlu0 %6238  ;;  %3484 = vmatprep.mubr.bf16.mxu0 %v4440_v19  ;;  %3397 = vmatmul.mubr.bf16.gmra.mrb[88].mxu1 %v4465_v24  ;;  %v6189_v44 = vpop.permute.xlu1 %6188  ;;  %v10632_v19 = vld [vmem:[#allocation214_spill] sm:$0xff]  ;;  %v6437_v18 = vpack.i.bf16 %v6186_v30, %v1802_v17  ;;  %v5885_v30 = vunpack.i.l.bf16 %v10638_v54 }
 0x501   : > { %v6241_v63 = vunpack.i.h.bf16 %v6239_v42  ;;  %v6240_v37 = vunpack.i.l.bf16 %v6239_v42  ;;  %3540 = vmatprep.mubr.bf16.mxu1 %v4358_v62  ;;  %v6191_v32 = vunpack.i.h.bf16 %v6189_v44  ;;  %v6190_v16 = vunpack.i.l.bf16 %v6189_v44  ;;  %v10633_v62 = vld [vmem:[#allocation215_spill] sm:$0xff] }
 0x502   : > { %v5856_v24 = vunpack.i.h.bf16 %v10632_v19  ;;  %v5855_v51 = vunpack.i.l.bf16 %v10632_v19  ;;  %6433 = vrot.lane.b32.xlu1 %v7838_v35, %s6613_s25  ;;  %v4439_v42 = vcombine.low %v10627_v5, %v10626_v4  ;;  %v5861_v27 = vunpack.i.h.bf16 %v10633_v62  ;;  %v10637_v5 = vld [vmem:[#allocation219_spill] sm:$0xff] }
 0x503   : > { %v8878_v26 = vsel %vm272_vm2, %v6240_v37, %v6241_v63  ;;  %v5860_v45 = vunpack.i.l.bf16 %v10633_v62  ;;  %v4454_v19 = vcombine.high %v10635_v40, %v10634_v41  ;;  %v5876_v37 = vunpack.i.h.bf16 %v10636_v39 }
 0x504   : > { %v6447_v6 = vpack.i.bf16 %v6241_v63, %v8878_v26  ;;  %v8887_v44 = vpop.permute.xlu0 %6243  ;;  %v8894_v13 = vpop.permute.xlu1 %6193  ;;  %v5875_v4 = vunpack.i.l.bf16 %v10636_v39  ;;  %v5881_v62 = vunpack.i.h.bf16 %v10637_v5  ;;  %v5880_v63 = vunpack.i.l.bf16 %v10637_v5 }
 0x505   : > { %v6246_v46 = vunpack.i.h.bf16 %v8887_v44  ;;  %v6245_v35 = vunpack.i.l.bf16 %v8887_v44  ;;  %v8900_v0 = vsel %vm310_vm4, %v6190_v16, %v6191_v32  ;;  %v8908_v39 = vsel %vm348_vm5, %v5850_v56, %v5851_v21 }
 0x506   : > { %6448 = vrot.lane.b32.xlu0 %v6447_v6, %s6614_s26  ;;  %6438 = vrot.lane.b32.xlu1 %v6437_v18, %s6614_s26  ;;  %v8911_v44 = vsel %vm367_vm8, %v5855_v51, %v5856_v24  ;;  %v6011_v16 = vunpack.i.h.bf16 %v8484_v34  ;;  %v6010_v5 = vunpack.i.l.bf16 %v8484_v34  ;;  %v8918_v54 = vsel %vm386_vm12, %v5860_v45, %v5861_v27  ;;  %v10641_v45 = vld [vmem:[#allocation194_spill] sm:$0xff] }
 0x507   : > { %v1803_v47 = vsel %vm291_vm3, %v6245_v35, %v6246_v46  ;;  %3485 = vmatmul.mubr.bf16.gmra.mrb[76].mxu0 %v4439_v42  ;;  %v10639_v35 = vld [vmem:[#allocation222_spill] sm:$0xff]  ;;  %v6442_v21 = vpack.i.bf16 %v6191_v32, %v8900_v0  ;;  %v8924_v24 = vsel %vm605_vm0, %v5880_v63, %v5881_v62  ;;  %v2515_v34 = vpack.c.bf16 %v8729_v14, %v8736_v20  ;;  %v10640_v32 = vld [vmem:[#allocation193_spill] sm:$0xff]  ;;  %v10659_v62 = vld [vmem:[#allocation56_spill] sm:$0xff] }
 0x508   : > { %v8915_v6 = vpop.permute.xlu0 %6248  ;;  %v2514_v9 = vpack.c.bf16 %v1803_v47, %v1802_v17  ;;  %3492 = vmatprep.mubr.bf16.mxu0 %v4454_v19  ;;  %v5891_v18 = vunpack.i.h.bf16 %v10639_v35  ;;  %v5890_v42 = vunpack.i.l.bf16 %v10639_v35  ;;  %v6199_v56 = vpop.permute.xlu1 %6198  ;;  %v8931_v17 = vsel %vm443_vm15, %v5875_v4, %v5876_v37 }
 0x509   : > { %v8934_v27 = vsel %vm462_vm7, %v5885_v30, %v5886_v7  ;;  %v10642_v19 = vpack.c.bf16 %v10640_v32, %v10641_v45  ;;  %v8947_v4 = vsel %vm329_vm6, %v6010_v5, %v6011_v16  ;;  %v6250_v37 = vunpack.i.l.bf16 %v8915_v6  ;;  %v10649_v5 = vld [vmem:[#allocation195_spill] sm:$0xff] }
 0x50a   : > { %6453 = vrot.lane.b32.xlu0 %v7827_v11, %s6613_s25  ;;  %4898 = vmatprep.subr.bf16.mxu1 %v2514_v9  ;;  %v4704_v51 = vpop.f32.mrb[16].mxu0  ;;  %v4453_v11 = vcombine.low %v10635_v40, %v10634_v41  ;;  %v10644_v9 = vld [vmem:[#allocation153_spill] sm:$0xff]  ;;  %vm10646_vm2 = vcmask 932864   ;;  %v6015_v40 = vunpack.i.l.bf16 %v8503_v52  ;;  %v6477_v45 = vpack.i.bf16 %v6011_v16, %v8947_v4 }
 0x50b   : > { %6443 = vrot.lane.b32.xlu1 %v6442_v21, %s6614_s26  ;;  %4899 = vmatpush3.bf16.msk.msra.mxu1 %vm7421_vm9, %v10642_v19  ;;  %v4468_v14 = vcombine.high %v10644_v9, %v10644_v9  ;;  %v4705_v20 = vpop.f32.mrb[17].mxu0  ;;  %v6016_v21 = vunpack.i.h.bf16 %v8503_v52  ;;  %v8963_v19 = vsel %vm10646_vm2, %v5890_v42, %v5891_v18  ;;  %v6201_v41 = vunpack.i.h.bf16 %v6199_v56  ;;  %vm10671_vm3 = vmmov %vm10646_vm2 }
 0x50c   : > { %v8951_v63 = vpop.permute.xlu0 %6253  ;;  %4900 = vmatprep.subr.bf16.mxu1 %v2515_v34  ;;  %v8953_v30 = vadd.f32 %v4705_v20, %v4704_v51  ;;  %v4707_v35 = vpop.f32.mrb[18].mxu0  ;;  %v6021_v34 = vunpack.i.h.bf16 %v8523_v10  ;;  %v6020_v51 = vunpack.i.l.bf16 %v8523_v10  ;;  %v2516_v52 = vpack.c.bf16 %v8781_v22, %v8786_v2 }
 0x50d   : > { %v8956_v32 = vpop.permute.xlu1 %6203  ;;  %v4708_v7 = vpop.f32.mrb[19].mxu0  ;;  %v6472_v18 = vpack.i.bf16 %v6246_v46, %v1803_v47  ;;  %v10648_v42 = vunpack.i.h.bf16 %v8915_v6  ;;  %v6035_v46 = vunpack.i.l.bf16 %v8552_v50 }
 0x50e   : > { %10645 = vst [vmem:[#allocation224_spill] sm:$0xff] %v8953_v30  ;;  %6463 = vrot.lane.b32.xlu0 %v7847_v1, %s6610_s22  ;;  %v8970_v20 = vadd.f32 %v4708_v7, %v4707_v35  ;;  %v6200_v30 = vunpack.i.l.bf16 %v6199_v56  ;;  %v10650_v7 = vld [vmem:[#allocation196_spill] sm:$0xff]  ;;  %v2518_v56 = vpack.c.bf16 %v8947_v4, %v8863_v33  ;;  %v9000_v33 = vsel %vm348_vm5, %v6015_v40, %v6016_v21 }
 0x50f   : > { %6458 = vrot.lane.b32.xlu1 %v7851_v8, %s6610_s22  ;;  %3493 = vmatmul.mubr.bf16.gmra.mrb[80].mxu0 %v4453_v11  ;;  %v8980_v10 = vsel %vm310_vm4, %v6250_v37, %v10648_v42  ;;  %v10651_v35 = vpack.c.bf16 %v10649_v5, %v10650_v7  ;;  %v6036_v11 = vunpack.i.h.bf16 %v8552_v50  ;;  %v8994_v37 = vsel %vm367_vm8, %v6020_v51, %v6021_v34  ;;  %v10652_v51 = vld [vmem:[#allocation50_spill] sm:$0xff] }
 0x510   : > { %10647 = vst [vmem:[#allocation230_spill] sm:$0xff] %v8970_v20  ;;  %v6259_v16 = vpop.permute.xlu0 %6258  ;;  %3500 = vmatprep.mubr.bf16.mxu0 %v4468_v14  ;;  %v6041_v5 = vunpack.i.h.bf16 %v8570_v23  ;;  %v6040_v42 = vunpack.i.l.bf16 %v8570_v23  ;;  %v1910_v50 = vsel %vm348_vm5, %v6200_v30, %v6201_v41  ;;  %v2517_v34 = vpack.c.bf16 %v8980_v10, %v8900_v0 }
 0x511   : > { %4901 = vmatpush3.bf16.msk.msra.mxu1 %vm7421_vm9, %v10651_v35  ;;  %v6261_v22 = vunpack.i.h.bf16 %v6259_v16  ;;  %v6260_v2 = vunpack.i.l.bf16 %v6259_v16  ;;  %v8991_v47 = vpop.permute.xlu1 %6218  ;;  %v6135_v40 = vunpack.i.l.bf16 %v8763_v55  ;;  %v10654_v35 = vld [vmem:[#allocation197_spill] sm:$0xff]  ;;  %v10655_v16 = vld [vmem:[#allocation198_spill] sm:$0xff]  ;;  %vm10677_vm4 = vcmask 941056  }
 0x512   : > { %4902 = vmatprep.subr.bf16.mxu1 %v2516_v52  ;;  %6473 = vrot.lane.b32.xlu0 %v6472_v18, %s6614_s26  ;;  %v4710_v14 = vpop.f32.mrb[20].mxu0  ;;  %v10653_v52 = vld [vmem:[#allocation43_spill] sm:$0xff]  ;;  %v10200_v18 = vunpack.i.h.bf16 %v8763_v55  ;;  %v10656_v41 = vpack.c.bf16 %v10654_v35, %v10655_v16  ;;  %v6050_v16 = vunpack.i.l.bf16 %v8617_v3 }
 0x513   : > { %v1911_v4 = vsel %vm348_vm5, %v6260_v2, %v6261_v22  ;;  %6468 = vrot.lane.b32.xlu1 %v8870_v49, %s6614_s26  ;;  %v4360_v7 = vcombine.high %v10653_v52, %v10652_v51  ;;  %v4711_v23 = vpop.f32.mrb[21].mxu0  ;;  %v9022_v22 = vsel %vm386_vm12, %v6035_v46, %v6036_v11  ;;  %v10658_v35 = vld [vmem:[#allocation63_spill] sm:$0xff]  ;;  %v9036_v11 = vsel %vm443_vm15, %v6040_v42, %v6041_v5  ;;  %vm10682_vm5 = vmmov %vm10677_vm4 }
 0x514   : > { %v2523_v21 = vpack.c.bf16 %v1911_v4, %v1910_v50  ;;  %v9017_v30 = vpop.permute.xlu0 %6263  ;;  %v9019_v49 = vadd.f32 %v4711_v23, %v4710_v14  ;;  %v4713_v0 = vpop.f32.mrb[22].mxu0  ;;  %v6076_v14 = vunpack.i.h.bf16 %v8733_v43  ;;  %v6075_v23 = vunpack.i.l.bf16 %v8733_v43 }
 0x515   : > { %4903 = vmatpush3.bf16.msk.msra.mxu1 %vm7421_vm9, %v10656_v41  ;;  %v9024_v2 = vpop.permute.xlu1 %6223  ;;  %v4714_v41 = vpop.f32.mrb[23].mxu0  ;;  %v6045_v4 = vunpack.i.l.bf16 %v8590_v31  ;;  %v6051_v50 = vunpack.i.h.bf16 %v8617_v3  ;;  %v10661_v43 = vcombine.low %v10644_v9, %v10644_v9  ;;  %v6255_v5 = vunpack.i.l.bf16 %v8951_v63  ;;  %vm10723_vm9 = vmmov %vm10646_vm2 }
 0x516   : > { %10657 = vst [vmem:[#allocation225_spill] sm:$0xff] %v9019_v49  ;;  %4904 = vmatprep.subr.bf16.mxu1 %v2517_v34  ;;  %6478 = vrot.lane.b32.xlu0 %v6477_v45, %s6614_s26  ;;  %v9038_v46 = vadd.f32 %v4714_v41, %v4713_v0  ;;  %v6046_v34 = vunpack.i.h.bf16 %v8590_v31  ;;  %v10202_v45 = vunpack.i.h.bf16 %v8951_v63  ;;  %v10662_v42 = vpack.c.bf16 %v10579_v60, %v10583_v53  ;;  %v10663_v53 = vld [vmem:[#allocation77_spill] sm:$0xff]  ;;  %v10664_v41 = vld [vmem:[#allocation70_spill] sm:$0xff]  ;;  %v10678_v49 = vld [vmem:[#allocation203_spill] sm:$0xff] }
 0x517   : > { %4971 = vmatpush3.bf16.msra.mxu0 %v2523_v21  ;;  %6483 = vrot.lane.b32.xlu1 %v7851_v8, %s6613_s25  ;;  %v1873_v3 = vsel %vm329_vm6, %v6135_v40, %v10200_v18  ;;  %v6196_v40 = vunpack.i.h.bf16 %v8894_v13  ;;  %v6195_v8 = vunpack.i.l.bf16 %v8894_v13  ;;  %v6056_v18 = vunpack.i.h.bf16 %v8644_v25 }
 0x518   : > { %10660 = vst [vmem:[#allocation208_spill] sm:$0xff] %v9038_v46  ;;  %3501 = vmatmul.mubr.bf16.gmra.mrb[84].mxu0 %v10661_v43  ;;  %v9054_v31 = vpop.permute.xlu0 %6278  ;;  %v9079_v60 = vsel %vm605_vm0, %v6045_v4, %v6046_v34  ;;  %v9082_v43 = vsel %vm462_vm7, %v6050_v16, %v6051_v50  ;;  %v9095_v4 = vsel %vm329_vm6, %v6255_v5, %v10202_v45  ;;  %v6031_v34 = vunpack.i.h.bf16 %v8646_v57 }
 0x519   : > { %4905 = vmatpush3.bf16.msra.mxu1 %v10662_v42  ;;  %3644 = vmatprep.mubr.bf16.mxu0 %v4360_v7  ;;  %v9061_v21 = vpop.permute.xlu1 %6228  ;;  %v1872_v7 = vsel %vm329_vm6, %v6075_v23, %v6076_v14  ;;  %v6055_v23 = vunpack.i.l.bf16 %v8644_v25  ;;  %v6030_v13 = vunpack.i.l.bf16 %v8646_v57  ;;  %v2511_v5 = vpack.c.bf16 %v8878_v26, %v8851_v12 }
 0x51a   : > { %4906 = vmatprep.subr.bf16.mxu1 %v2518_v56  ;;  %6488 = vrot.lane.b32.xlu0 %v7847_v1, %s6613_s25  ;;  %v2510_v56 = vpack.c.bf16 %v8753_v58, %v8756_v15  ;;  %v4716_v0 = vpop.f32.mrb[24].mxu0  ;;  %v2519_v42 = vpack.c.bf16 %v1873_v3, %v1872_v7  ;;  %v10665_v58 = vunpack.i.h.bf16 %v8915_v6  ;;  %v6507_v6 = vpack.i.bf16 %v6076_v14, %v1872_v7  ;;  %v10669_v7 = vld [vmem:[#allocation84_spill] sm:$0xff] }
 0x51b   : > { %6493 = vrot.lane.b32.xlu1 %v10571_v36, %s6611_s23  ;;  %v4717_v1 = vpop.f32.mrb[25].mxu0  ;;  %v6176_v26 = vunpack.i.h.bf16 %v8830_v29  ;;  %v9132_v12 = vsel %vm10671_vm3, %v6055_v23, %v6056_v18  ;;  %v6115_v45 = vunpack.i.l.bf16 %v8820_v28  ;;  %v10674_v23 = vld [vmem:[#allocation229_spill] sm:$0xff] }
 0x51c   : > { %v6497_v15 = vpack.i.bf16 %v10665_v58, %v8980_v10  ;;  %v9097_v50 = vpop.permute.xlu0 %6288  ;;  %v9099_v36 = vadd.f32 %v4717_v1, %v4716_v0  ;;  %v4719_v16 = vpop.f32.mrb[26].mxu0  ;;  %v1874_v0 = vsel %vm329_vm6, %v6195_v8, %v6196_v40  ;;  %v6175_v8 = vunpack.i.l.bf16 %v8830_v29  ;;  %vm10718_vm6 = vmmov %vm10677_vm4 }
 0x51d   : > { %4907 = vmatpush3.bf16.msra.mxu1 %v2510_v56  ;;  %v9104_v9 = vpop.permute.xlu1 %6233  ;;  %v4720_v10 = vpop.f32.mrb[27].mxu0  ;;  %v2520_v57 = vpack.c.bf16 %v9095_v4, %v1874_v0  ;;  %v6211_v58 = vunpack.i.h.bf16 %v8842_v48  ;;  %v6517_v14 = vpack.i.bf16 %v6196_v40, %v1874_v0  ;;  %v2051_v1 = vsel %vm424_vm14, %v6030_v13, %v6031_v34  ;;  %v10673_v0 = vld [vmem:[#allocation223_spill] sm:$0xff]  ;;  %v10675_v34 = vld [vmem:[#allocation228_spill] sm:$0xff] }
 0x51e   : > { %10666 = vst [vmem:[#allocation211_spill] sm:$0xff] %v9099_v36  ;;  %4908 = vmatprep.subr.bf16.mxu1 %v2519_v42  ;;  %6498 = vrot.lane.b32.xlu0 %v6497_v15, %s6614_s26  ;;  %v9112_v25 = vadd.f32 %v4720_v10, %v4719_v16  ;;  %v10668_v42 = vld [vmem:[#allocation91_spill] sm:$0xff]  ;;  %v6210_v15 = vunpack.i.l.bf16 %v8842_v48  ;;  %v6116_v29 = vunpack.i.h.bf16 %v8820_v28  ;;  %v6155_v13 = vunpack.i.l.bf16 %v10673_v0 }
 0x51f   : > { %6508 = vrot.lane.b32.xlu1 %v6507_v6, %s6614_s26  ;;  %v10670_v6 = vunpack.i.h.bf16 %v8763_v55  ;;  %v10672_v55 = vld [vmem:[#allocation205_spill] sm:$0xff]  ;;  %v10676_v28 = vpack.c.bf16 %v10674_v23, %v10675_v34  ;;  %v2197_v36 = vsel %vm10677_vm4, %v6175_v8, %v6176_v26  ;;  %v10679_v23 = vpack.c.bf16 %v9000_v33, %v8908_v39 }
 0x520   : > { %10667 = vst [vmem:[#allocation210_spill] sm:$0xff] %v9112_v25  ;;  %v9126_v16 = vpop.permute.xlu0 %6313  ;;  %v6145_v40 = vunpack.i.l.bf16 %v10672_v55  ;;  %v2196_v8 = vsel %vm10682_vm5, %v6115_v45, %v6116_v29  ;;  %v6265_v39 = vunpack.i.l.bf16 %v9017_v30 }
 0x521   : > { %4909 = vmatpush3.bf16.msra.mxu1 %v2511_v5  ;;  %v6512_v10 = vpack.i.bf16 %v10670_v6, %v1873_v3  ;;  %v6269_v56 = vpop.permute.xlu1 %6268  ;;  %v6146_v3 = vunpack.i.h.bf16 %v10672_v55  ;;  %v2546_v33 = vpack.c.bf16 %v2197_v36, %v2196_v8 }
 0x522   : > { %4910 = vmatprep.subr.bf16.mxu1 %v2520_v57  ;;  %v6271_v25 = vunpack.i.h.bf16 %v6269_v56  ;;  %v6270_v48 = vunpack.i.l.bf16 %v6269_v56  ;;  %6503 = vrot.lane.b32.xlu0 %v7833_v38, %s6611_s23  ;;  %v4722_v5 = vpop.f32.mrb[28].mxu0  ;;  %v6156_v57 = vunpack.i.h.bf16 %v10673_v0  ;;  %v2018_v38 = vsel %vm405_vm13, %v6210_v15, %v6211_v58 }
 0x523   : > { %6518 = vrot.lane.b32.xlu1 %v6517_v14, %s6614_s26  ;;  %v4723_v18 = vpop.f32.mrb[29].mxu0  ;;  %v6086_v0 = vunpack.i.h.bf16 %v10678_v49  ;;  %v6085_v14 = vunpack.i.l.bf16 %v10678_v49  ;;  %v1945_v49 = vsel %vm367_vm8, %v6145_v40, %v6146_v3  ;;  %v10689_v40 = vld [vmem:[#allocation64_spill] sm:$0xff] }
 0x524   : > { %v9146_v56 = vpop.permute.xlu0 %6323  ;;  %v2019_v6 = vsel %vm405_vm13, %v6270_v48, %v6271_v25  ;;  %v9151_v55 = vadd.f32 %v4723_v18, %v4722_v5  ;;  %v4725_v46 = vpop.f32.mrb[30].mxu0  ;;  %v10681_v25 = vld [vmem:[#allocation202_spill] sm:$0xff]  ;;  %v6266_v18 = vunpack.i.h.bf16 %v9017_v30  ;;  %v2053_v30 = vsel %vm424_vm14, %v6155_v13, %v6156_v57  ;;  %vm10734_vm13 = vmmov %vm10646_vm2 }
 0x525   : > { %4911 = vmatpush3.bf16.msra.mxu1 %v10676_v28  ;;  %v9155_v20 = vpop.permute.xlu1 %6273  ;;  %v2532_v34 = vpack.c.bf16 %v2019_v6, %v2018_v38  ;;  %v10680_v28 = vld [vmem:[#allocation226_spill] sm:$0xff]  ;;  %v4726_v15 = vpop.f32.mrb[31].mxu0  ;;  %v6096_v48 = vunpack.i.h.bf16 %v10681_v25  ;;  %v6095_v26 = vunpack.i.l.bf16 %v10681_v25  ;;  %v10684_v38 = vunpack.i.h.bf16 %v8951_v63 }
 0x526   : > { %4912 = vmatprep.subr.bf16.mxu1 %v10679_v23  ;;  %v2533_v58 = vpack.c.bf16 %v2051_v1, %v10680_v28  ;;  %6513 = vrot.lane.b32.xlu0 %v6512_v10, %s6614_s26  ;;  %v9165_v5 = vadd.f32 %v4726_v15, %v4725_v46  ;;  %v10683_v1 = vld [vmem:[#allocation158_spill] sm:$0xff]  ;;  %v10685_v23 = vld [vmem:[#allocation221_spill] sm:$0xff]  ;;  %v10686_v10 = vld [vmem:[#allocation216_spill] sm:$0xff]  ;;  %v10688_v46 = vpack.c.bf16 %v8994_v37, %v8911_v44  ;;  %v6206_v63 = vunpack.i.h.bf16 %v8956_v32 }
 0x527   : > { %4972 = vmatprep.subr.bf16.mxu0 %v2532_v34  ;;  %3926 = vperm.xlu1 %6527, %v10683_v1   ;;  %v6522_v6 = vpack.i.bf16 %v10684_v38, %v9095_v4  ;;  %v10687_v28 = vpack.c.bf16 %v10685_v23, %v10686_v10  ;;  %v1944_v29 = vsel %vm367_vm8, %v6085_v14, %v6086_v0  ;;  %v6205_v4 = vunpack.i.l.bf16 %v8956_v32  ;;  %v10690_v44 = vld [vmem:[#allocation57_spill] sm:$0xff]  ;;  %v10692_v14 = vld [vmem:[#allocation98_spill] sm:$0xff]  ;;  %v10693_v32 = vld [vmem:[#allocation200_spill] sm:$0xff] }
 0x528   : > { %4973 = vmatpush3.bf16.msra.mxu0 %v10688_v46  ;;  %v9180_v45 = vpop.permute.xlu0 %6333  ;;  %v2525_v34 = vpack.c.bf16 %v1945_v49, %v1944_v29  ;;  %v2052_v57 = vsel %vm424_vm14, %v6095_v26, %v6096_v48  ;;  %v10691_v0 = vld [vmem:[#allocation105_spill] sm:$0xff]  ;;  %v6161_v8 = vunpack.i.h.bf16 %v10693_v32  ;;  %v10695_v26 = vld [vmem:[#allocation160_spill] sm:$0xff]  ;;  %v6160_v38 = vunpack.i.l.bf16 %v10693_v32 }
 0x529   : > { %4913 = vmatpush3.bf16.msra.mxu1 %v10687_v28  ;;  %v9188_v3 = vpop.permute.xlu1 %6283  ;;  %4974 = vmatprep.subr.bf16.mxu0 %v2533_v58  ;;  %v1947_v58 = vsel %vm367_vm8, %v6265_v39, %v6266_v18  ;;  %v2534_v1 = vpack.c.bf16 %v2053_v30, %v2052_v57  ;;  %v10697_v18 = vcombine.high %v10659_v62, %v10658_v35  ;;  %v10699_v30 = vld [vmem:[#allocation204_spill] sm:$0xff]  ;;  %v10700_v57 = vld [vmem:[#allocation201_spill] sm:$0xff] }
 0x52a   : > { %5038 = vmatprep.subr.bf16.mxu1 %v2546_v33  ;;  %6523 = vrot.lane.b32.xlu0 %v6522_v6, %s6614_s26  ;;  %v4728_v25 = vpop.f32.mrb[32].mxu0  ;;  %v10694_v33 = vcombine.low %v10629_v61, %v10628_v59  ;;  %v10696_v6 = vld [vmem:[#allocation207_spill] sm:$0xff]  ;;  %v6101_v29 = vunpack.i.h.bf16 %v10699_v30  ;;  %v6165_v32 = vunpack.i.l.bf16 %v10700_v57 }
 0x52b   : > { %v4729_v48 = vpop.f32.mrb[33].mxu0  ;;  %3936 = vperm.xlu1 %6527, %v10695_v26   ;;  %v6216_v23 = vunpack.i.h.bf16 %v10696_v6  ;;  %v6215_v10 = vunpack.i.l.bf16 %v10696_v6  ;;  %v1946_v26 = vsel %vm367_vm8, %v6205_v4, %v6206_v63  ;;  %v10703_v61 = vld [vmem:[#allocation199_spill] sm:$0xff]  ;;  %v1981_v63 = vsel %vm386_vm12, %v6160_v38, %v6161_v8  ;;  %vm10719_vm8 = vmmov %vm10677_vm4 }
 0x52c   : > { %3541 = vmatmul.mubr.bf16.vlgmr.msra.gmra.mrb[92].mxu1 %v10694_v33  ;;  %4975 = vmatpush3.bf16.msra.mxu0 %v2525_v34  ;;  %v9209_v28 = vpop.permute.xlu0 %6338  ;;  %v9214_v39 = vadd.f32 %v4729_v48, %v4728_v25  ;;  %v4731_v46 = vpop.f32.mrb[34].mxu0  ;;  %v6166_v33 = vunpack.i.h.bf16 %v10700_v57  ;;  %v2526_v6 = vpack.c.bf16 %v1947_v58, %v1946_v26  ;;  %v6100_v25 = vunpack.i.l.bf16 %v10699_v30  ;;  %v10702_v48 = vld [vmem:[#allocation206_spill] sm:$0xff] }
 0x52d   : > { %3548 = vmatprep.mubr.bf16.mxu1 %v10697_v18  ;;  %v6294_v49 = vpop.permute.xlu1 %6293  ;;  %4976 = vmatprep.subr.bf16.mxu0 %v2534_v1  ;;  %v4732_v34 = vpop.f32.mrb[35].mxu0  ;;  %v10701_v18 = vld [vmem:[#allocation159_spill] sm:$0xff]  ;;  %v6106_v36 = vunpack.i.h.bf16 %v10702_v48  ;;  %v6105_v59 = vunpack.i.l.bf16 %v10702_v48  ;;  %v6111_v57 = vunpack.i.h.bf16 %v10703_v61  ;;  %v6110_v4 = vunpack.i.l.bf16 %v10703_v61 }
 0x52e   : > { %10698 = vst [vmem:[#allocation227_spill] sm:$0xff] %v9214_v39  ;;  %v6296_v13 = vunpack.i.h.bf16 %v6294_v49  ;;  %v6295_v15 = vunpack.i.l.bf16 %v6294_v49  ;;  %v9220_v37 = vadd.f32 %v4732_v34, %v4731_v46  ;;  %3931 = vperm.xlu0 %6528, %v10701_v18   ;;  %v10704_v39 = vld [vmem:[#allocation161_spill] sm:$0xff]  ;;  %v2054_v1 = vsel %vm424_vm14, %v6215_v10, %v6216_v23  ;;  %v10705_v46 = vld [vmem:[#allocation218_spill] sm:$0xff] }
 0x52f   : > { %3941 = vperm.xlu1 %6527, %v10704_v39   ;;  %v6171_v30 = vunpack.i.h.bf16 %v10705_v46  ;;  %v6170_v26 = vunpack.i.l.bf16 %v10705_v46  ;;  %v2089_v39 = vsel %vm443_vm15, %v6165_v32, %v6166_v33  ;;  %v6221_v8 = vunpack.i.h.bf16 %v8991_v47  ;;  %v10706_v10 = vld [vmem:[#allocation162_spill] sm:$0xff] }
 0x530   : > { %4977 = vmatpush3.bf16.msra.mxu0 %v2526_v6  ;;  %v9230_v58 = vpop.permute.xlu0 %6343  ;;  %v2055_v49 = vsel %vm424_vm14, %v6295_v15, %v6296_v13  ;;  %v6220_v61 = vunpack.i.l.bf16 %v8991_v47  ;;  %v6231_v38 = vunpack.i.h.bf16 %v9061_v21  ;;  %v6230_v6 = vunpack.i.l.bf16 %v9061_v21  ;;  %v10708_v32 = vld [vmem:[#allocation78_spill] sm:$0xff]  ;;  %v10709_v47 = vld [vmem:[#allocation71_spill] sm:$0xff]  ;;  %vm10735_vm14 = vmmov %vm10646_vm2 }
 0x531   : > { %v9236_v34 = vpop.permute.xlu1 %6298  ;;  %v2535_v18 = vpack.c.bf16 %v2055_v49, %v2054_v1  ;;  %v1980_v13 = vsel %vm386_vm12, %v6100_v25, %v6101_v29  ;;  %v6341_v15 = vunpack.i.h.bf16 %v9209_v28  ;;  %v6340_v48 = vunpack.i.l.bf16 %v9209_v28 }
 0x532   : > { %v4734_v23 = vpop.f32.mrb[36].mxu0  ;;  %3946 = vperm.xlu0 %6528, %v10706_v10   ;;  %v10707_v33 = vcombine.low %v10659_v62, %v10658_v35  ;;  %v9253_v21 = vsel %vm605_vm0, %v6110_v4, %v6111_v57  ;;  %v10710_v46 = vpack.c.bf16 %v9022_v22, %v8918_v54  ;;  %v2088_v25 = vsel %vm443_vm15, %v6105_v59, %v6106_v36 }
 0x533   : > { %4978 = vmatprep.subr.bf16.mxu0 %v2535_v18  ;;  %v4735_v49 = vpop.f32.mrb[37].mxu0  ;;  %v10711_v28 = vcombine.high %v10664_v41, %v10663_v53  ;;  %v10712_v57 = vpack.c.bf16 %v9036_v11, %v8931_v17  ;;  %v2528_v54 = vpack.c.bf16 %v1981_v63, %v1980_v13  ;;  %v2537_v22 = vpack.c.bf16 %v2089_v39, %v2088_v25 }
 0x534   : > { %3549 = vmatmul.mubr.bf16.gmra.mrb[96].mxu1 %v10707_v33  ;;  %4979 = vmatpush3.bf16.msra.mxu0 %v10710_v46  ;;  %v6349_v29 = vpop.permute.xlu0 %6348  ;;  %v9262_v10 = vadd.f32 %v4735_v49, %v4734_v23  ;;  %v4737_v18 = vpop.f32.mrb[38].mxu0  ;;  %v10713_v46 = vld [vmem:[#allocation163_spill] sm:$0xff]  ;;  %v9271_v59 = vsel %vm605_vm0, %v6170_v26, %v6171_v30  ;;  %v1982_v36 = vsel %vm386_vm12, %v6220_v61, %v6221_v8  ;;  %v6235_v17 = vunpack.i.l.bf16 %v9104_v9 }
 0x535   : > { %3556 = vmatprep.mubr.bf16.mxu1 %v10711_v28  ;;  %v6351_v33 = vunpack.i.h.bf16 %v6349_v29  ;;  %v6350_v1 = vunpack.i.l.bf16 %v6349_v29  ;;  %v9264_v35 = vpop.permute.xlu1 %6303  ;;  %4980 = vmatprep.subr.bf16.mxu0 %v10712_v57  ;;  %v4738_v4 = vpop.f32.mrb[39].mxu0  ;;  %v2090_v23 = vsel %vm443_vm15, %v6230_v6, %v6231_v38  ;;  %v10714_v29 = vld [vmem:[#allocation164_spill] sm:$0xff]  ;;  %v6236_v28 = vunpack.i.h.bf16 %v9104_v9 }
 0x536   : > { %3951 = vperm.xlu1 %6527, %v10713_v46   ;;  %v9275_v49 = vadd.f32 %v4738_v4, %v4737_v18  ;;  %3956 = vperm.xlu0 %6528, %v10714_v29   ;;  %v1983_v11 = vsel %vm386_vm12, %v6340_v48, %v6341_v15  ;;  %v6226_v39 = vunpack.i.h.bf16 %v9024_v2  ;;  %v6225_v30 = vunpack.i.l.bf16 %v9024_v2  ;;  %v10715_v15 = vld [vmem:[#allocation165_spill] sm:$0xff]  ;;  %vm10729_vm12 = vmmov %vm10646_vm2 }
 0x537   : > { %v2091_v63 = vsel %vm443_vm15, %v6350_v1, %v6351_v33  ;;  %v6281_v26 = vunpack.i.h.bf16 %v9054_v31  ;;  %v6280_v38 = vunpack.i.l.bf16 %v9054_v31  ;;  %v6291_v6 = vunpack.i.h.bf16 %v9097_v50  ;;  %v10716_v33 = vld [vmem:[#allocation166_spill] sm:$0xff] }
 0x538   : > { %v2538_v8 = vpack.c.bf16 %v2091_v63, %v2090_v23  ;;  %4981 = vmatpush3.bf16.msra.mxu0 %v2528_v54  ;;  %v6354_v61 = vpop.permute.xlu0 %6353  ;;  %v6290_v48 = vunpack.i.l.bf16 %v9097_v50  ;;  %v6276_v2 = vunpack.i.h.bf16 %v9155_v20  ;;  %v6275_v1 = vunpack.i.l.bf16 %v9155_v20 }
 0x539   : > { %v6356_v13 = vunpack.i.h.bf16 %v6354_v61  ;;  %v6355_v25 = vunpack.i.l.bf16 %v6354_v61  ;;  %v9287_v9 = vpop.permute.xlu1 %6308  ;;  %4982 = vmatprep.subr.bf16.mxu0 %v2537_v22  ;;  %v2529_v18 = vpack.c.bf16 %v1983_v11, %v1982_v36  ;;  %v6286_v31 = vunpack.i.h.bf16 %v9188_v3 }
 0x53a   : > { %3961 = vperm.xlu1 %6527, %v10715_v15   ;;  %5039 = vmatpush3.bf16.msra.mxu1 %v2538_v8  ;;  %v10717_v57 = vcombine.low %v10664_v41, %v10663_v53  ;;  %v2198_v54 = vsel %vm10718_vm6, %v6235_v17, %v6236_v28  ;;  %v2555_v50 = vpack.c.bf16 %v9271_v59, %v9253_v21  ;;  %v4740_v4 = vpop.f32.mrb[40].mxu0  ;;  %v6285_v20 = vunpack.i.l.bf16 %v9188_v3  ;;  %v10722_v8 = vld [vmem:[#allocation167_spill] sm:$0xff] }
 0x53b   : > { %3966 = vperm.xlu0 %6528, %v10716_v33   ;;  %v2199_v22 = vsel %vm10719_vm8, %v6355_v25, %v6356_v13  ;;  %v6346_v46 = vunpack.i.h.bf16 %v9230_v58  ;;  %v6345_v36 = vunpack.i.l.bf16 %v9230_v58  ;;  %v10720_v11 = vcombine.high %v10669_v7, %v10668_v42  ;;  %v4741_v28 = vpop.f32.mrb[41].mxu0 }
 0x53c   : > { %3557 = vmatmul.mubr.bf16.gmra.mrb[100].mxu1 %v10717_v57  ;;  %4983 = vmatpush3.bf16.msra.mxu0 %v2529_v18  ;;  %v6359_v23 = vpop.permute.xlu0 %6358  ;;  %v2547_v29 = vpack.c.bf16 %v2199_v22, %v2198_v54  ;;  %v9309_v17 = vsel %vm605_vm0, %v6225_v30, %v6226_v39  ;;  %v2125_v21 = vsel %vm462_vm7, %v6280_v38, %v6281_v26  ;;  %v10721_v3 = vmov 0   ;;  %v4743_v58 = vpop.f32.mrb[42].mxu0  ;;  %v10724_v26 = vld [vmem:[#allocation168_spill] sm:$0xff] }
 0x53d   : > { %3564 = vmatprep.mubr.bf16.mxu1 %v10720_v11  ;;  %v9312_v59 = vpop.permute.xlu1 %6318  ;;  %3820 = vmatprep.subr.bf16.mxu0 %v10721_v3  ;;  %v9315_v63 = vadd.f32 %v4741_v28, %v4740_v4  ;;  %v6316_v61 = vunpack.i.h.bf16 %v9126_v16  ;;  %v2124_v13 = vsel %vm462_vm7, %v6275_v1, %v6276_v2  ;;  %v6301_v25 = vunpack.i.h.bf16 %v9236_v34  ;;  %v4744_v30 = vpop.f32.mrb[43].mxu0 }
 0x53e   : > { %3971 = vperm.xlu1 %6527, %v10722_v8   ;;  %5040 = vmatprep.subr.bf16.mxu1 %v2547_v29  ;;  %v2233_v39 = vsel %vm10723_vm9, %v6290_v48, %v6291_v6  ;;  %v6300_v38 = vunpack.i.l.bf16 %v9236_v34  ;;  %v6361_v15 = vunpack.i.h.bf16 %v6359_v23  ;;  %v6360_v18 = vunpack.i.l.bf16 %v6359_v23 }
 0x53f   : > { %3976 = vperm.xlu0 %6528, %v10724_v26   ;;  %v10725_v33 = vcombine.low %v10653_v52, %v10652_v51  ;;  %v10726_v57 = vpack.c.bf16 %v9082_v43, %v8934_v27  ;;  %v9330_v2 = vadd.f32 %v4744_v30, %v4743_v58  ;;  %v2403_v1 = vsel %vm605_vm0, %v6345_v36, %v6346_v46 }
 0x540   : > { %v6306_v6 = vunpack.i.h.bf16 %v9264_v35  ;;  %v6305_v48 = vunpack.i.l.bf16 %v9264_v35  ;;  %v10727_v34 = vpack.c.bf16 %v9079_v60, %v8924_v24  ;;  %v6364_v54 = vpop.permute.xlu0 %6363  ;;  %v10728_v22 = vpack.c.bf16 %v9132_v12, %v8963_v19 }
 0x541   : > { %3645 = vmatmul.mubr.bf16.vlgmr.msra.gmra.mrb[88].mxu0 %v10725_v33  ;;  %5041 = vmatpush3.bf16.msra.mxu1 %v10726_v57  ;;  %v2232_v27 = vsel %vm10729_vm12, %v6285_v20, %v6286_v31  ;;  %v6311_v43 = vunpack.i.h.bf16 %v9287_v9  ;;  %v6310_v4 = vunpack.i.l.bf16 %v9287_v9  ;;  %v6366_v46 = vunpack.i.h.bf16 %v6364_v54  ;;  %v9344_v23 = vpop.permute.xlu1 %6328  ;;  %v10731_v31 = vld [vmem:[#allocation169_spill] sm:$0xff]  ;;  %v10732_v9 = vld [vmem:[#allocation170_spill] sm:$0xff] }
 0x542   : > { %3821 = vmatpush1.bf16.msra.mxu0 %v10727_v34  ;;  %5042 = vmatprep.subr.bf16.mxu1 %v10728_v22  ;;  %v6365_v36 = vunpack.i.l.bf16 %v6364_v54  ;;  %v10730_v24 = vcombine.high %v10690_v44, %v10689_v40  ;;  %v6315_v35 = vunpack.i.l.bf16 %v9126_v16  ;;  %v6326_v19 = vunpack.i.h.bf16 %v9146_v56  ;;  %v4746_v8 = vpop.f32.mrb[44].mxu0  ;;  %v10738_v34 = vld [vmem:[#allocation171_spill] sm:$0xff]  ;;  %v10747_v16 = vld [vmem:[#allocation173_spill] sm:$0xff] }
 0x543   : > { %3822 = vmatprep.subr.bf16.mxu0 %v10721_v3  ;;  %v6325_v60 = vunpack.i.l.bf16 %v9146_v56  ;;  %v2540_v12 = vpack.c.bf16 %v2125_v21, %v2124_v13  ;;  %3981 = vperm.xlu1 %6527, %v10731_v31   ;;  %v2556_v20 = vpack.c.bf16 %v2403_v1, %v9309_v17  ;;  %v2126_v29 = vsel %vm462_vm7, %v6300_v38, %v6301_v25  ;;  %v4747_v25 = vpop.f32.mrb[45].mxu0  ;;  %v10743_v31 = vld [vmem:[#allocation112_spill] sm:$0xff] }
 0x544   : > { %3652 = vmatprep.mubr.bf16.mxu0 %v10730_v24  ;;  %3986 = vperm.xlu0 %6528, %v10732_v9   ;;  %v2127_v11 = vsel %vm462_vm7, %v6360_v18, %v6361_v15  ;;  %v10733_v28 = vcombine.low %v10669_v7, %v10668_v42  ;;  %v2549_v58 = vpack.c.bf16 %v2233_v39, %v2232_v27  ;;  %v6321_v30 = vunpack.i.h.bf16 %v9312_v59  ;;  %v6384_v21 = vpop.permute.xlu0 %6383  ;;  %v4749_v33 = vpop.f32.mrb[46].mxu0 }
 0x545   : > { %v6320_v56 = vunpack.i.l.bf16 %v9312_v59  ;;  %5043 = vmatpush3.bf16.msra.mxu1 %v2540_v12  ;;  %v2234_v13 = vsel %vm10734_vm13, %v6305_v48, %v6306_v6  ;;  %v2235_v17 = vsel %vm10735_vm14, %v6365_v36, %v6366_v46  ;;  %vm10736_vm15 = vcmask 949248   ;;  %v6369_v18 = vpop.permute.xlu1 %6368  ;;  %v4750_v48 = vpop.f32.mrb[47].mxu0  ;;  %v10740_v46 = vld [vmem:[#allocation172_spill] sm:$0xff] }
 0x546   : > { %3565 = vmatmul.mubr.bf16.gmra.mrb[104].mxu1 %v10733_v28  ;;  %3823 = vmatpush1.bf16.msra.mxu0 %v2555_v50  ;;  %v2158_v26 = vsel %vm10736_vm15, %v6310_v4, %v6311_v43  ;;  %v6386_v38 = vunpack.i.h.bf16 %v6384_v21  ;;  %v6385_v15 = vunpack.i.l.bf16 %v6384_v21  ;;  %v9367_v39 = vadd.f32 %v4747_v25, %v4746_v8  ;;  %vm10744_vm11 = vmmov %vm10736_vm15  ;;  %v10752_v25 = vld [vmem:[#allocation85_spill] sm:$0xff] }
 0x547   : > { %5044 = vmatprep.subr.bf16.mxu1 %v2549_v58  ;;  %3824 = vmatprep.subr.bf16.mxu0 %v10721_v3  ;;  %v2541_v59 = vpack.c.bf16 %v2127_v11, %v2126_v29  ;;  %v6331_v50 = vunpack.i.h.bf16 %v9344_v23  ;;  %v6371_v57 = vunpack.i.h.bf16 %v6369_v18  ;;  %v6370_v1 = vunpack.i.l.bf16 %v6369_v18  ;;  %vm10748_vm10 = vmmov %vm10744_vm11 }
 0x548   : > { %v10737_v6 = vcombine.high %v10692_v14, %v10691_v0  ;;  %3991 = vperm.xlu1 %6527, %v10738_v34   ;;  %v6330_v54 = vunpack.i.l.bf16 %v9344_v23  ;;  %v2405_v22 = vsel %vm605_vm0, %v6385_v15, %v6386_v38  ;;  %v10739_v27 = vcombine.low %v10690_v44, %v10689_v40  ;;  %3996 = vperm.xlu0 %6528, %v10740_v46   ;;  %v9383_v24 = vpop.permute.xlu0 %6388  ;;  %v10742_v23 = vld [vmem:[#allocation119_spill] sm:$0xff]  ;;  %vm10753_vm2 = vmmov %vm10748_vm10 }
 0x549   : > { %v2550_v43 = vpack.c.bf16 %v2235_v17, %v2234_v13  ;;  %v9379_v4 = vadd.f32 %v4750_v48, %v4749_v33  ;;  %v2404_v36 = vsel %vm605_vm0, %v6370_v1, %v6371_v57  ;;  %5045 = vmatpush3.bf16.msra.mxu1 %v2541_v59  ;;  %vm10741_vm7 = vcmask 924672   ;;  %v9393_v8 = vpop.permute.xlu1 %6373  ;;  %v10750_v17 = vld [vmem:[#allocation174_spill] sm:$0xff]  ;;  %v10754_v1 = vld [vmem:[#allocation175_spill] sm:$0xff]  ;;  %v10755_v48 = vld [vmem:[#allocation176_spill] sm:$0xff] }
 0x54a   : > { %3572 = vmatprep.mubr.bf16.mxu1 %v10737_v6  ;;  %3653 = vmatmul.mubr.bf16.gmra.mrb[92].mxu0 %v10739_v27  ;;  %v2266_v12 = vsel %vm10741_vm7, %v6320_v56, %v6321_v30  ;;  %v4428_v9 = vcombine.high %v10743_v31, %v10742_v23  ;;  %v2159_v29 = vsel %vm10744_vm11, %v6315_v35, %v6316_v61  ;;  %v6336_v11 = vunpack.i.h.bf16 %v9180_v45  ;;  %vm10745_vm1 = vmmov %vm10741_vm7  ;;  %v4752_v13 = vpop.f32.mrb[48].mxu0 }
 0x54b   : > { %3825 = vmatpush1.bf16.msra.mxu0 %v2556_v20  ;;  %v6335_v28 = vunpack.i.l.bf16 %v9180_v45  ;;  %v2557_v58 = vpack.c.bf16 %v2405_v22, %v2404_v36  ;;  %5046 = vmatprep.subr.bf16.mxu1 %v2550_v43  ;;  %v2542_v20 = vpack.c.bf16 %v2159_v29, %v2158_v26  ;;  %v2267_v30 = vsel %vm10745_vm1, %v6325_v60, %v6326_v19  ;;  %v10751_v60 = vld [vmem:[#allocation92_spill] sm:$0xff]  ;;  %v4753_v38 = vpop.f32.mrb[49].mxu0  ;;  %v10757_v22 = vld [vmem:[#allocation126_spill] sm:$0xff]  ;;  %v10758_v29 = vld [vmem:[#allocation177_spill] sm:$0xff] }
 0x54c   : > { %3826 = vmatprep.subr.bf16.mxu0 %v10721_v3  ;;  %v10746_v56 = vcombine.high %v10709_v47, %v10708_v32  ;;  %4001 = vperm.xlu1 %6527, %v10747_v16   ;;  %v2160_v61 = vsel %vm10748_vm10, %v6330_v54, %v6331_v50  ;;  %v10749_v45 = vcombine.low %v10692_v14, %v10691_v0  ;;  %v9408_v19 = vpop.permute.xlu0 %6393  ;;  %v4755_v59 = vpop.f32.mrb[50].mxu0  ;;  %v10756_v54 = vld [vmem:[#allocation133_spill] sm:$0xff]  ;;  %v10787_v14 = vld [vmem:[#allocation52_spill] sm:$0xff]  ;;  %vm10789_vm3 = vmmov %vm10745_vm1  ;;  %vm10796_vm12 = vcmask 941056  }
 0x54d   : > { %v2551_v35 = vpack.c.bf16 %v2267_v30, %v2266_v12  ;;  %v4387_v21 = vcombine.low %v10709_v47, %v10708_v32  ;;  %4006 = vperm.xlu0 %6528, %v10750_v17   ;;  %5047 = vmatpush3.bf16.msra.mxu1 %v2542_v20  ;;  %v4402_v26 = vcombine.high %v10752_v25, %v10751_v60  ;;  %v9413_v18 = vpop.permute.xlu1 %6378  ;;  %v4756_v57 = vpop.f32.mrb[51].mxu0  ;;  %v10760_v30 = vld [vmem:[#allocation106_spill] sm:$0xff]  ;;  %v10765_v17 = vld [vmem:[#allocation140_spill] sm:$0xff]  ;;  %vm10790_vm4 = vmmov %vm10745_vm1 }
 0x54e   : > { %3660 = vmatprep.mubr.bf16.mxu0 %v10746_v56  ;;  %3573 = vmatmul.mubr.bf16.gmra.mrb[108].mxu1 %v10749_v45  ;;  %v2161_v15 = vsel %vm10753_vm2, %v6335_v28, %v6336_v11  ;;  %v9415_v33 = vadd.f32 %v4753_v38, %v4752_v13  ;;  %v4427_v6 = vcombine.low %v10743_v31, %v10742_v23  ;;  %v10761_v56 = vld [vmem:[#allocation99_spill] sm:$0xff]  ;;  %v10766_v38 = vld [vmem:[#allocation181_spill] sm:$0xff]  ;;  %v10767_v59 = vld [vmem:[#allocation182_spill] sm:$0xff] }
 0x54f   : > { %3827 = vmatpush1.bf16.msra.mxu0 %v2557_v58  ;;  %5048 = vmatprep.subr.bf16.mxu1 %v2551_v35  ;;  %v2543_v50 = vpack.c.bf16 %v2161_v15, %v2160_v61  ;;  %v4442_v27 = vcombine.high %v10757_v22, %v10756_v54  ;;  %v4401_v28 = vcombine.low %v10752_v25, %v10751_v60  ;;  %v10759_v58 = vld [vmem:[#allocation178_spill] sm:$0xff]  ;;  %v10762_v45 = vld [vmem:[#allocation179_spill] sm:$0xff]  ;;  %v10769_v57 = vld [vmem:[#allocation113_spill] sm:$0xff] }
 0x550   : > { %3580 = vmatprep.mubr.bf16.mxu1 %v4428_v9  ;;  %3828 = vmatprep.subr.bf16.mxu0 %v10721_v3  ;;  %v6414_v34 = vpop.permute.xlu0 %6413  ;;  %v4416_v16 = vcombine.high %v10761_v56, %v10760_v30  ;;  %v4441_v35 = vcombine.low %v10757_v22, %v10756_v54  ;;  %v10764_v13 = vld [vmem:[#allocation147_spill] sm:$0xff]  ;;  %v4415_v15 = vcombine.low %v10761_v56, %v10760_v30  ;;  %vm10791_vm5 = vmmov %vm10753_vm2 }
 0x551   : > { %4028 = vperm.xlu1 %6527, %v10754_v1   ;;  %4033 = vperm.xlu0 %6528, %v10755_v48   ;;  %v6416_v43 = vunpack.i.h.bf16 %v6414_v34  ;;  %v6415_v46 = vunpack.i.l.bf16 %v6414_v34  ;;  %v6399_v36 = vpop.permute.xlu1 %6398  ;;  %v4455_v48 = vcombine.low %v10765_v17, %v10764_v13  ;;  %v10771_v34 = vld [vmem:[#allocation184_spill] sm:$0xff]  ;;  %vm10792_vm6 = vmmov %vm10753_vm2 }
 0x552   : > { %3661 = vmatmul.mubr.bf16.gmra.mrb[96].mxu0 %v4387_v21  ;;  %5049 = vmatpush3.bf16.msra.mxu1 %v2543_v50  ;;  %v6401_v12 = vunpack.i.h.bf16 %v6399_v36  ;;  %v6400_v9 = vunpack.i.l.bf16 %v6399_v36  ;;  %v10763_v21 = vld [vmem:[#allocation180_spill] sm:$0xff]  ;;  %vm10793_vm8 = vmmov %vm10745_vm1 }
 0x553   : > { %3668 = vmatprep.mubr.bf16.mxu0 %v4402_v26  ;;  %v2407_v11 = vsel %vm605_vm0, %v6415_v46, %v6416_v43  ;;  %v4456_v26 = vcombine.high %v10765_v17, %v10764_v13  ;;  %v10768_v50 = vld [vmem:[#allocation120_spill] sm:$0xff]  ;;  %v10773_v46 = vld [vmem:[#allocation185_spill] sm:$0xff]  ;;  %vm10794_vm9 = vmmov %vm10745_vm1 }
 0x554   : > { %v2406_v20 = vsel %vm605_vm0, %v6400_v9, %v6401_v12  ;;  %v4430_v1 = vcombine.high %v10769_v57, %v10768_v50  ;;  %v4429_v36 = vcombine.low %v10769_v57, %v10768_v50  ;;  %v10774_v12 = vld [vmem:[#allocation186_spill] sm:$0xff]  ;;  %vm10797_vm13 = vmmov %vm10796_vm12 }
 0x555   : > { %4038 = vperm.xlu1 %6527, %v10758_v29   ;;  %4043 = vperm.xlu0 %6528, %v10759_v58   ;;  %v2558_v61 = vpack.c.bf16 %v2407_v11, %v2406_v20  ;;  %v10775_v9 = vld [vmem:[#allocation134_spill] sm:$0xff]  ;;  %v10776_v29 = vld [vmem:[#allocation127_spill] sm:$0xff]  ;;  %v9458_v58 = vpop.permute.xlu1 %6403 }
 0x556   : > { %3581 = vmatmul.mubr.bf16.gmra.mrb[112].mxu1 %v4427_v6  ;;  %v10770_v6 = vld [vmem:[#allocation183_spill] sm:$0xff]  ;;  %v4444_v11 = vcombine.high %v10776_v29, %v10775_v9 }
 0x557   : > { %3588 = vmatprep.mubr.bf16.mxu1 %v4442_v27  ;;  %3829 = vmatpush1.bf16.msra.mxu0 %v2558_v61  ;;  %v10772_v27 = vld [vmem:[#allocation154_spill] sm:$0xff]  ;;  %v10779_v61 = vld [vmem:[#allocation51_spill] sm:$0xff] }
 0x558   : > { %3830 = vmatprep.subr.bf16.mxu0 %v10721_v3  ;;  %v4470_v43 = vcombine.high %v10772_v27, %v10772_v27  ;;  %v4469_v20 = vcombine.low %v10772_v27, %v10772_v27 }
 0x559   : > { %4048 = vperm.xlu1 %6527, %v10762_v45   ;;  %4053 = vperm.xlu0 %6528, %v10763_v21   ;;  %v10780_v45 = vld [vmem:[#allocation44_spill] sm:$0xff]  ;;  %v10781_v21 = vld [vmem:[#allocation189_spill] sm:$0xff] }
 0x55a   : > { %3669 = vmatmul.mubr.bf16.gmra.mrb[100].mxu0 %v4401_v28  ;;  %v10777_v28 = vld [vmem:[#allocation187_spill] sm:$0xff] }
 0x55b   : > { %3676 = vmatprep.mubr.bf16.mxu0 %v4416_v16  ;;  %v10778_v16 = vld [vmem:[#allocation188_spill] sm:$0xff] }
 0x55d   : > { %4058 = vperm.xlu1 %6527, %v10766_v38   ;;  %4063 = vperm.xlu0 %6528, %v10767_v59   ;;  %v10782_v38 = vld [vmem:[#allocation190_spill] sm:$0xff]  ;;  %v10784_v59 = vld [vmem:[#allocation141_spill] sm:$0xff] }
 0x55e   : > { %3589 = vmatmul.mubr.bf16.gmra.mrb[116].mxu1 %v4441_v35  ;;  %v4362_v35 = vcombine.high %v10780_v45, %v10779_v61 }
 0x55f   : > { %3596 = vmatprep.mubr.bf16.mxu1 %v4456_v26  ;;  %v4443_v26 = vcombine.low %v10776_v29, %v10775_v9 }
 0x561   : > { %4068 = vperm.xlu1 %6527, %v10770_v6   ;;  %4073 = vperm.xlu0 %6528, %v10771_v34   ;;  %v9471_v6 = vpop.permute.xlu1 %6408  ;;  %v10785_v34 = vld [vmem:[#allocation191_spill] sm:$0xff] }
 0x562   : > { %3677 = vmatmul.mubr.bf16.gmra.mrb[104].mxu0 %v4415_v15  ;;  %v10783_v15 = vld [vmem:[#allocation148_spill] sm:$0xff] }
 0x563   : > { %3684 = vmatprep.mubr.bf16.mxu0 %v4430_v1  ;;  %v4458_v1 = vcombine.high %v10784_v59, %v10783_v15 }
 0x565   : > { %4078 = vperm.xlu1 %6527, %v10773_v46   ;;  %4083 = vperm.xlu0 %6528, %v10774_v12   ;;  %v4457_v46 = vcombine.low %v10784_v59, %v10783_v15  ;;  %v10786_v12 = vld [vmem:[#allocation155_spill] sm:$0xff]  ;;  %v10788_v15 = vld [vmem:[#allocation45_spill] sm:$0xff] }
 0x566   : > { %3597 = vmatmul.mubr.bf16.gmra.mrb[120].mxu1 %v4455_v48  ;;  %v6419_v48 = vpop.permute.xlu0 %6418  ;;  %v4471_v13 = vcombine.low %v10786_v12, %v10786_v12 }
 0x567   : > { %3604 = vmatprep.mubr.bf16.mxu1 %v4470_v43  ;;  %v6420_v23 = vunpack.i.l.bf16 %v6419_v48 }
 0x569   : > { %4088 = vperm.xlu1 %6527, %v10777_v28   ;;  %4093 = vperm.xlu0 %6528, %v10778_v16   ;;  %v6390_v16 = vunpack.i.l.bf16 %v9383_v24 }
 0x56a   : > { %3685 = vmatmul.mubr.bf16.gmra.mrb[108].mxu0 %v4429_v36  ;;  %v9476_v36 = vpop.permute.xlu0 %6423 }
 0x56b   : > { %3692 = vmatprep.mubr.bf16.mxu0 %v4444_v11  ;;  %v4472_v11 = vcombine.high %v10786_v12, %v10786_v12 }
 0x56d   : > { %4098 = vperm.xlu1 %6527, %v10781_v21   ;;  %4103 = vperm.xlu0 %6528, %v10782_v38   ;;  %v6375_v38 = vunpack.i.l.bf16 %v9393_v8 }
 0x56e   : > { %3605 = vmatmul.mubr.bf16.gmra.mrb[124].mxu1 %v4469_v20  ;;  %v6391_v20 = vunpack.i.h.bf16 %v9383_v24  ;;  %v4364_v24 = vcombine.high %v10788_v15, %v10787_v14 }
 0x56f   : > { %3748 = vmatprep.mubr.bf16.mxu1 %v4362_v35 }
 0x570   : > { %v6429_v43 = vpop.permute.xlu1 %6428  ;;  %v2411_v9 = vsel %vm605_vm0, %v6390_v16, %v6391_v20  ;;  %v6406_v20 = vunpack.i.h.bf16 %v9458_v58  ;;  %v6405_v16 = vunpack.i.l.bf16 %v9458_v58 }
 0x571   : > { %4108 = vperm.xlu1 %6527, %v10785_v34   ;;  %v6431_v35 = vunpack.i.h.bf16 %v6429_v43  ;;  %v6430_v21 = vunpack.i.l.bf16 %v6429_v43 }
 0x572   : > { %3693 = vmatmul.mubr.bf16.gmra.mrb[112].mxu0 %v4443_v26  ;;  %v6376_v26 = vunpack.i.h.bf16 %v9393_v8  ;;  %v2412_v58 = vsel %vm605_vm0, %v6405_v16, %v6406_v20 }
 0x573   : > { %3700 = vmatprep.mubr.bf16.mxu0 %v4458_v1  ;;  %v2408_v43 = vsel %vm605_vm0, %v6430_v21, %v6431_v35 }
 0x574   : > { %v6434_v28 = vpop.permute.xlu1 %6433  ;;  %v2410_v8 = vsel %vm605_vm0, %v6375_v38, %v6376_v26 }
 0x575   : > { %v6435_v17 = vunpack.i.l.bf16 %v6434_v28  ;;  %v2560_v35 = vpack.c.bf16 %v2411_v9, %v2410_v8 }
 0x578   : > { %v6449_v1 = vpop.permute.xlu0 %6448  ;;  %v6439_v7 = vpop.permute.xlu1 %6438 }
 0x579   : > { %v6451_v34 = vunpack.i.h.bf16 %v6449_v1  ;;  %v6450_v0 = vunpack.i.l.bf16 %v6449_v1  ;;  %v6440_v9 = vunpack.i.l.bf16 %v6439_v7 }
 0x57a   : > { %3701 = vmatmul.mubr.bf16.gmra.mrb[116].mxu0 %v4457_v46  ;;  %v6436_v46 = vunpack.i.h.bf16 %v6434_v28 }
 0x57b   : > { %3708 = vmatprep.mubr.bf16.mxu0 %v4472_v11  ;;  %v2409_v22 = vsel %vm605_vm0, %v6450_v0, %v6451_v34  ;;  %v6421_v11 = vunpack.i.h.bf16 %v6419_v48 }
 0x57c   : > { %v2559_v1 = vpack.c.bf16 %v2409_v22, %v2408_v43  ;;  %v6454_v25 = vpop.permute.xlu0 %6453  ;;  %v2268_v0 = vsel %vm10789_vm3, %v6435_v17, %v6436_v46  ;;  %v6395_v17 = vunpack.i.l.bf16 %v9408_v19 }
 0x57d   : > { %v6456_v12 = vunpack.i.h.bf16 %v6454_v25  ;;  %v6455_v27 = vunpack.i.l.bf16 %v6454_v25  ;;  %v9494_v29 = vpop.permute.xlu1 %6443  ;;  %v2413_v21 = vsel %vm605_vm0, %v6420_v23, %v6421_v11  ;;  %v6381_v23 = vunpack.i.h.bf16 %v9413_v18 }
 0x57e   : > { %3831 = vmatpush1.bf16.msra.mxu0 %v2559_v1  ;;  %v2561_v46 = vpack.c.bf16 %v2413_v21, %v2412_v58  ;;  %v6425_v21 = vunpack.i.l.bf16 %v9476_v36  ;;  %v6411_v58 = vunpack.i.h.bf16 %v9471_v6 }
 0x57f   : > { %3832 = vmatprep.subr.bf16.mxu0 %v10721_v3  ;;  %v2269_v28 = vsel %vm10790_vm4, %v6455_v27, %v6456_v12  ;;  %v6441_v27 = vunpack.i.h.bf16 %v6439_v7 }
 0x580   : > { %v6464_v48 = vpop.permute.xlu0 %6463  ;;  %v2552_v22 = vpack.c.bf16 %v2269_v28, %v2268_v0 }
 0x581   : > { %v6466_v25 = vunpack.i.h.bf16 %v6464_v48  ;;  %v6465_v26 = vunpack.i.l.bf16 %v6464_v48  ;;  %v6459_v38 = vpop.permute.xlu1 %6458 }
 0x582   : > { %3709 = vmatmul.mubr.bf16.gmra.mrb[120].mxu0 %v4471_v13  ;;  %v6396_v13 = vunpack.i.h.bf16 %v9408_v19  ;;  %v6461_v34 = vunpack.i.h.bf16 %v6459_v38  ;;  %v6460_v43 = vunpack.i.l.bf16 %v6459_v38  ;;  %5050 = vmatprep.subr.bf16.mxu1 %v2552_v22  ;;  %v2414_v19 = vsel %vm605_vm0, %v6440_v9, %v6441_v27 }
 0x583   : > { %4522 = vmatprep.mubr.msk.bf16.mxu0 %vm605_vm0, %v4364_v24  ;;  %3833 = vmatpush1.bf16.msra.mxu0 %v2560_v35  ;;  %v2163_v12 = vsel %vm10791_vm5, %v6465_v26, %v6466_v25  ;;  %v6380_v24 = vunpack.i.l.bf16 %v9413_v18  ;;  %v6426_v22 = vunpack.i.h.bf16 %v9476_v36  ;;  %v6410_v25 = vunpack.i.l.bf16 %v9471_v6 }
 0x584   : > { %3834 = vmatprep.subr.bf16.mxu0 %v10721_v3  ;;  %v2162_v8 = vsel %vm10792_vm6, %v6460_v43, %v6461_v34  ;;  %v6474_v11 = vpop.permute.xlu0 %6473  ;;  %v2417_v28 = vsel %vm605_vm0, %v6395_v17, %v6396_v13  ;;  %v6446_v36 = vunpack.i.h.bf16 %v9494_v29  ;;  %v6445_v6 = vunpack.i.l.bf16 %v9494_v29 }
 0x585   : > { %v2544_v1 = vpack.c.bf16 %v2163_v12, %v2162_v8  ;;  %v6476_v20 = vunpack.i.h.bf16 %v6474_v11  ;;  %v6475_v16 = vunpack.i.l.bf16 %v6474_v11  ;;  %v6469_v0 = vpop.permute.xlu1 %6468  ;;  %v2416_v18 = vsel %vm605_vm0, %v6380_v24, %v6381_v23 }
 0x586   : > { %v2563_v43 = vpack.c.bf16 %v2417_v28, %v2416_v18  ;;  %v2419_v17 = vsel %vm605_vm0, %v6425_v21, %v6426_v22  ;;  %v2418_v27 = vsel %vm605_vm0, %v6410_v25, %v6411_v58  ;;  %v6471_v28 = vunpack.i.h.bf16 %v6469_v0 }
 0x587   : > { %3835 = vmatpush1.bf16.msra.mxu0 %v2561_v46  ;;  %v2415_v7 = vsel %vm605_vm0, %v6475_v16, %v6476_v20  ;;  %5051 = vmatpush3.bf16.msra.mxu1 %v2544_v1  ;;  %v2564_v8 = vpack.c.bf16 %v2419_v17, %v2418_v27  ;;  %v6470_v18 = vunpack.i.l.bf16 %v6469_v0  ;;  %v2420_v29 = vsel %vm605_vm0, %v6445_v6, %v6446_v36 }
 0x588   : > { %3836 = vmatprep.subr.bf16.mxu0 %v10721_v3  ;;  %v2562_v35 = vpack.c.bf16 %v2415_v7, %v2414_v19  ;;  %v6479_v48 = vpop.permute.xlu0 %6478 }
 0x589   : > { %v6484_v26 = vpop.permute.xlu1 %6483  ;;  %v6481_v20 = vunpack.i.h.bf16 %v6479_v48  ;;  %v6480_v16 = vunpack.i.l.bf16 %v6479_v48 }
 0x58a   : > { %v6486_v38 = vunpack.i.h.bf16 %v6484_v26  ;;  %v6485_v34 = vunpack.i.l.bf16 %v6484_v26 }
 0x58b   : > { %3837 = vmatpush1.bf16.msra.mxu0 %v2562_v35 }
 0x58c   : > { %3838 = vmatprep.subr.bf16.mxu0 %v10721_v3  ;;  %v6489_v13 = vpop.permute.xlu0 %6488  ;;  %v2270_v24 = vsel %vm10793_vm8, %v6485_v34, %v6486_v38 }
 0x58d   : > { %v6491_v9 = vunpack.i.h.bf16 %v6489_v13  ;;  %v6490_v12 = vunpack.i.l.bf16 %v6489_v13  ;;  %v6494_v23 = vpop.permute.xlu1 %6493  ;;  %v2423_v13 = vsel %vm605_vm0, %v6480_v16, %v6481_v20 }
 0x58e   : > { %v6496_v21 = vunpack.i.h.bf16 %v6494_v23  ;;  %v6495_v58 = vunpack.i.l.bf16 %v6494_v23 }
 0x58f   : > { %3839 = vmatpush1.bf16.msra.mxu0 %v2563_v43  ;;  %v2271_v46 = vsel %vm10794_vm9, %v6490_v12, %v6491_v9  ;;  %v2422_v9 = vsel %vm605_vm0, %v6470_v18, %v6471_v28  ;;  %v10795_v12 = vld [vmem:[#allocation224_spill] sm:$0xff] }
 0x590   : > { %3840 = vmatprep.subr.bf16.mxu0 %v10721_v3  ;;  %v6499_v11 = vpop.permute.xlu0 %6498  ;;  %v2553_v1 = vpack.c.bf16 %v2271_v46, %v2270_v24  ;;  %v2194_v6 = vsel %vm10796_vm12, %v6495_v58, %v6496_v21 }
 0x591   : > { %v6501_v19 = vunpack.i.h.bf16 %v6499_v11  ;;  %v6500_v7 = vunpack.i.l.bf16 %v6499_v11  ;;  %v6509_v35 = vpop.permute.xlu1 %6508  ;;  %v2566_v11 = vpack.c.bf16 %v2423_v13, %v2422_v9 }
 0x592   : > { %5052 = vmatprep.subr.bf16.mxu1 %v2553_v1  ;;  %v4774_v22 = vpop.f32.mrb[56].mxu1  ;;  %v6511_v24 = vunpack.i.h.bf16 %v6509_v35  ;;  %v6510_v46 = vunpack.i.l.bf16 %v6509_v35  ;;  %v10800_v35 = vld [vmem:[#allocation58_spill] sm:$0xff] }
 0x593   : > { %3841 = vmatpush1.bf16.msra.mxu0 %v2564_v8  ;;  %v2421_v25 = vsel %vm605_vm0, %v6500_v7, %v6501_v19  ;;  %v4775_v26 = vpop.f32.mrb[57].mxu1  ;;  %v10798_v19 = vld [vmem:[#allocation230_spill] sm:$0xff] }
 0x594   : > { %3842 = vmatprep.subr.bf16.mxu0 %v10721_v3  ;;  %v2565_v38 = vpack.c.bf16 %v2421_v25, %v2420_v29  ;;  %v6504_v34 = vpop.permute.xlu0 %6503  ;;  %v4776_v48 = vadd.f32 %v4775_v26, %v4774_v22  ;;  %v4777_v43 = vpop.f32.mrb[58].mxu1  ;;  %v4361_v22 = vcombine.low %v10780_v45, %v10779_v61  ;;  %v10799_v29 = vld [vmem:[#allocation65_spill] sm:$0xff]  ;;  %v2424_v25 = vsel %vm605_vm0, %v6510_v46, %v6511_v24 }
 0x595   : > { %v6506_v0 = vunpack.i.h.bf16 %v6504_v34  ;;  %v6505_v17 = vunpack.i.l.bf16 %v6504_v34  ;;  %v4778_v27 = vpop.f32.mrb[59].mxu1  ;;  %v6519_v20 = vpop.permute.xlu1 %6518  ;;  %v4376_v21 = vcombine.high %v10800_v35, %v10799_v29 }
 0x596   : > { %v9532_v36 = vadd.f32 %v4776_v48, %v10795_v12  ;;  %v4779_v23 = vadd.f32 %v4778_v27, %v4777_v43  ;;  %v6521_v26 = vunpack.i.h.bf16 %v6519_v20 }
 0x597   : > { %3843 = vmatpush1.bf16.msra.mxu0 %v2565_v38  ;;  %v2195_v8 = vsel %vm10797_vm13, %v6505_v17, %v6506_v0  ;;  %v6520_v38 = vunpack.i.l.bf16 %v6519_v20 }
 0x598   : > { %3844 = vmatprep.subr.bf16.mxu0 %v10721_v3  ;;  %v2545_v1 = vpack.c.bf16 %v2195_v8, %v2194_v6  ;;  %v6514_v16 = vpop.permute.xlu0 %6513  ;;  %v9538_v7 = vadd.f32 %v4779_v23, %v10798_v19  ;;  %v10801_v23 = vld [vmem:[#allocation225_spill] sm:$0xff]  ;;  %v4363_v19 = vcombine.low %v10788_v15, %v10787_v14 }
 0x599   : > { %v6516_v28 = vunpack.i.h.bf16 %v6514_v16  ;;  %v6515_v18 = vunpack.i.l.bf16 %v6514_v16  ;;  %v2426_v46 = vsel %vm605_vm0, %v6520_v38, %v6521_v26  ;;  %v4375_v16 = vcombine.low %v10800_v35, %v10799_v29 }
 0x59a   : > { %5053 = vmatpush3.bf16.msra.mxu1 %v2545_v1  ;;  %v4780_v58 = vpop.f32.mrb[60].mxu1  ;;  %v10802_v1 = vld [vmem:[#allocation208_spill] sm:$0xff] }
 0x59b   : > { %3845 = vmatpush1.bf16.msra.mxu0 %v2566_v11  ;;  %v2425_v34 = vsel %vm605_vm0, %v6515_v18, %v6516_v28  ;;  %v4781_v48 = vpop.f32.mrb[61].mxu1  ;;  %v10803_v28 = vld [vmem:[#allocation79_spill] sm:$0xff]  ;;  %v10804_v18 = vld [vmem:[#allocation72_spill] sm:$0xff] }
 0x59c   : > { %3846 = vmatprep.subr.bf16.mxu0 %v10721_v3  ;;  %v2567_v43 = vpack.c.bf16 %v2425_v34, %v2424_v25  ;;  %v6524_v13 = vpop.permute.xlu0 %6523  ;;  %v4782_v0 = vadd.f32 %v4781_v48, %v4780_v58  ;;  %v4783_v17 = vpop.f32.mrb[62].mxu1  ;;  %v10806_v58 = vld [vmem:[#allocation59_spill] sm:$0xff] }
 0x59d   : > { %v6526_v27 = vunpack.i.h.bf16 %v6524_v13  ;;  %v6525_v9 = vunpack.i.l.bf16 %v6524_v13  ;;  %3749 = vmatmul.mubr.bf16.vlgmr.msra.gmra.mrb[128].mxu1 %v4361_v22  ;;  %v4784_v12 = vpop.f32.mrb[63].mxu1  ;;  %v4390_v22 = vcombine.high %v10804_v18, %v10803_v28 }
 0x59e   : > { %3756 = vmatprep.mubr.bf16.mxu1 %v4376_v21  ;;  %v9548_v6 = vadd.f32 %v4782_v0, %v10801_v23  ;;  %v4785_v24 = vadd.f32 %v4784_v12, %v4783_v17  ;;  %v10805_v21 = vld [vmem:[#allocation66_spill] sm:$0xff] }
 0x59f   : > { %3847 = vmatpush1.bf16.msra.mxu0 %v2567_v43  ;;  %v2427_v8 = vsel %vm605_vm0, %v6525_v9, %v6526_v27  ;;  %v4378_v25 = vcombine.high %v10806_v58, %v10805_v21  ;;  %v10807_v43 = vld [vmem:[#allocation211_spill] sm:$0xff]  ;;  %v10808_v17 = vld [vmem:[#allocation210_spill] sm:$0xff]  ;;  %v4389_v9 = vcombine.low %v10804_v18, %v10803_v28  ;;  %v4377_v12 = vcombine.low %v10806_v58, %v10805_v21 }
 0x5a0   : > { %3848 = vmatprep.subr.bf16.mxu0 %v10721_v3  ;;  %v2568_v11 = vpack.c.bf16 %v2427_v8, %v2426_v46  ;;  %v9554_v20 = vadd.f32 %v4785_v24, %v10802_v1  ;;  %v10809_v24 = vld [vmem:[#allocation93_spill] sm:$0xff]  ;;  %v10810_v46 = vld [vmem:[#allocation86_spill] sm:$0xff]  ;;  %v10817_v18 = vld [vmem:[#allocation227_spill] sm:$0xff] }
 0x5a1   : > { %v4404_v8 = vcombine.high %v10810_v46, %v10809_v24  ;;  %v10812_v1 = vld [vmem:[#allocation73_spill] sm:$0xff] }
 0x5a2   : > { %v4786_v26 = vpop.f32.mrb[64].mxu1 }
 0x5a3   : > { %3849 = vmatpush1.bf16.msra.mxu0 %v2568_v11  ;;  %v4787_v38 = vpop.f32.mrb[65].mxu1  ;;  %v10811_v11 = vld [vmem:[#allocation80_spill] sm:$0xff] }
 0x5a4   : > { %v4788_v3 = vadd.f32 %v4787_v38, %v4786_v26  ;;  %v4789_v34 = vpop.f32.mrb[66].mxu1 }
 0x5a5   : > { %3757 = vmatmul.mubr.bf16.gmra.mrb[132].mxu1 %v4375_v16  ;;  %v4790_v48 = vpop.f32.mrb[67].mxu1  ;;  %v4392_v16 = vcombine.high %v10812_v1, %v10811_v11 }
 0x5a6   : > { %3853 = vmatmul.mubr.bf16.vlgmr.msra.gmra.mrb[124].mxu0 %v4363_v19  ;;  %3764 = vmatprep.mubr.bf16.mxu1 %v4390_v22  ;;  %v9566_v13 = vadd.f32 %v4788_v3, %v10807_v43  ;;  %v4791_v0 = vadd.f32 %v4790_v48, %v4789_v34 }
 0x5a7   : > { %4523 = vmatprep.mubr.msk.bf16.mxu0 %vm605_vm0, %v4378_v25 }
 0x5a8   : > { %v9569_v27 = vadd.f32 %v4791_v0, %v10808_v17 }
 0x5aa   : > { %v4844_v23 = vpop.f32.mrb[52].mxu0  ;;  %v4792_v22 = vpop.f32.mrb[68].mxu1 }
 0x5ab   : > { %v4845_v19 = vpop.f32.mrb[53].mxu0  ;;  %v4793_v38 = vpop.f32.mrb[69].mxu1 }
 0x5ac   : > { %v4846_v25 = vadd.f32 %v4845_v19, %v4844_v23  ;;  %v4847_v26 = vpop.f32.mrb[54].mxu0  ;;  %v4794_v34 = vadd.f32 %v4793_v38, %v4792_v22  ;;  %v4795_v48 = vpop.f32.mrb[70].mxu1  ;;  %v10813_v19 = vld [vmem:[#allocation107_spill] sm:$0xff] }
 0x5ad   : > { %v4848_v3 = vpop.f32.mrb[55].mxu0  ;;  %3765 = vmatmul.mubr.bf16.gmra.mrb[136].mxu1 %v4389_v9  ;;  %v4796_v17 = vpop.f32.mrb[71].mxu1  ;;  %v4403_v9 = vcombine.low %v10810_v46, %v10809_v24 }
 0x5ae   : > { %3861 = vmatmul.mubr.bf16.gmra.mrb[128].mxu0 %v4377_v12  ;;  %v9580_v43 = vadd.f32 %v4846_v25, %v9532_v36  ;;  %v4849_v0 = vadd.f32 %v4848_v3, %v4847_v26  ;;  %3772 = vmatprep.mubr.bf16.mxu1 %v4404_v8  ;;  %v9584_v14 = vadd.f32 %v4794_v34, %v9151_v55  ;;  %v10815_v25 = vld [vmem:[#allocation94_spill] sm:$0xff]  ;;  %v10816_v55 = vld [vmem:[#allocation87_spill] sm:$0xff] }
 0x5af   : > { %4524 = vmatprep.mubr.msk.bf16.mxu0 %vm605_vm0, %v4392_v16  ;;  %v4797_v15 = vadd.f32 %v4796_v17, %v4795_v48  ;;  %v4391_v12 = vcombine.low %v10812_v1, %v10811_v11  ;;  %v10814_v16 = vld [vmem:[#allocation100_spill] sm:$0xff]  ;;  %v4406_v26 = vcombine.high %v10816_v55, %v10815_v25 }
 0x5b0   : > { %v9587_v23 = vadd.f32 %v4849_v0, %v9538_v7  ;;  %v4418_v22 = vcombine.high %v10814_v16, %v10813_v19 }
 0x5b1   : > { %v9594_v36 = vadd.f32 %v4797_v15, %v9165_v5 }
 0x5b2   : > { %v4850_v8 = vpop.f32.mrb[56].mxu0  ;;  %v4798_v3 = vpop.f32.mrb[72].mxu1 }
 0x5b3   : > { %v4851_v38 = vpop.f32.mrb[57].mxu0  ;;  %v4799_v48 = vpop.f32.mrb[73].mxu1 }
 0x5b4   : > { %v4852_v7 = vadd.f32 %v4851_v38, %v4850_v8  ;;  %v4853_v34 = vpop.f32.mrb[58].mxu0  ;;  %v4800_v17 = vadd.f32 %v4799_v48, %v4798_v3  ;;  %v4801_v1 = vpop.f32.mrb[74].mxu1  ;;  %v10818_v38 = vld [vmem:[#allocation121_spill] sm:$0xff] }
 0x5b5   : > { %v4854_v0 = vpop.f32.mrb[59].mxu0  ;;  %3773 = vmatmul.mubr.bf16.gmra.mrb[140].mxu1 %v4403_v9  ;;  %v4802_v11 = vpop.f32.mrb[75].mxu1  ;;  %v4417_v9 = vcombine.low %v10814_v16, %v10813_v19 }
 0x5b6   : > { %3869 = vmatmul.mubr.bf16.gmra.mrb[132].mxu0 %v4391_v12  ;;  %v9601_v5 = vadd.f32 %v4852_v7, %v9548_v6  ;;  %v4855_v15 = vadd.f32 %v4854_v0, %v4853_v34  ;;  %3780 = vmatprep.mubr.bf16.mxu1 %v4418_v22  ;;  %v9605_v21 = vadd.f32 %v4800_v17, %v10817_v18  ;;  %v10820_v7 = vld [vmem:[#allocation108_spill] sm:$0xff]  ;;  %v10821_v18 = vld [vmem:[#allocation101_spill] sm:$0xff] }
 0x5b7   : > { %4525 = vmatprep.mubr.msk.bf16.mxu0 %vm605_vm0, %v4406_v26  ;;  %v4803_v24 = vadd.f32 %v4802_v11, %v4801_v1  ;;  %v4405_v12 = vcombine.low %v10816_v55, %v10815_v25  ;;  %v10819_v26 = vld [vmem:[#allocation114_spill] sm:$0xff]  ;;  %v4420_v34 = vcombine.high %v10821_v18, %v10820_v7 }
 0x5b8   : > { %v9608_v8 = vadd.f32 %v4855_v15, %v9554_v20  ;;  %v4432_v3 = vcombine.high %v10819_v26, %v10818_v38 }
 0x5b9   : > { %v9615_v6 = vadd.f32 %v4803_v24, %v9220_v37 }
 0x5ba   : > { %v4856_v22 = vpop.f32.mrb[60].mxu0 }
 0x5bb   : > { %v4857_v11 = vpop.f32.mrb[61].mxu0  ;;  %v4804_v1 = vpop.f32.mrb[76].mxu1 }
 0x5bc   : > { %v4858_v20 = vadd.f32 %v4857_v11, %v4856_v22  ;;  %v4859_v48 = vpop.f32.mrb[62].mxu0  ;;  %v4805_v0 = vpop.f32.mrb[77].mxu1  ;;  %v10822_v11 = vld [vmem:[#allocation135_spill] sm:$0xff] }
 0x5bd   : > { %v4860_v17 = vpop.f32.mrb[63].mxu0  ;;  %3781 = vmatmul.mubr.bf16.gmra.mrb[144].mxu1 %v4417_v9  ;;  %v4806_v15 = vadd.f32 %v4805_v0, %v4804_v1  ;;  %v4807_v16 = vpop.f32.mrb[78].mxu1  ;;  %v4431_v9 = vcombine.low %v10819_v26, %v10818_v38 }
 0x5be   : > { %3877 = vmatmul.mubr.bf16.gmra.mrb[136].mxu0 %v4405_v12  ;;  %v9622_v37 = vadd.f32 %v4858_v20, %v9566_v13  ;;  %v4861_v24 = vadd.f32 %v4860_v17, %v4859_v48  ;;  %3788 = vmatprep.mubr.bf16.mxu1 %v4432_v3  ;;  %v4808_v19 = vpop.f32.mrb[79].mxu1  ;;  %v4419_v12 = vcombine.low %v10821_v18, %v10820_v7  ;;  %v10824_v20 = vld [vmem:[#allocation122_spill] sm:$0xff] }
 0x5bf   : > { %4526 = vmatprep.mubr.msk.bf16.mxu0 %vm605_vm0, %v4420_v34  ;;  %v9626_v25 = vadd.f32 %v4806_v15, %v9262_v10  ;;  %v4809_v28 = vadd.f32 %v4808_v19, %v4807_v16  ;;  %v10823_v34 = vld [vmem:[#allocation128_spill] sm:$0xff]  ;;  %v10825_v10 = vld [vmem:[#allocation115_spill] sm:$0xff] }
 0x5c0   : > { %v9629_v22 = vadd.f32 %v4861_v24, %v9569_v27  ;;  %v4446_v1 = vcombine.high %v10823_v34, %v10822_v11  ;;  %v4434_v48 = vcombine.high %v10825_v10, %v10824_v20 }
 0x5c1   : > { %v9636_v13 = vadd.f32 %v4809_v28, %v9275_v49 }
 0x5c2   : > { %v4862_v3 = vpop.f32.mrb[64].mxu0 }
 0x5c3   : > { %v4863_v19 = vpop.f32.mrb[65].mxu0  ;;  %v4810_v16 = vpop.f32.mrb[80].mxu1 }
 0x5c4   : > { %v4864_v27 = vadd.f32 %v4863_v19, %v4862_v3  ;;  %v4865_v0 = vpop.f32.mrb[66].mxu0  ;;  %v4811_v17 = vpop.f32.mrb[81].mxu1 }
 0x5c5   : > { %v4866_v15 = vpop.f32.mrb[67].mxu0  ;;  %3789 = vmatmul.mubr.bf16.gmra.mrb[148].mxu1 %v4431_v9  ;;  %v4812_v24 = vadd.f32 %v4811_v17, %v4810_v16  ;;  %v4813_v7 = vpop.f32.mrb[82].mxu1  ;;  %v4445_v9 = vcombine.low %v10823_v34, %v10822_v11  ;;  %v10826_v16 = vld [vmem:[#allocation149_spill] sm:$0xff] }
 0x5c6   : > { %3885 = vmatmul.mubr.bf16.gmra.mrb[140].mxu0 %v4419_v12  ;;  %v9643_v49 = vadd.f32 %v4864_v27, %v9584_v14  ;;  %v4867_v28 = vadd.f32 %v4866_v15, %v4865_v0  ;;  %3796 = vmatprep.mubr.bf16.mxu1 %v4446_v1  ;;  %v4814_v18 = vpop.f32.mrb[83].mxu1  ;;  %v4433_v12 = vcombine.low %v10825_v10, %v10824_v20  ;;  %v10827_v1 = vld [vmem:[#allocation142_spill] sm:$0xff]  ;;  %v10829_v0 = vld [vmem:[#allocation129_spill] sm:$0xff] }
 0x5c7   : > { %4527 = vmatprep.mubr.msk.bf16.mxu0 %vm605_vm0, %v4434_v48  ;;  %v3383_v26 = vadd.f32 %v4812_v24, %v9315_v63  ;;  %v4815_v29 = vadd.f32 %v4814_v18, %v4813_v7  ;;  %v4460_v27 = vcombine.high %v10827_v1, %v10826_v16  ;;  %v10828_v48 = vld [vmem:[#allocation136_spill] sm:$0xff] }
 0x5c8   : > { %v9648_v3 = vadd.f32 %v4867_v28, %v9594_v36  ;;  %v4448_v17 = vcombine.high %v10829_v0, %v10828_v48 }
 0x5c9   : > { %v3386_v14 = vadd.f32 %v4815_v29, %v9330_v2 }
 0x5ca   : > { %v4868_v19 = vpop.f32.mrb[68].mxu0 }
 0x5cb   : > { %v4869_v63 = vpop.f32.mrb[69].mxu0  ;;  %v4816_v7 = vpop.f32.mrb[84].mxu1 }
 0x5cc   : > { %v4870_v18 = vadd.f32 %v4869_v63, %v4868_v19  ;;  %v4871_v36 = vpop.f32.mrb[70].mxu0  ;;  %v4817_v15 = vpop.f32.mrb[85].mxu1 }
 0x5cd   : > { %v4872_v24 = vpop.f32.mrb[71].mxu0  ;;  %3797 = vmatmul.mubr.bf16.gmra.mrb[152].mxu1 %v4445_v9  ;;  %v4818_v28 = vadd.f32 %v4817_v15, %v4816_v7  ;;  %v4819_v11 = vpop.f32.mrb[86].mxu1  ;;  %v4459_v9 = vcombine.low %v10827_v1, %v10826_v16  ;;  %v10830_v7 = vld [vmem:[#allocation156_spill] sm:$0xff] }
 0x5ce   : > { %3893 = vmatmul.mubr.bf16.gmra.mrb[144].mxu0 %v4433_v12  ;;  %v9660_v10 = vadd.f32 %v4870_v18, %v9605_v21  ;;  %v4873_v2 = vadd.f32 %v4872_v24, %v4871_v36  ;;  %3804 = vmatprep.mubr.bf16.mxu1 %v4460_v27  ;;  %v4820_v29 = vpop.f32.mrb[87].mxu1  ;;  %v4447_v12 = vcombine.low %v10829_v0, %v10828_v48  ;;  %v10832_v18 = vld [vmem:[#allocation143_spill] sm:$0xff] }
 0x5cf   : > { %4528 = vmatprep.mubr.msk.bf16.mxu0 %vm605_vm0, %v4448_v17  ;;  %v3391_v20 = vadd.f32 %v4818_v28, %v9367_v39  ;;  %v4821_v30 = vadd.f32 %v4820_v29, %v4819_v11  ;;  %v4474_v27 = vcombine.high %v10830_v7, %v10830_v7  ;;  %v10831_v17 = vld [vmem:[#allocation150_spill] sm:$0xff] }
 0x5d0   : > { %v9665_v19 = vadd.f32 %v4873_v2, %v9615_v6  ;;  %v4462_v36 = vcombine.high %v10832_v18, %v10831_v17 }
 0x5d1   : > { %v3394_v21 = vadd.f32 %v4821_v30, %v9379_v4 }
 0x5d2   : > { %v4874_v63 = vpop.f32.mrb[72].mxu0 }
 0x5d3   : > { %v4875_v39 = vpop.f32.mrb[73].mxu0  ;;  %v4822_v11 = vpop.f32.mrb[88].mxu1 }
 0x5d4   : > { %v4876_v15 = vadd.f32 %v4875_v39, %v4874_v63  ;;  %v4877_v6 = vpop.f32.mrb[74].mxu0  ;;  %v4823_v24 = vpop.f32.mrb[89].mxu1  ;;  %v4473_v63 = vcombine.low %v10830_v7, %v10830_v7  ;;  %v10833_v39 = vld [vmem:[#allocation157_spill] sm:$0xff] }
 0x5d5   : > { %v4878_v28 = vpop.f32.mrb[75].mxu0  ;;  %3805 = vmatmul.mubr.bf16.gmra.mrb[156].mxu1 %v4459_v9  ;;  %v4824_v2 = vadd.f32 %v4823_v24, %v4822_v11  ;;  %v4825_v29 = vpop.f32.mrb[90].mxu1  ;;  %v4461_v9 = vcombine.low %v10832_v18, %v10831_v17  ;;  %v4475_v24 = vcombine.low %v10833_v39, %v10833_v39 }
 0x5d6   : > { %3901 = vmatmul.mubr.bf16.gmra.mrb[148].mxu0 %v4447_v12  ;;  %v9677_v0 = vadd.f32 %v4876_v15, %v9626_v25  ;;  %v4879_v4 = vadd.f32 %v4878_v28, %v4877_v6  ;;  %3812 = vmatprep.mubr.bf16.mxu1 %v4474_v27  ;;  %v4826_v30 = vpop.f32.mrb[91].mxu1  ;;  %v4476_v25 = vcombine.high %v10833_v39, %v10833_v39 }
 0x5d7   : > { %4529 = vmatprep.mubr.msk.bf16.mxu0 %vm605_vm0, %v4462_v36  ;;  %v3399_v1 = vadd.f32 %v4824_v2, %v9415_v33 }
 0x5d8   : > { %v9682_v16 = vadd.f32 %v4879_v4, %v9636_v13 }
 0x5da   : > { %v4880_v12 = vpop.f32.mrb[76].mxu0 }
 0x5db   : > { %v4881_v11 = vpop.f32.mrb[77].mxu0 }
 0x5dc   : > { %v4882_v27 = vadd.f32 %v4881_v11, %v4880_v12  ;;  %v4883_v15 = vpop.f32.mrb[78].mxu0 }
 0x5dd   : > { %v4884_v36 = vpop.f32.mrb[79].mxu0  ;;  %3813 = vmatmul.mubr.bf16.gmra.mrb[160].mxu1 %v4473_v63 }
 0x5de   : > { %3909 = vmatmul.mubr.bf16.gmra.mrb[152].mxu0 %v4461_v9  ;;  %v9690_v33 = vadd.f32 %v4882_v27, %v3383_v26  ;;  %v4885_v13 = vadd.f32 %v4884_v36, %v4883_v15 }
 0x5df   : > { %4530 = vmatprep.mubr.msk.bf16.mxu0 %vm605_vm0, %v4476_v25 }
 0x5e0   : > { %v9693_v6 = vadd.f32 %v4885_v13, %v3386_v14 }
 0x5e2   : > { %v4886_v28 = vpop.f32.mrb[80].mxu0 }
 0x5e3   : > { %v4887_v2 = vpop.f32.mrb[81].mxu0 }
 0x5e4   : > { %v4888_v29 = vadd.f32 %v4887_v2, %v4886_v28  ;;  %v4889_v4 = vpop.f32.mrb[82].mxu0 }
 0x5e5   : > { %v4890_v30 = vpop.f32.mrb[83].mxu0 }
 0x5e6   : > { %3917 = vmatmul.mubr.bf16.gmra.mrb[156].mxu0 %v4475_v24  ;;  %v9697_v12 = vadd.f32 %v4888_v29, %v3391_v20  ;;  %v4891_v63 = vadd.f32 %v4890_v30, %v4889_v4 }
 0x5e8   : > { %v9699_v9 = vadd.f32 %v4891_v63, %v3394_v21 }
 0x5eb   : > { %v4892_v26 = vpop.f32.mrb[84].mxu0 }
 0x5ec   : > { %v4893_v11 = vpop.f32.mrb[85].mxu0 }
 0x5ed   : > { %v4894_v27 = vadd.f32 %v4893_v11, %v4892_v26  ;;  %v4895_v25 = vpop.f32.mrb[86].mxu0 }
 0x5ee   : > { %v4896_v14 = vpop.f32.mrb[87].mxu0 }
 0x5ef   : > { %v9701_v15 = vadd.f32 %v4894_v27, %v3399_v1 }
 0x5ff   : > { %v4914_v36 = vpop.f32.mrb[92].mxu1 }
 0x600   : > { %v4915_v13 = vpop.f32.mrb[93].mxu1 }
 0x601   : > { %v4916_v7 = vadd.f32 %v4915_v13, %v4914_v36  ;;  %v4917_v17 = vpop.f32.mrb[94].mxu1 }
 0x602   : > { %v4918_v28 = vpop.f32.mrb[95].mxu1 }
 0x603   : > { %v3543_v2 = vadd.f32 %v4916_v7, %v9580_v43  ;;  %v4919_v24 = vadd.f32 %v4918_v28, %v4917_v17 }
 0x605   : > { %v3546_v20 = vadd.f32 %v4919_v24, %v9587_v23 }
 0x607   : > { %v4920_v29 = vpop.f32.mrb[96].mxu1 }
 0x608   : > { %v4921_v21 = vpop.f32.mrb[97].mxu1 }
 0x609   : > { %v4922_v4 = vadd.f32 %v4921_v21, %v4920_v29  ;;  %v4923_v30 = vpop.f32.mrb[98].mxu1 }
 0x60a   : > { %v4924_v63 = vpop.f32.mrb[99].mxu1 }
 0x60b   : > { %v3551_v26 = vadd.f32 %v4922_v4, %v9601_v5  ;;  %v4925_v11 = vadd.f32 %v4924_v63, %v4923_v30 }
 0x60d   : > { %v3554_v1 = vadd.f32 %v4925_v11, %v9608_v8 }
 0x60f   : > { %v4926_v27 = vpop.f32.mrb[100].mxu1 }
 0x610   : > { %v4927_v25 = vpop.f32.mrb[101].mxu1 }
 0x611   : > { %v4928_v14 = vadd.f32 %v4927_v25, %v4926_v27  ;;  %v4929_v36 = vpop.f32.mrb[102].mxu1 }
 0x612   : > { %v4930_v13 = vpop.f32.mrb[103].mxu1 }
 0x613   : > { %v3559_v43 = vadd.f32 %v4928_v14, %v9622_v37  ;;  %v4931_v7 = vadd.f32 %v4930_v13, %v4929_v36 }
 0x614   : > { %v4984_v17 = vpop.f32.mrb[88].mxu0 }
 0x615   : > { %v4985_v23 = vpop.f32.mrb[89].mxu0  ;;  %v3562_v28 = vadd.f32 %v4931_v7, %v9629_v22 }
 0x616   : > { %v4986_v24 = vadd.f32 %v4985_v23, %v4984_v17  ;;  %v4987_v29 = vpop.f32.mrb[90].mxu0 }
 0x617   : > { %v4988_v21 = vpop.f32.mrb[91].mxu0 }
 0x618   : > { %v9709_v18 = vadd.f32 %v4986_v24, %v3543_v2  ;;  %v4989_v5 = vadd.f32 %v4988_v21, %v4987_v29 }
 0x619   : > { %v4932_v4 = vpop.f32.mrb[104].mxu1 }
 0x61a   : > { %v4933_v8 = vpop.f32.mrb[105].mxu1  ;;  %v9711_v30 = vadd.f32 %v4989_v5, %v3546_v20 }
 0x61b   : > { %v4934_v63 = vadd.f32 %v4933_v8, %v4932_v4  ;;  %v4935_v11 = vpop.f32.mrb[106].mxu1 }
 0x61c   : > { %v4936_v27 = vpop.f32.mrb[107].mxu1 }
 0x61d   : > { %v3567_v37 = vadd.f32 %v4934_v63, %v9643_v49  ;;  %v4937_v25 = vadd.f32 %v4936_v27, %v4935_v11  ;;  %v4990_v14 = vpop.f32.mrb[92].mxu0 }
 0x61e   : > { %v4991_v36 = vpop.f32.mrb[93].mxu0 }
 0x61f   : > { %v3570_v22 = vadd.f32 %v4937_v25, %v9648_v3  ;;  %v4992_v13 = vadd.f32 %v4991_v36, %v4990_v14  ;;  %v4993_v7 = vpop.f32.mrb[94].mxu0 }
 0x620   : > { %v4994_v17 = vpop.f32.mrb[95].mxu0 }
 0x621   : > { %v9715_v2 = vadd.f32 %v4992_v13, %v3551_v26  ;;  %v4995_v23 = vadd.f32 %v4994_v17, %v4993_v7  ;;  %v4938_v24 = vpop.f32.mrb[108].mxu1 }
 0x622   : > { %v4939_v29 = vpop.f32.mrb[109].mxu1 }
 0x623   : > { %v9717_v20 = vadd.f32 %v4995_v23, %v3554_v1  ;;  %v4940_v21 = vadd.f32 %v4939_v29, %v4938_v24  ;;  %v4941_v5 = vpop.f32.mrb[110].mxu1 }
 0x624   : > { %v4942_v4 = vpop.f32.mrb[111].mxu1 }
 0x625   : > { %v3575_v49 = vadd.f32 %v4940_v21, %v9660_v10  ;;  %v4943_v8 = vadd.f32 %v4942_v4, %v4941_v5  ;;  %v4996_v63 = vpop.f32.mrb[96].mxu0 }
 0x626   : > { %v4997_v11 = vpop.f32.mrb[97].mxu0 }
 0x627   : > { %v3578_v3 = vadd.f32 %v4943_v8, %v9665_v19  ;;  %v4998_v27 = vadd.f32 %v4997_v11, %v4996_v63  ;;  %v4999_v25 = vpop.f32.mrb[98].mxu0 }
 0x628   : > { %v5000_v14 = vpop.f32.mrb[99].mxu0 }
 0x629   : > { %v9721_v26 = vadd.f32 %v4998_v27, %v3559_v43  ;;  %v5001_v36 = vadd.f32 %v5000_v14, %v4999_v25  ;;  %v4944_v13 = vpop.f32.mrb[112].mxu1 }
 0x62a   : > { %v4945_v7 = vpop.f32.mrb[113].mxu1 }
 0x62b   : > { %v9723_v1 = vadd.f32 %v5001_v36, %v3562_v28  ;;  %v4946_v17 = vadd.f32 %v4945_v7, %v4944_v13  ;;  %v4947_v23 = vpop.f32.mrb[114].mxu1 }
 0x62c   : > { %v4948_v24 = vpop.f32.mrb[115].mxu1 }
 0x62d   : > { %v3583_v10 = vadd.f32 %v4946_v17, %v9677_v0  ;;  %v4949_v29 = vadd.f32 %v4948_v24, %v4947_v23  ;;  %v5002_v21 = vpop.f32.mrb[100].mxu0 }
 0x62e   : > { %v5003_v5 = vpop.f32.mrb[101].mxu0 }
 0x62f   : > { %v3586_v19 = vadd.f32 %v4949_v29, %v9682_v16  ;;  %v5004_v4 = vadd.f32 %v5003_v5, %v5002_v21  ;;  %v5005_v8 = vpop.f32.mrb[102].mxu0 }
 0x630   : > { %v5006_v63 = vpop.f32.mrb[103].mxu0 }
 0x631   : > { %v9727_v43 = vadd.f32 %v5004_v4, %v3567_v37  ;;  %v5007_v11 = vadd.f32 %v5006_v63, %v5005_v8  ;;  %v4950_v27 = vpop.f32.mrb[116].mxu1 }
 0x632   : > { %v4951_v25 = vpop.f32.mrb[117].mxu1 }
 0x633   : > { %v9729_v28 = vadd.f32 %v5007_v11, %v3570_v22  ;;  %v4952_v14 = vadd.f32 %v4951_v25, %v4950_v27  ;;  %v4953_v36 = vpop.f32.mrb[118].mxu1 }
 0x634   : > { %v4954_v13 = vpop.f32.mrb[119].mxu1 }
 0x635   : > { %v3591_v0 = vadd.f32 %v4952_v14, %v9690_v33  ;;  %v4955_v7 = vadd.f32 %v4954_v13, %v4953_v36  ;;  %v5008_v17 = vpop.f32.mrb[104].mxu0 }
 0x636   : > { %v5009_v23 = vpop.f32.mrb[105].mxu0 }
 0x637   : > { %v3594_v16 = vadd.f32 %v4955_v7, %v9693_v6  ;;  %v5010_v24 = vadd.f32 %v5009_v23, %v5008_v17  ;;  %v5011_v29 = vpop.f32.mrb[106].mxu0 }
 0x638   : > { %v5012_v21 = vpop.f32.mrb[107].mxu0 }
 0x639   : > { %v9733_v37 = vadd.f32 %v5010_v24, %v3575_v49  ;;  %v5013_v5 = vadd.f32 %v5012_v21, %v5011_v29  ;;  %v4956_v4 = vpop.f32.mrb[120].mxu1 }
 0x63a   : > { %v4957_v8 = vpop.f32.mrb[121].mxu1 }
 0x63b   : > { %v9735_v22 = vadd.f32 %v5013_v5, %v3578_v3  ;;  %v4958_v63 = vadd.f32 %v4957_v8, %v4956_v4  ;;  %v4959_v11 = vpop.f32.mrb[122].mxu1 }
 0x63c   : > { %v4960_v27 = vpop.f32.mrb[123].mxu1 }
 0x63d   : > { %v3599_v33 = vadd.f32 %v4958_v63, %v9697_v12  ;;  %v4961_v25 = vadd.f32 %v4960_v27, %v4959_v11  ;;  %v5014_v14 = vpop.f32.mrb[108].mxu0 }
 0x63e   : > { %v5015_v36 = vpop.f32.mrb[109].mxu0 }
 0x63f   : > { %v3602_v6 = vadd.f32 %v4961_v25, %v9699_v9  ;;  %v5016_v13 = vadd.f32 %v5015_v36, %v5014_v14  ;;  %v5017_v7 = vpop.f32.mrb[110].mxu0  ;;  %v3927_v25 = vpop.permute.xlu1 %3926 }
 0x640   : > { %v5018_v17 = vpop.f32.mrb[111].mxu0 }
 0x641   : > { %v9739_v49 = vadd.f32 %v5016_v13, %v3583_v10  ;;  %v5019_v23 = vadd.f32 %v5018_v17, %v5017_v7  ;;  %v4962_v24 = vpop.f32.mrb[124].mxu1 }
 0x642   : > { %v4963_v29 = vpop.f32.mrb[125].mxu1 }
 0x643   : > { %v9741_v3 = vadd.f32 %v5019_v23, %v3586_v19  ;;  %v4964_v21 = vadd.f32 %v4963_v29, %v4962_v24  ;;  %v4965_v5 = vpop.f32.mrb[126].mxu1  ;;  %v9748_v19 = vpop.permute.xlu1 %3936 }
 0x644   : > { %v4966_v4 = vpop.f32.mrb[127].mxu1  ;;  %v3932_v29 = vpop.permute.xlu0 %3931 }
 0x645   : > { %v3607_v12 = vadd.f32 %v4964_v21, %v9701_v15  ;;  %v5020_v8 = vpop.f32.mrb[112].mxu0 }
 0x646   : > { %v5021_v63 = vpop.f32.mrb[113].mxu0 }
 0x647   : > { %v5022_v11 = vadd.f32 %v5021_v63, %v5020_v8  ;;  %v5023_v27 = vpop.f32.mrb[114].mxu0  ;;  %v9754_v4 = vpop.permute.xlu1 %3941 }
 0x648   : > { %v5024_v9 = vpop.f32.mrb[115].mxu0  ;;  %v9756_v8 = vpop.permute.xlu0 %3946 }
 0x649   : > { %v9744_v14 = vadd.f32 %v5022_v11, %v3591_v0  ;;  %v5025_v10 = vadd.f32 %v5024_v9, %v5023_v27 }
 0x64b   : > { %v9746_v36 = vadd.f32 %v5025_v10, %v3594_v16  ;;  %v9760_v10 = vpop.permute.xlu1 %3951 }
 0x64d   : > { %v5026_v13 = vpop.f32.mrb[116].mxu0 }
 0x64e   : > { %v5027_v7 = vpop.f32.mrb[117].mxu0 }
 0x64f   : > { %v5028_v17 = vadd.f32 %v5027_v7, %v5026_v13  ;;  %v5029_v23 = vpop.f32.mrb[118].mxu0  ;;  %v9762_v13 = vpop.permute.xlu0 %3956 }
 0x650   : > { %v5030_v24 = vpop.f32.mrb[119].mxu0 }
 0x651   : > { %v9750_v15 = vadd.f32 %v5028_v17, %v3599_v33  ;;  %v5031_v21 = vadd.f32 %v5030_v24, %v5029_v23  ;;  %v9764_v33 = vpop.permute.xlu1 %3961 }
 0x653   : > { %v9752_v5 = vadd.f32 %v5031_v21, %v3602_v6  ;;  %v9766_v7 = vpop.permute.xlu0 %3966 }
 0x655   : > { %v5032_v0 = vpop.f32.mrb[120].mxu0  ;;  %v9768_v6 = vpop.permute.xlu1 %3971 }
 0x656   : > { %v5033_v16 = vpop.f32.mrb[121].mxu0 }
 0x657   : > { %v5034_v63 = vadd.f32 %v5033_v16, %v5032_v0  ;;  %v5035_v11 = vpop.f32.mrb[122].mxu0  ;;  %v9770_v17 = vpop.permute.xlu0 %3976 }
 0x658   : > { %v5036_v27 = vpop.f32.mrb[123].mxu0 }
 0x659   : > { %v9758_v9 = vadd.f32 %v5034_v63, %v3607_v12  ;;  %v9772_v23 = vpop.permute.xlu1 %3981 }
 0x65b   : > { %v9774_v24 = vpop.permute.xlu0 %3986 }
 0x65d   : > { %v9776_v21 = vpop.permute.xlu1 %3991 }
 0x65f   : > { %v9778_v0 = vpop.permute.xlu0 %3996 }
 0x661   : > { %v9781_v34 = vpop.permute.xlu1 %4001 }
 0x663   : > { %v9784_v38 = vpop.permute.xlu0 %4006 }
 0x670   : > { %v5054_v12 = vpop.f32.mrb[128].mxu1 }
 0x671   : > { %v5055_v16 = vpop.f32.mrb[129].mxu1 }
 0x672   : > { %v5056_v63 = vadd.f32 %v5055_v16, %v5054_v12  ;;  %v5057_v11 = vpop.f32.mrb[130].mxu1 }
 0x673   : > { %v5058_v27 = vpop.f32.mrb[131].mxu1 }
 0x674   : > { %v5059_v31 = vadd.f32 %v5058_v27, %v5057_v11  ;;  %v3751_v32 = vadd.f32 %v5056_v63, %v9709_v18  ;;  %v4029_v27 = vpop.permute.xlu1 %4028 }
 0x676   : > { %v3754_v35 = vadd.f32 %v5059_v31, %v9711_v30  ;;  %v4034_v30 = vpop.permute.xlu0 %4033 }
 0x678   : > { %v5060_v39 = vpop.f32.mrb[132].mxu1 }
 0x679   : > { %v3854_v40 = vpop.f32.mrb[124].mxu0  ;;  %v5061_v42 = vpop.f32.mrb[133].mxu1 }
 0x67a   : > { %v3855_v41 = vadd.f32 %v3854_v40, %v3751_v32  ;;  %v3856_v44 = vpop.f32.mrb[125].mxu0  ;;  %v5062_v45 = vadd.f32 %v5061_v42, %v5060_v39  ;;  %v5063_v46 = vpop.f32.mrb[134].mxu1 }
 0x67b   : > { %v3857_v47 = vpop.f32.mrb[126].mxu0  ;;  %v5064_v48 = vpop.f32.mrb[135].mxu1 }
 0x67c   : > { %v4009_v12 = vmul.f32 %v3927_v25, %v3855_v41  ;;  %v3858_v16 = vadd.f32 %v3857_v47, %v3754_v35  ;;  %v3859_v11 = vpop.f32.mrb[127].mxu0  ;;  %v5065_v18 = vadd.f32 %v5064_v48, %v5063_v46  ;;  %v3759_v63 = vadd.f32 %v5062_v45, %v9715_v2 }
 0x67d   : > { %v4039_v11 = vpop.permute.xlu1 %4038 }
 0x67e   : > { %v9787_v50 = vadd.f32 %v4029_v27, %v4009_v12  ;;  %v4010_v31 = vmul.f32 %v3932_v29, %v3858_v16  ;;  %v3762_v51 = vadd.f32 %v5065_v18, %v9717_v20 }
 0x680   : > { %v4128_v40 = vmin.f32 %v9787_v50, 0.0  ;;  %v9791_v44 = vadd.f32 %v4034_v30, %v4010_v31  ;;  %v5066_v42 = vpop.f32.mrb[136].mxu1  ;;  %v4044_v30 = vpop.permute.xlu0 %4043  ;;  %vm4213_vm0 = vcmp.gt.f32.partialorder %v9787_v50, 0.0 }
 0x681   : > { %v3862_v32 = vpop.f32.mrb[128].mxu0  ;;  %v5067_v39 = vpop.f32.mrb[137].mxu1 }
 0x682   : > { %v4145_v41 = vmul.f32 1.442695, %v4128_v40  ;;  %v4129_v47 = vmin.f32 %v9791_v44, 0.0  ;;  %v3863_v35 = vadd.f32 %v3862_v32, %v3759_v63  ;;  %v3864_v46 = vpop.f32.mrb[129].mxu0  ;;  %v5068_v48 = vadd.f32 %v5067_v39, %v5066_v42  ;;  %v5069_v45 = vpop.f32.mrb[138].mxu1 }
 0x683   : > { %v3865_v2 = vpop.f32.mrb[130].mxu0  ;;  %v5070_v12 = vpop.f32.mrb[139].mxu1  ;;  %vm4214_vm14 = vcmp.gt.f32.partialorder %v9791_v44, 0.0 }
 0x684   : > { %6529 = vpow2.f32 %v4145_v41  ;;  %v4147_v25 = vmul.f32 1.442695, %v4129_v47  ;;  %v4011_v29 = vmul.f32 %v9748_v19, %v3863_v35  ;;  %v3866_v20 = vadd.f32 %v3865_v2, %v3762_v51  ;;  %v3867_v16 = vpop.f32.mrb[131].mxu0 }
 0x685   : > { %v5071_v27 = vadd.f32 %v5070_v12, %v5069_v45  ;;  %v3767_v18 = vadd.f32 %v5068_v48, %v9721_v26 }
 0x686   : > { %6531 = vpow2.f32 %v4147_v25  ;;  %v9796_v31 = vadd.f32 %v4039_v11, %v4011_v29  ;;  %v4012_v63 = vmul.f32 %v9754_v4, %v3866_v20  ;;  %v4049_v20 = vpop.permute.xlu1 %4048 }
 0x687   : > { %v3770_v40 = vadd.f32 %v5071_v27, %v9723_v1 }
 0x688   : > { %v4130_v42 = vmin.f32 %v9796_v31, 0.0  ;;  %v9801_v32 = vadd.f32 %v4044_v30, %v4012_v63  ;;  %v5072_v19 = vpop.f32.mrb[140].mxu1  ;;  %v4054_v63 = vpop.permute.xlu0 %4053  ;;  %vm4215_vm15 = vcmp.gt.f32.partialorder %v9796_v31, 0.0 }
 0x689   : > { %v3870_v51 = vpop.f32.mrb[132].mxu0  ;;  %v5073_v39 = vpop.f32.mrb[141].mxu1 }
 0x68a   : > { %v4149_v41 = vmul.f32 1.442695, %v4130_v42  ;;  %v4131_v47 = vmin.f32 %v9801_v32, 0.0  ;;  %v3871_v35 = vadd.f32 %v3870_v51, %v3767_v18  ;;  %v3872_v26 = vpop.f32.mrb[133].mxu0  ;;  %v5074_v46 = vadd.f32 %v5073_v39, %v5072_v19  ;;  %v5075_v48 = vpop.f32.mrb[142].mxu1 }
 0x68b   : > { %v3873_v45 = vpop.f32.mrb[134].mxu0  ;;  %v5076_v25 = vpop.f32.mrb[143].mxu1  ;;  %vm4216_vm7 = vcmp.gt.f32.partialorder %v9801_v32, 0.0 }
 0x68c   : > { %6533 = vpow2.f32 %v4149_v41  ;;  %v4151_v4 = vmul.f32 1.442695, %v4131_v47  ;;  %v4013_v1 = vmul.f32 %v9756_v8, %v3871_v35  ;;  %v3874_v2 = vadd.f32 %v3873_v45, %v3770_v40  ;;  %v3875_v29 = vpop.f32.mrb[135].mxu0 }
 0x68d   : > { %v5077_v12 = vadd.f32 %v5076_v25, %v5075_v48  ;;  %v3775_v16 = vadd.f32 %v5074_v46, %v9727_v43 }
 0x68e   : > { %v6530_v11 = vpop.eup %6529  ;;  %6535 = vpow2.f32 %v4151_v4  ;;  %v9806_v27 = vadd.f32 %v4049_v20, %v4013_v1  ;;  %v4014_v18 = vmul.f32 %v9760_v10, %v3874_v2 }
 0x68f   : > { %v4531_v30 = vadd.f32 -1.0, %v6530_v11  ;;  %v3778_v42 = vadd.f32 %v5077_v12, %v9729_v28 }
 0x690   : > { %v6532_v19 = vpop.eup %6531  ;;  %v4132_v8 = vmin.f32 %v9806_v27, 0.0  ;;  %v9812_v40 = vadd.f32 %v4054_v63, %v4014_v18  ;;  %v5078_v47 = vpop.f32.mrb[144].mxu1  ;;  %vm4217_vm11 = vcmp.gt.f32.partialorder %v9806_v27, 0.0 }
 0x691   : > { %v4196_v51 = vmul.f32 1.6732632, %v4531_v30  ;;  %v4532_v41 = vadd.f32 -1.0, %v6532_v19  ;;  %v3878_v43 = vpop.f32.mrb[136].mxu0  ;;  %v5079_v26 = vpop.f32.mrb[145].mxu1 }
 0x692   : > { %v4153_v35 = vmul.f32 1.442695, %v4132_v8  ;;  %v4133_v39 = vmin.f32 %v9812_v40, 0.0  ;;  %v3879_v10 = vadd.f32 %v3878_v43, %v3775_v16  ;;  %v3880_v46 = vpop.f32.mrb[137].mxu0  ;;  %v5080_v45 = vadd.f32 %v5079_v26, %v5078_v47  ;;  %v5081_v4 = vpop.f32.mrb[146].mxu1 }
 0x693   : > { %v4230_v28 = vsel %vm4213_vm0, %v9787_v50, %v4196_v51  ;;  %v4197_v48 = vmul.f32 1.6732632, %v4532_v41  ;;  %v3881_v1 = vpop.f32.mrb[138].mxu0  ;;  %v5082_v20 = vpop.f32.mrb[147].mxu1  ;;  %vm4218_vm1 = vcmp.gt.f32.partialorder %v9812_v40, 0.0 }
 0x694   : > { %v4247_v2 = vmul.f32 1.050701, %v4230_v28  ;;  %6537 = vpow2.f32 %v4153_v35  ;;  %v4155_v25 = vmul.f32 1.442695, %v4133_v39  ;;  %v4015_v29 = vmul.f32 %v9762_v13, %v3879_v10  ;;  %v3883_v12 = vpop.f32.mrb[139].mxu0  ;;  %v4059_v16 = vpop.permute.xlu1 %4058 }
 0x695   : > { %v4231_v11 = vsel %vm4214_vm14, %v9791_v44, %v4197_v48  ;;  %v3882_v18 = vadd.f32 %v3881_v1, %v3778_v42  ;;  %v5083_v50 = vadd.f32 %v5082_v20, %v5081_v4  ;;  %v3783_v63 = vadd.f32 %v5080_v45, %v9733_v37  ;;  %v4064_v43 = vpop.permute.xlu0 %4063 }
 0x696   : > { %v6534_v30 = vpop.eup %6533  ;;  %4266 = vst [vmem:[%s9819_s7] sm:$0xff] %v4247_v2  ;;  %v4248_v19 = vmul.f32 1.050701, %v4231_v11  ;;  %6539 = vpow2.f32 %v4155_v25  ;;  %v9827_v8 = vadd.f32 %v4059_v16, %v4015_v29 }
 0x697   : > { %v4533_v51 = vadd.f32 -1.0, %v6534_v30  ;;  %v4016_v41 = vmul.f32 %v9764_v33, %v3882_v18  ;;  %v3786_v13 = vadd.f32 %v5083_v50, %v9735_v22 }
 0x698   : > { %v6536_v47 = vpop.eup %6535  ;;  %4267 = vst [vmem:[%s9819_s7 + $0x8] sm:$0xff] %v4248_v19  ;;  %v4134_v44 = vmin.f32 %v9827_v8, 0.0  ;;  %v5084_v37 = vpop.f32.mrb[148].mxu1  ;;  %vm4219_vm10 = vcmp.gt.f32.partialorder %v9827_v8, 0.0 }
 0x699   : > { %v4198_v42 = vmul.f32 1.6732632, %v4533_v51  ;;  %v4534_v35 = vadd.f32 -1.0, %v6536_v47  ;;  %v9833_v39 = vadd.f32 %v4064_v43, %v4016_v41  ;;  %v3886_v10 = vpop.f32.mrb[140].mxu0  ;;  %v5085_v28 = vpop.f32.mrb[149].mxu1 }
 0x69a   : > { %v4157_v26 = vmul.f32 1.442695, %v4134_v44  ;;  %v3887_v46 = vadd.f32 %v3886_v10, %v3783_v63  ;;  %v3888_v48 = vpop.f32.mrb[141].mxu0  ;;  %v5087_v4 = vpop.f32.mrb[150].mxu1  ;;  %v5086_v29 = vadd.f32 %v5085_v28, %v5084_v37 }
 0x69b   : > { %v4232_v33 = vsel %vm4215_vm15, %v9796_v31, %v4198_v42  ;;  %v4199_v22 = vmul.f32 1.6732632, %v4534_v35  ;;  %v4135_v45 = vmin.f32 %v9833_v39, 0.0  ;;  %v3889_v1 = vpop.f32.mrb[142].mxu0  ;;  %v5088_v20 = vpop.f32.mrb[151].mxu1  ;;  %vm4220_vm2 = vcmp.gt.f32.partialorder %v9833_v39, 0.0 }
 0x69c   : > { %v4249_v2 = vmul.f32 1.050701, %v4232_v33  ;;  %6541 = vpow2.f32 %v4157_v26  ;;  %v4017_v25 = vmul.f32 %v9766_v7, %v3887_v46  ;;  %v3891_v12 = vpop.f32.mrb[143].mxu0  ;;  %v4069_v16 = vpop.permute.xlu1 %4068  ;;  %v3890_v18 = vadd.f32 %v3889_v1, %v3786_v13 }
 0x69d   : > { %v4233_v11 = vsel %vm4216_vm7, %v9801_v32, %v4199_v22  ;;  %v4159_v31 = vmul.f32 1.442695, %v4135_v45  ;;  %v5089_v50 = vadd.f32 %v5088_v20, %v5087_v4  ;;  %v3791_v51 = vadd.f32 %v5086_v29, %v9739_v49  ;;  %v4074_v44 = vpop.permute.xlu0 %4073 }
 0x69e   : > { %v6538_v63 = vpop.eup %6537  ;;  %4268 = vst [vmem:[%s9819_s7 + $0x10] sm:$0xff] %v4249_v2  ;;  %v4250_v30 = vmul.f32 1.050701, %v4233_v11  ;;  %v9842_v19 = vadd.f32 %v4069_v16, %v4017_v25  ;;  %v4018_v7 = vmul.f32 %v9768_v6, %v3890_v18 }
 0x69f   : > { %v4535_v41 = vadd.f32 -1.0, %v6538_v63  ;;  %6543 = vpow2.f32 %v4159_v31  ;;  %v3794_v47 = vadd.f32 %v5089_v50, %v9741_v3 }
 0x6a0   : > { %v6540_v43 = vpop.eup %6539  ;;  %4269 = vst [vmem:[%s9819_s7 + $0x18] sm:$0xff] %v4250_v30  ;;  %v4136_v32 = vmin.f32 %v9842_v19, 0.0  ;;  %v9849_v35 = vadd.f32 %v4074_v44, %v4018_v7  ;;  %v5090_v37 = vpop.f32.mrb[152].mxu1  ;;  %vm4221_vm3 = vcmp.gt.f32.partialorder %v9842_v19, 0.0 }
 0x6a1   : > { %v4200_v13 = vmul.f32 1.6732632, %v4535_v41  ;;  %v4536_v42 = vadd.f32 -1.0, %v6540_v43  ;;  %v3894_v10 = vpop.f32.mrb[144].mxu0  ;;  %v5091_v46 = vpop.f32.mrb[153].mxu1 }
 0x6a2   : > { %v4161_v49 = vmul.f32 1.442695, %v4136_v32  ;;  %v3895_v26 = vadd.f32 %v3894_v10, %v3791_v51  ;;  %v3896_v28 = vpop.f32.mrb[145].mxu0  ;;  %v4137_v48 = vmin.f32 %v9849_v35, 0.0  ;;  %v5093_v33 = vpop.f32.mrb[154].mxu1  ;;  %v5092_v1 = vadd.f32 %v5091_v46, %v5090_v37 }
 0x6a3   : > { %v4234_v6 = vsel %vm4217_vm11, %v9806_v27, %v4200_v13  ;;  %v4201_v3 = vmul.f32 1.6732632, %v4536_v42  ;;  %v3897_v22 = vpop.f32.mrb[146].mxu0  ;;  %v5094_v2 = vpop.f32.mrb[155].mxu1  ;;  %vm4222_vm4 = vcmp.gt.f32.partialorder %v9849_v35, 0.0 }
 0x6a4   : > { %v4251_v45 = vmul.f32 1.050701, %v4234_v6  ;;  %6545 = vpow2.f32 %v4161_v49  ;;  %v4019_v4 = vmul.f32 %v9770_v17, %v3895_v26  ;;  %v3899_v25 = vpop.f32.mrb[147].mxu0  ;;  %v4079_v29 = vpop.permute.xlu1 %4078  ;;  %v4163_v27 = vmul.f32 1.442695, %v4137_v48 }
 0x6a5   : > { %v4235_v20 = vsel %vm4218_vm1, %v9812_v40, %v4201_v3  ;;  %v3898_v12 = vadd.f32 %v3897_v22, %v3794_v47  ;;  %v5095_v16 = vadd.f32 %v5094_v2, %v5093_v33  ;;  %v3799_v50 = vadd.f32 %v5092_v1, %v9744_v14  ;;  %v4084_v51 = vpop.permute.xlu0 %4083 }
 0x6a6   : > { %v6542_v11 = vpop.eup %6541  ;;  %4270 = vst [vmem:[%s9819_s7 + $0x20] sm:$0xff] %v4251_v45  ;;  %v4252_v31 = vmul.f32 1.050701, %v4235_v20  ;;  %v9858_v18 = vadd.f32 %v4079_v29, %v4019_v4  ;;  %6547 = vpow2.f32 %v4163_v27 }
 0x6a7   : > { %v4537_v63 = vadd.f32 -1.0, %v6542_v11  ;;  %v4020_v17 = vmul.f32 %v9772_v23, %v3898_v12  ;;  %v3802_v30 = vadd.f32 %v5095_v16, %v9746_v36 }
 0x6a8   : > { %4271 = vst [vmem:[%s9819_s7 + $0x28] sm:$0xff] %v4252_v31  ;;  %v4138_v40 = vmin.f32 %v9858_v18, 0.0  ;;  %v5096_v43 = vpop.f32.mrb[156].mxu1  ;;  %v4089_v33 = vpop.permute.xlu1 %4088  ;;  %vm4223_vm5 = vcmp.gt.f32.partialorder %v9858_v18, 0.0 }
 0x6a9   : > { %v6544_v41 = vpop.eup %6543  ;;  %v4202_v7 = vmul.f32 1.6732632, %v4537_v63  ;;  %v9865_v47 = vadd.f32 %v4084_v51, %v4020_v17  ;;  %v3902_v44 = vpop.f32.mrb[148].mxu0 }
 0x6aa   : > { %v4538_v32 = vadd.f32 -1.0, %v6544_v41  ;;  %v4165_v14 = vmul.f32 1.442695, %v4138_v40  ;;  %v3903_v13 = vadd.f32 %v3902_v44, %v3799_v50  ;;  %v5097_v42 = vpop.f32.mrb[157].mxu1  ;;  %v3904_v37 = vpop.f32.mrb[149].mxu0 }
 0x6ab   : > { %v4236_v23 = vsel %vm4219_vm10, %v9827_v8, %v4202_v7  ;;  %v4139_v36 = vmin.f32 %v9865_v47, 0.0  ;;  %v5098_v10 = vadd.f32 %v5097_v42, %v5096_v43  ;;  %v5099_v49 = vpop.f32.mrb[158].mxu1  ;;  %v3905_v26 = vpop.f32.mrb[150].mxu0  ;;  %vm4224_vm6 = vcmp.gt.f32.partialorder %v9865_v47, 0.0 }
 0x6ac   : > { %v4253_v46 = vmul.f32 1.050701, %v4236_v23  ;;  %v4203_v28 = vmul.f32 1.6732632, %v4538_v32  ;;  %6549 = vpow2.f32 %v4165_v14  ;;  %v4021_v6 = vmul.f32 %v9774_v24, %v3903_v13  ;;  %v5100_v3 = vpop.f32.mrb[159].mxu1  ;;  %v3907_v48 = vpop.f32.mrb[151].mxu0 }
 0x6ad   : > { %v4167_v22 = vmul.f32 1.442695, %v4139_v36  ;;  %v3906_v45 = vadd.f32 %v3905_v26, %v3802_v30  ;;  %v5101_v8 = vadd.f32 %v5100_v3, %v5099_v49  ;;  %v3807_v4 = vadd.f32 %v5098_v10, %v9750_v15  ;;  %v4094_v27 = vpop.permute.xlu0 %4093  ;;  %v4099_v37 = vpop.permute.xlu1 %4098 }
 0x6ae   : > { %v6546_v1 = vpop.eup %6545  ;;  %4272 = vst [vmem:[%s9819_s7 + $0x30] sm:$0xff] %v4253_v46  ;;  %v4237_v2 = vsel %vm4220_vm2, %v9833_v39, %v4203_v28  ;;  %v9877_v25 = vadd.f32 %v4089_v33, %v4021_v6 }
 0x6af   : > { %v4254_v29 = vmul.f32 1.050701, %v4237_v2  ;;  %v4539_v20 = vadd.f32 -1.0, %v6546_v1  ;;  %6551 = vpow2.f32 %v4167_v22  ;;  %v4022_v24 = vmul.f32 %v9776_v21, %v3906_v45 }
 0x6b0   : > { %v4140_v12 = vmin.f32 %v9877_v25, 0.0  ;;  %v3810_v16 = vadd.f32 %v5101_v8, %v9752_v5  ;;  %v6548_v11 = vpop.eup %6547  ;;  %v5102_v50 = vpop.f32.mrb[160].mxu1  ;;  %vm4225_vm8 = vcmp.gt.f32.partialorder %v9877_v25, 0.0 }
 0x6b1   : > { %4273 = vst [vmem:[%s9819_s7 + $0x38] sm:$0xff] %v4254_v29  ;;  %v4204_v15 = vmul.f32 1.6732632, %v4539_v20  ;;  %v9883_v31 = vadd.f32 %v4094_v27, %v4022_v24  ;;  %v3910_v63 = vpop.f32.mrb[152].mxu0  ;;  %v4540_v39 = vadd.f32 -1.0, %v6548_v11  ;;  %v5103_v51 = vpop.f32.mrb[161].mxu1 }
 0x6b2   : > { %v4169_v17 = vmul.f32 1.442695, %v4140_v12  ;;  %v3911_v30 = vadd.f32 %v3910_v63, %v3807_v4  ;;  %v3912_v40 = vpop.f32.mrb[153].mxu0  ;;  %v5104_v5 = vadd.f32 %v5103_v51, %v5102_v50  ;;  %v5105_v43 = vpop.f32.mrb[162].mxu1 }
 0x6b3   : > { %v4238_v21 = vsel %vm4221_vm3, %v9842_v19, %v4204_v15  ;;  %v4141_v41 = vmin.f32 %v9883_v31, 0.0  ;;  %v3913_v7 = vpop.f32.mrb[154].mxu0  ;;  %v4205_v32 = vmul.f32 1.6732632, %v4540_v39  ;;  %v5106_v42 = vpop.f32.mrb[163].mxu1  ;;  %vm4226_vm9 = vcmp.gt.f32.partialorder %v9883_v31, 0.0 }
 0x6b4   : > { %v4255_v44 = vmul.f32 1.050701, %v4238_v21  ;;  %6553 = vpow2.f32 %v4169_v17  ;;  %v4023_v14 = vmul.f32 %v9778_v0, %v3911_v30  ;;  %v3915_v13 = vpop.f32.mrb[155].mxu0  ;;  %v3914_v36 = vadd.f32 %v3913_v7, %v3810_v16  ;;  %v4104_v6 = vpop.permute.xlu0 %4103 }
 0x6b5   : > { %v4171_v23 = vmul.f32 1.442695, %v4141_v41  ;;  %v3815_v19 = vadd.f32 %v5104_v5, %v9758_v9  ;;  %v4239_v49 = vsel %vm4222_vm4, %v9849_v35, %v4205_v32  ;;  %v4109_v12 = vpop.permute.xlu1 %4108 }
 0x6b6   : > { %v6550_v10 = vpop.eup %6549  ;;  %4274 = vst [vmem:[%s9819_s7 + $0x40] sm:$0xff] %v4255_v44  ;;  %v4125_v26 = vadd.f32 %v4099_v37, %v4023_v14  ;;  %v4256_v46 = vmul.f32 1.050701, %v4239_v49  ;;  %v4024_v0 = vmul.f32 %v9781_v34, %v3914_v36 }
 0x6b7   : > { %v4541_v28 = vadd.f32 -1.0, %v6550_v10  ;;  %6555 = vpow2.f32 %v4171_v23 }
 0x6b8   : > { %v4142_v3 = vmin.f32 %v4125_v26, 0.0  ;;  %4275 = vst [vmem:[%s9819_s7 + $0x48] sm:$0xff] %v4256_v46  ;;  %v4126_v22 = vadd.f32 %v4104_v6, %v4024_v0  ;;  %vm4227_vm12 = vcmp.gt.f32.partialorder %v4125_v26, 0.0 }
 0x6b9   : > { %v6552_v48 = vpop.eup %6551  ;;  %v4206_v33 = vmul.f32 1.6732632, %v4541_v28  ;;  %v3918_v45 = vpop.f32.mrb[156].mxu0 }
 0x6ba   : > { %v4542_v9 = vadd.f32 -1.0, %v6552_v48  ;;  %v4173_v8 = vmul.f32 1.442695, %v4142_v3  ;;  %v3919_v4 = vadd.f32 %v3918_v45, %v3815_v19  ;;  %v3920_v35 = vpop.f32.mrb[157].mxu0  ;;  %v4143_v2 = vmin.f32 %v4126_v22, 0.0 }
 0x6bb   : > { %v4240_v1 = vsel %vm4223_vm5, %v9858_v18, %v4206_v33  ;;  %v3921_v29 = vpop.f32.mrb[158].mxu0  ;;  %vm4228_vm13 = vcmp.gt.f32.partialorder %v4126_v22, 0.0 }
 0x6bc   : > { %v4257_v20 = vmul.f32 1.050701, %v4240_v1  ;;  %v4207_v34 = vmul.f32 1.6732632, %v4542_v9  ;;  %6557 = vpow2.f32 %v4173_v8  ;;  %v4025_v24 = vmul.f32 %v9784_v38, %v3919_v4  ;;  %v3922_v27 = vpop.f32.mrb[159].mxu0 }
 0x6bd   : > { %v4175_v16 = vmul.f32 1.442695, %v4143_v2 }
 0x6be   : > { %v6554_v11 = vpop.eup %6553  ;;  %4276 = vst [vmem:[%s9819_s7 + $0x50] sm:$0xff] %v4257_v20  ;;  %v4241_v15 = vsel %vm4224_vm6, %v9865_v47, %v4207_v34  ;;  %v4127_v50 = vadd.f32 %v4109_v12, %v4025_v24 }
 0x6bf   : > { %v4258_v63 = vmul.f32 1.050701, %v4241_v15  ;;  %v4543_v18 = vadd.f32 -1.0, %v6554_v11  ;;  %6559 = vpow2.f32 %v4175_v16 }
 0x6c0   : > { %v4144_v39 = vmin.f32 %v4127_v50, 0.0  ;;  %vm4229_vm0 = vcmp.gt.f32.partialorder %v4127_v50, 0.0 }
 0x6c1   : > { %v6556_v17 = vpop.eup %6555  ;;  %4277 = vst [vmem:[%s9819_s7 + $0x58] sm:$0xff] %v4258_v63  ;;  %v4208_v30 = vmul.f32 1.6732632, %v4543_v18 }
 0x6c2   : > { %v4544_v38 = vadd.f32 -1.0, %v6556_v17  ;;  %v4177_v51 = vmul.f32 1.442695, %v4144_v39 }
 0x6c3   : > { %v4242_v40 = vsel %vm4225_vm8, %v9877_v25, %v4208_v30 }
 0x6c4   : > { %v4259_v21 = vmul.f32 1.050701, %v4242_v40  ;;  %v4209_v41 = vmul.f32 1.6732632, %v4544_v38  ;;  %6561 = vpow2.f32 %v4177_v51 }
 0x6c6   : > { %v6558_v47 = vpop.eup %6557  ;;  %4278 = vst [vmem:[%s9819_s7 + $0x60] sm:$0xff] %v4259_v21  ;;  %v4243_v5 = vsel %vm4226_vm9, %v9883_v31, %v4209_v41 }
 0x6c7   : > { %v4260_v7 = vmul.f32 1.050701, %v4243_v5  ;;  %v4545_v43 = vadd.f32 -1.0, %v6558_v47 }
 0x6c9   : > { %v6560_v44 = vpop.eup %6559  ;;  %4279 = vst [vmem:[%s9819_s7 + $0x68] sm:$0xff] %v4260_v7  ;;  %v4210_v32 = vmul.f32 1.6732632, %v4545_v43 }
 0x6ca   : > { %v4546_v14 = vadd.f32 -1.0, %v6560_v44 }
 0x6cb   : > { %v4244_v25 = vsel %vm4227_vm12, %v4125_v26, %v4210_v32 }
 0x6cc   : > { %v4261_v13 = vmul.f32 1.050701, %v4244_v25  ;;  %v4211_v42 = vmul.f32 1.6732632, %v4546_v14 }
 0x6ce   : > { %v6562_v37 = vpop.eup %6561  ;;  %4280 = vst [vmem:[%s9819_s7 + $0x70] sm:$0xff] %v4261_v13  ;;  %v4245_v23 = vsel %vm4228_vm13, %v4126_v22, %v4211_v42 }
 0x6cf   : > { %v4262_v36 = vmul.f32 1.050701, %v4245_v23  ;;  %v4547_v19 = vadd.f32 -1.0, %v6562_v37 }
 0x6d0   :  { %226 = sbr.rel (!%p224_p8) target bundleno = 113 (0x71), region = 53 }
 0x6d1   : > { %4281 = vst [vmem:[%s9819_s7 + $0x78] sm:$0xff] %v4262_v36  ;;  %v4212_v31 = vmul.f32 1.6732632, %v4547_v19 }
 0x6d3   : > { %v4246_v10 = vsel %vm4229_vm0, %v4127_v50, %v4212_v31 }
 0x6d4   : > { %v4263_v49 = vmul.f32 1.050701, %v4246_v10 }
 0x6d6   : > { %4282 = vst [vmem:[%s9819_s7 + $0x80] sm:$0xf] %v4263_v49 }
 0x6d7   :  { %4287 = vsyncpa [#allocation3], 1 }

</bundles_post_ra>
